<compile_context>
chip_gen: v6e
topology: v6e:2x2x1
jax: 0.10.0
libtpu: 0.0.40
codegen_flags: <defaults>
</compile_context>

<pallas_src>
import functools

import numpy as np
import jax
import jax.numpy as jnp
from jax import lax
from jax.experimental import pallas as pl
from jax.experimental.pallas import tpu as pltpu

EPS = 1e-5


def _round_up(x, m):
    return (x + m - 1) // m * m


def _vmem_capacity_bytes():
    try:
        info = pltpu.get_tpu_info()
        cap = getattr(info, "vmem_capacity_bytes", None)
        if cap:
            return int(cap)
    except Exception:
        pass
    return 64 * 1024 * 1024  # conservative default (v7x per-TC VMEM)


def _double_conv_kernel(xb_ref, w1_ref, b1_ref, w2_ref, b2_ref, mask_ref,
                        out_ref, acc1_ref, mid_ref, acc2_ref,
                        *, Wp, Hb, off1, D):
    # xb_ref  : (Rband, K1)  bf16  band input slab (flat rows incl. halo rows)
    # w1_ref  : (T1, K1, Cmid) bf16 ; b1_ref: (1, Cmid) f32   (BN folded)
    # w2_ref  : (9, Cmid, Cout) bf16 ; b2_ref: (1, Cout) f32
    # mask_ref: (M1b, 1) f32  constant per-band validity mask for conv1 rows
    # out_ref : (M2b, Cout)   band output, flat rows (2 garbage cols per row)
    # acc1/acc2: f32 scratch accumulators ; mid: bf16 padded intermediate
    M1b = (Hb + 2) * Wp
    M2b = Hb * Wp
    S = D + 1                       # 8-aligned start of the interior mid store
    Rm, Cmid = mid_ref.shape

    # ---- conv1: shifted dots accumulated into a f32 VMEM scratch (MXU acc) ----
    for t, off in enumerate(off1):
        a = jnp.dot(xb_ref[off:off + M1b, :], w1_ref[t],
                    preferred_element_type=jnp.float32)
        if t == 0:
            acc1_ref[...] = a
        else:
            acc1_ref[...] += a

    # BN/bias folded into w1/b1; the constant mask turns the out-of-image rows
    # and garbage x-columns into the zero padding of the intermediate.
    h1 = (jnp.maximum(acc1_ref[...] + b1_ref[...], 0.0) * mask_ref[...]
          ).astype(mid_ref.dtype)
    mid_ref[0:S, :] = jnp.zeros((S, Cmid), mid_ref.dtype)          # left/top halo
    mid_ref[S:S + M1b, :] = h1                                     # 8-aligned store
    mid_ref[S + M1b:Rm, :] = jnp.zeros((Rm - S - M1b, Cmid), mid_ref.dtype)

    # ---- conv2: 9 shifted dots over the padded bf16 intermediate ----
    for k in range(9):
        off = D + (k // 3) * Wp + (k % 3)
        a = jnp.dot(mid_ref[off:off + M2b, :], w2_ref[k],
                    preferred_element_type=jnp.float32)
        if k == 0:
            acc2_ref[...] = a
        else:
            acc2_ref[...] += a

    # Reshape-free store (lane-dense / unmasked when Cout % 128 == 0); the two
    # garbage columns per row are stripped by the wrapper.
    out_ref[...] = jnp.maximum(acc2_ref[...] + b2_ref[...], 0.0).astype(out_ref.dtype)


@functools.partial(jax.jit, static_argnames=("band_h", "fold_kx"))
def double_conv_pallas(x_nchw, params, *, band_h=None, fold_kx=None):
    (w1, b1, g1, be1, rm1, rv1, w2, b2, g2, be2, rm2, rv2) = params
    N, Cin, H, W = x_nchw.shape
    Cmid = w1.shape[0]
    Cout = w2.shape[0]
    Wp = W + 2

    if fold_kx is None:
        fold_kx = Cin <= 16                 # shallow-channel first conv -> fold kx into K
    K1 = 3 * Cin if fold_kx else Cin
    T1 = 3 if fold_kx else 9
    D = 7                                   # interior mid store starts at D+1 = 8 (aligned)

    # ---- per-generation VMEM sizing ----
    cap = _vmem_capacity_bytes()
    budget = int(cap * 0.6)

    def est_bytes(hb):
        m1 = (hb + 2) * Wp
        m2 = hb * Wp
        rb = _round_up((hb + 4) * Wp + 2, 8)
        rm = _round_up(D + m1 + 2, 8)
        blocks = 2 * rb * K1 * 2 + 2 * m2 * Cout * 4            # double-buffered in/out
        scratch = m1 * Cmid * 4 + rm * Cmid * 2 + m2 * Cout * 4
        consts = 2 * (T1 * K1 * Cmid + 9 * Cmid * Cout) * 2 + m1 * 4
        return blocks + scratch + consts

    if band_h is None:
        divs = [d for d in range(1, H + 1) if H % d == 0]
        valid = [d for d in divs if (d == H or (d * Wp) % 8 == 0)]
        fit = [d for d in valid if est_bytes(d) <= budget] or [min(valid)]
        deep = [d for d in fit if N * (H // d) >= 4]             # >= ~2 steps per TC (v7x)
        band_h = max(deep) if deep else max(fit)
    Hb = int(band_h)
    assert H % Hb == 0, "band_h must divide H"
    n_bands = H // Hb
    assert n_bands == 1 or (Hb * Wp) % 8 == 0, "band rows must be 8-aligned"

    M1b = (Hb + 2) * Wp                     # conv1 rows computed per band (incl. halo rows)
    M2b = Hb * Wp                           # conv2 output rows per band
    Rband = _round_up((Hb + 4) * Wp + 2, 8)
    Rm = _round_up(D + M1b + 2, 8)
    off1 = (tuple(ky * Wp for ky in range(3)) if fold_kx
            else tuple((k // 3) * Wp + (k % 3) for k in range(9)))
    assert M1b - 1 + max(off1) < Rband      # conv1 reads stay in-bounds
    assert D + M1b + 1 < Rm                 # conv2 reads stay in-bounds

    # ---- input prep: NHWC, pad (extra halo row top/bottom), kx-fold, band slabs ----
    x = jnp.transpose(x_nchw, (0, 2, 3, 1)).astype(jnp.bfloat16)
    xp = jnp.pad(x, ((0, 0), (2, 2), (1, 1), (0, 0)))            # (N, H+4, Wp, Cin)
    if fold_kx:
        x1 = jnp.pad(xp[:, :, 1:, :], ((0, 0), (0, 0), (0, 1), (0, 0)))
        x2 = jnp.pad(xp[:, :, 2:, :], ((0, 0), (0, 0), (0, 2), (0, 0)))
        xp = jnp.concatenate([xp, x1, x2], axis=-1)              # (N, H+4, Wp, 3*Cin)
    xf = xp.reshape(N, (H + 4) * Wp, K1)
    total_rows = (n_bands - 1) * Hb * Wp + Rband
    xf = jnp.pad(xf, ((0, 0), (0, total_rows - (H + 4) * Wp), (0, 0)))
    xb = jnp.stack([xf[:, j * Hb * Wp:j * Hb * Wp + Rband, :]
                    for j in range(n_bands)], axis=1)            # (N, n_bands, Rband, K1)

    # ---- fold eval-mode BN in f32, then cast weights to bf16 ----
    s1 = g1 / jnp.sqrt(rv1 + EPS)
    s2 = g2 / jnp.sqrt(rv2 + EPS)
    w1f = jnp.transpose(w1 * s1[:, None, None, None], (2, 3, 1, 0))   # (3,3,Cin,Cmid)
    w1t = (w1f.reshape(3, 3 * Cin, Cmid) if fold_kx
           else w1f.reshape(9, Cin, Cmid)).astype(jnp.bfloat16)
    w2t = jnp.transpose(w2 * s2[:, None, None, None], (2, 3, 1, 0)
                        ).reshape(9, Cmid, Cout).astype(jnp.bfloat16)
    b1f = ((b1 - rm1) * s1 + be1).reshape(1, Cmid).astype(jnp.float32)
    b2f = ((b2 - rm2) * s2 + be2).reshape(1, Cout).astype(jnp.float32)

    # ---- constant per-band validity mask (no in-kernel iota/modulo) ----
    r = np.arange(M1b)
    vv, xx = r // Wp, r % Wp
    mask = np.zeros((n_bands, M1b, 1), np.float32)
    for j in range(n_bands):
        y = j * Hb - 1 + vv                 # conv1 output row in image coords
        mask[j, :, 0] = ((xx < W) & (y >= 0) & (y < H)).astype(np.float32)
    mask = jnp.asarray(mask)

    kernel = functools.partial(_double_conv_kernel, Wp=Wp, Hb=Hb, off1=off1, D=D)

    out_flat = pl.pallas_call(
        kernel,
        out_shape=jax.ShapeDtypeStruct((N, H * Wp, Cout), jnp.float32),
        grid_spec=pltpu.PrefetchScalarGridSpec(
            num_scalar_prefetch=0,
            grid=(N, n_bands),
            in_specs=[
                pl.BlockSpec((None, None, Rband, K1), lambda i, j: (i, j, 0, 0)),
                pl.BlockSpec((T1, K1, Cmid), lambda i, j: (0, 0, 0)),
                pl.BlockSpec((1, Cmid), lambda i, j: (0, 0)),
                pl.BlockSpec((9, Cmid, Cout), lambda i, j: (0, 0, 0)),
                pl.BlockSpec((1, Cout), lambda i, j: (0, 0)),
                pl.BlockSpec((None, M1b, 1), lambda i, j: (j, 0, 0)),
            ],
            out_specs=pl.BlockSpec((None, M2b, Cout), lambda i, j: (i, j, 0)),
            scratch_shapes=[
                pltpu.VMEM((M1b, Cmid), jnp.float32),     # conv1 accumulator
                pltpu.VMEM((Rm, Cmid), jnp.bfloat16),     # padded intermediate
                pltpu.VMEM((M2b, Cout), jnp.float32),     # conv2 accumulator
            ],
        ),
        compiler_params=pltpu.CompilerParams(
            dimension_semantics=("parallel", "parallel"),
            vmem_limit_bytes=min(int(cap * 3 // 4), 112 * 1024 * 1024),
        ),
    )(xb, w1t, b1f, w2t, b2f, mask)

    # (N, H*Wp, Cout) -> drop 2 garbage columns per row -> NCHW.
    out = out_flat.reshape(N, H, Wp, Cout)[:, :, :W, :]
    return jnp.transpose(out, (0, 3, 1, 2))


def double_conv_ref(x_nchw, params):
    """Pure-JAX f32 reference (mirrors PyTorch eval-mode forward)."""
    (w1, b1, g1, be1, rm1, rv1, w2, b2, g2, be2, rm2, rv2) = params

    def block(x, w, b, g, be, rm, rv):
        y = lax.conv_general_dilated(
            x, w, window_strides=(1, 1), padding="SAME",
            dimension_numbers=("NCHW", "OIHW", "NCHW"))
        y = y + b[None, :, None, None]
        y = (y - rm[None, :, None, None]) / jnp.sqrt(rv + EPS)[None, :, None, None]
        y = y * g[None, :, None, None] + be[None, :, None, None]
        return jnp.maximum(y, 0.0)

    y = block(x_nchw, w1, b1, g1, be1, rm1, rv1)
    return block(y, w2, b2, g2, be2, rm2, rv2)


def init_params(key, in_channels, out_channels, mid_channels=None):
    if not mid_channels:
        mid_channels = out_channels
    ks = jax.random.split(key, 10)
    w1 = 0.1 * jax.random.normal(ks[0], (mid_channels, in_channels, 3, 3), jnp.float32)
    b1 = 0.05 * jax.random.normal(ks[1], (mid_channels,), jnp.float32)
    g1 = 1.0 + 0.1 * jax.random.normal(ks[2], (mid_channels,), jnp.float32)
    be1 = 0.1 * jax.random.normal(ks[3], (mid_channels,), jnp.float32)
    rm1 = 0.1 * jax.random.normal(ks[4], (mid_channels,), jnp.float32)
    rv1 = 1.0 + 0.1 * jax.random.uniform(ks[5], (mid_channels,), jnp.float32)
    w2 = 0.1 * jax.random.normal(ks[6], (out_channels, mid_channels, 3, 3), jnp.float32)
    b2 = 0.05 * jax.random.normal(ks[7], (out_channels,), jnp.float32)
    g2 = 1.0 + 0.1 * jax.random.normal(ks[8], (out_channels,), jnp.float32)
    be2 = 0.1 * jax.random.normal(ks[9], (out_channels,), jnp.float32)
    rm2 = jnp.zeros((out_channels,), jnp.float32)
    rv2 = jnp.ones((out_channels,), jnp.float32)
    return (w1, b1, g1, be1, rm1, rv1, w2, b2, g2, be2, rm2, rv2)


if __name__ == "__main__":
    key = jax.random.PRNGKey(0)
    kx, kp = jax.random.split(key)

    N, Cin, Cout, H, W = 2, 4, 8, 16, 16
    x = jax.random.normal(kx, (N, Cin, H, W), jnp.float32)      # NCHW, like PyTorch
    params = init_params(kp, Cin, Cout)

    ref = jax.block_until_ready(double_conv_ref(x, params))

    # auto band selection (multi-band + kx-folded conv1), single whole-image
    # band, and the unfolded 9-tap conv1 path.
    for kwargs in ({}, {"band_h": H}, {"band_h": 8, "fold_kx": False}):
        out = jax.block_until_ready(double_conv_pallas(x, params, **kwargs))
        assert out.shape == (N, Cout, H, W), (kwargs, out.shape)
        err = float(jnp.max(jnp.abs(out - ref)))
        assert jnp.allclose(out, ref, rtol=3e-2, atol=6e-2), (kwargs, err)

    print("KERNEL_OK")
</pallas_src>

<mosaic_0001>
module attributes {stable_mosaic.version = 11 : i64} {
  func.func @_double_conv_kernel(%arg0: i32, %arg1: i32, %arg2: memref<1x1x224x12xbf16, #tpu.memory_space<vmem>>, %arg3: memref<3x12x8xbf16, #tpu.memory_space<vmem>>, %arg4: memref<1x8xf32, #tpu.memory_space<vmem>>, %arg5: memref<9x8x8xbf16, #tpu.memory_space<vmem>>, %arg6: memref<1x8xf32, #tpu.memory_space<vmem>>, %arg7: memref<1x180x1xf32, #tpu.memory_space<vmem>>, %arg8: memref<1x144x8xf32, #tpu.memory_space<vmem>>, %arg9: memref<180x8xf32, #tpu.memory_space<vmem>>, %arg10: memref<192x8xbf16, #tpu.memory_space<vmem>>, %arg11: memref<144x8xf32, #tpu.memory_space<vmem>>) attributes {dimension_semantics = [#tpu.dimension_semantics<parallel>, #tpu.dimension_semantics<parallel>], iteration_bounds = array<i64: 2, 2>, scalar_prefetch = 0 : i64, scratch_operands = 3 : i64, tpu.core_type = #tpu.core_type<tc>, window_params = [{transform_indices = @transform_0, window_bounds = array<i64: 1, 1, 224, 12>}, {pipeline_mode = #tpu.pipeline_mode<synchronous>, transform_indices = @transform_1, window_bounds = array<i64: 3, 12, 8>}, {pipeline_mode = #tpu.pipeline_mode<synchronous>, transform_indices = @transform_2, window_bounds = array<i64: 1, 8>}, {pipeline_mode = #tpu.pipeline_mode<synchronous>, transform_indices = @transform_3, window_bounds = array<i64: 9, 8, 8>}, {pipeline_mode = #tpu.pipeline_mode<synchronous>, transform_indices = @transform_4, window_bounds = array<i64: 1, 8>}, {transform_indices = @transform_5, window_bounds = array<i64: 1, 180, 1>}, {transform_indices = @transform_6, window_bounds = array<i64: 1, 144, 8>}]} {
    %c0 = arith.constant 0 : index
    %c0_0 = arith.constant 0 : index
    %c0_1 = arith.constant 0 : index
    %c0_2 = arith.constant 0 : index
    %0 = vector.load %arg2[%c0, %c0_0, %c0_1, %c0_2] : memref<1x1x224x12xbf16, #tpu.memory_space<vmem>>, vector<1x1x180x12xbf16>
    %1 = vector.shape_cast %0 : vector<1x1x180x12xbf16> to vector<180x12xbf16>
    %c0_3 = arith.constant 0 : index
    %c0_4 = arith.constant 0 : index
    %c0_5 = arith.constant 0 : index
    %2 = vector.load %arg3[%c0_3, %c0_4, %c0_5] : memref<3x12x8xbf16, #tpu.memory_space<vmem>>, vector<1x12x8xbf16>
    %3 = vector.shape_cast %2 : vector<1x12x8xbf16> to vector<12x8xbf16>
    %cst = arith.constant dense<0.000000e+00> : vector<180x8xf32>
    %4 = tpu.matmul %1, %3, %cst {dimension_numbers = #tpu.dot_dimension_numbers<[1], [0], [0], [1], [0, 0, 1, 1], [], []>} : vector<180x12xbf16>, vector<12x8xbf16>, vector<180x8xf32> -> vector<180x8xf32>
    %c0_6 = arith.constant 0 : index
    %c0_7 = arith.constant 0 : index
    %5 = vector.load %arg9[%c0_6, %c0_7] : memref<180x8xf32, #tpu.memory_space<vmem>>, vector<180x8xf32>
    tpu.vector_store %arg9[%c0_6, %c0_7], %4 {strides = array<i32>} : memref<180x8xf32, #tpu.memory_space<vmem>>, vector<180x8xf32>,
    %c0_8 = arith.constant 0 : index
    %c0_9 = arith.constant 0 : index
    %c18 = arith.constant 18 : index
    %c0_10 = arith.constant 0 : index
    %6 = vector.load %arg2[%c0_8, %c0_9, %c18, %c0_10] : memref<1x1x224x12xbf16, #tpu.memory_space<vmem>>, vector<1x1x180x12xbf16>
    %7 = vector.shape_cast %6 : vector<1x1x180x12xbf16> to vector<180x12xbf16>
    %c1 = arith.constant 1 : index
    %c0_11 = arith.constant 0 : index
    %c0_12 = arith.constant 0 : index
    %8 = vector.load %arg3[%c1, %c0_11, %c0_12] : memref<3x12x8xbf16, #tpu.memory_space<vmem>>, vector<1x12x8xbf16>
    %9 = vector.shape_cast %8 : vector<1x12x8xbf16> to vector<12x8xbf16>
    %cst_13 = arith.constant dense<0.000000e+00> : vector<180x8xf32>
    %10 = tpu.matmul %7, %9, %cst_13 {dimension_numbers = #tpu.dot_dimension_numbers<[1], [0], [0], [1], [0, 0, 1, 1], [], []>} : vector<180x12xbf16>, vector<12x8xbf16>, vector<180x8xf32> -> vector<180x8xf32>
    %c0_14 = arith.constant 0 : index
    %c0_15 = arith.constant 0 : index
    %11 = vector.load %arg9[%c0_14, %c0_15] : memref<180x8xf32, #tpu.memory_space<vmem>>, vector<180x8xf32>
    %12 = arith.addf %11, %10 : vector<180x8xf32>
    %c0_16 = arith.constant 0 : index
    %c0_17 = arith.constant 0 : index
    %13 = vector.load %arg9[%c0_16, %c0_17] : memref<180x8xf32, #tpu.memory_space<vmem>>, vector<180x8xf32>
    tpu.vector_store %arg9[%c0_16, %c0_17], %12 {strides = array<i32>} : memref<180x8xf32, #tpu.memory_space<vmem>>, vector<180x8xf32>,
    %c0_18 = arith.constant 0 : index
    %c0_19 = arith.constant 0 : index
    %c36 = arith.constant 36 : index
    %c0_20 = arith.constant 0 : index
    %14 = vector.load %arg2[%c0_18, %c0_19, %c36, %c0_20] : memref<1x1x224x12xbf16, #tpu.memory_space<vmem>>, vector<1x1x180x12xbf16>
    %15 = vector.shape_cast %14 : vector<1x1x180x12xbf16> to vector<180x12xbf16>
    %c2 = arith.constant 2 : index
    %c0_21 = arith.constant 0 : index
    %c0_22 = arith.constant 0 : index
    %16 = vector.load %arg3[%c2, %c0_21, %c0_22] : memref<3x12x8xbf16, #tpu.memory_space<vmem>>, vector<1x12x8xbf16>
    %17 = vector.shape_cast %16 : vector<1x12x8xbf16> to vector<12x8xbf16>
    %cst_23 = arith.constant dense<0.000000e+00> : vector<180x8xf32>
    %18 = tpu.matmul %15, %17, %cst_23 {dimension_numbers = #tpu.dot_dimension_numbers<[1], [0], [0], [1], [0, 0, 1, 1], [], []>} : vector<180x12xbf16>, vector<12x8xbf16>, vector<180x8xf32> -> vector<180x8xf32>
    %c0_24 = arith.constant 0 : index
    %c0_25 = arith.constant 0 : index
    %19 = vector.load %arg9[%c0_24, %c0_25] : memref<180x8xf32, #tpu.memory_space<vmem>>, vector<180x8xf32>
    %20 = arith.addf %19, %18 : vector<180x8xf32>
    %c0_26 = arith.constant 0 : index
    %c0_27 = arith.constant 0 : index
    %21 = vector.load %arg9[%c0_26, %c0_27] : memref<180x8xf32, #tpu.memory_space<vmem>>, vector<180x8xf32>
    tpu.vector_store %arg9[%c0_26, %c0_27], %20 {strides = array<i32>} : memref<180x8xf32, #tpu.memory_space<vmem>>, vector<180x8xf32>,
    %c0_28 = arith.constant 0 : index
    %c0_29 = arith.constant 0 : index
    %22 = vector.load %arg9[%c0_28, %c0_29] : memref<180x8xf32, #tpu.memory_space<vmem>>, vector<180x8xf32>
    %c0_30 = arith.constant 0 : index
    %c0_31 = arith.constant 0 : index
    %23 = vector.load %arg4[%c0_30, %c0_31] : memref<1x8xf32, #tpu.memory_space<vmem>>, vector<1x8xf32>
    %24 = vector.broadcast %23 : vector<1x8xf32> to vector<180x8xf32>
    %25 = arith.addf %22, %24 : vector<180x8xf32>
    %cst_32 = arith.constant 0.000000e+00 : f32
    %26 = vector.broadcast %cst_32 : f32 to vector<180x8xf32>
    %27 = arith.maximumf %25, %26 : vector<180x8xf32>
    %c0_33 = arith.constant 0 : index
    %c0_34 = arith.constant 0 : index
    %c0_35 = arith.constant 0 : index
    %28 = vector.load %arg7[%c0_33, %c0_34, %c0_35] : memref<1x180x1xf32, #tpu.memory_space<vmem>>, vector<1x180x1xf32>
    %29 = vector.shape_cast %28 : vector<1x180x1xf32> to vector<180x1xf32>
    %30 = vector.broadcast %29 : vector<180x1xf32> to vector<180x8xf32>
    %31 = arith.mulf %27, %30 : vector<180x8xf32>
    %32 = arith.truncf %31 : vector<180x8xf32> to vector<180x8xbf16>
    %cst_36 = arith.constant 0.000000e+00 : bf16
    %33 = vector.broadcast %cst_36 : bf16 to vector<8x8xbf16>
    %c0_37 = arith.constant 0 : index
    %c0_38 = arith.constant 0 : index
    %34 = vector.load %arg10[%c0_37, %c0_38] : memref<192x8xbf16, #tpu.memory_space<vmem>>, vector<8x8xbf16>
    tpu.vector_store %arg10[%c0_37, %c0_38], %33 {strides = array<i32>} : memref<192x8xbf16, #tpu.memory_space<vmem>>, vector<8x8xbf16>,
    %c8 = arith.constant 8 : index
    %c0_39 = arith.constant 0 : index
    %35 = vector.load %arg10[%c8, %c0_39] : memref<192x8xbf16, #tpu.memory_space<vmem>>, vector<180x8xbf16>
    tpu.vector_store %arg10[%c8, %c0_39], %32 {strides = array<i32>} : memref<192x8xbf16, #tpu.memory_space<vmem>>, vector<180x8xbf16>,
    %cst_40 = arith.constant 0.000000e+00 : bf16
    %36 = vector.broadcast %cst_40 : bf16 to vector<4x8xbf16>
    %c188 = arith.constant 188 : index
    %c0_41 = arith.constant 0 : index
    %37 = vector.load %arg10[%c188, %c0_41] : memref<192x8xbf16, #tpu.memory_space<vmem>>, vector<4x8xbf16>
    tpu.vector_store %arg10[%c188, %c0_41], %36 {strides = array<i32>} : memref<192x8xbf16, #tpu.memory_space<vmem>>, vector<4x8xbf16>,
    %c7 = arith.constant 7 : index
    %c0_42 = arith.constant 0 : index
    %38 = vector.load %arg10[%c7, %c0_42] : memref<192x8xbf16, #tpu.memory_space<vmem>>, vector<144x8xbf16>
    %c0_43 = arith.constant 0 : index
    %c0_44 = arith.constant 0 : index
    %c0_45 = arith.constant 0 : index
    %39 = vector.load %arg5[%c0_43, %c0_44, %c0_45] : memref<9x8x8xbf16, #tpu.memory_space<vmem>>, vector<1x8x8xbf16>
    %40 = vector.shape_cast %39 : vector<1x8x8xbf16> to vector<8x8xbf16>
    %cst_46 = arith.constant dense<0.000000e+00> : vector<144x8xf32>
    %41 = tpu.matmul %38, %40, %cst_46 {dimension_numbers = #tpu.dot_dimension_numbers<[1], [0], [0], [1], [0, 0, 1, 1], [], []>} : vector<144x8xbf16>, vector<8x8xbf16>, vector<144x8xf32> -> vector<144x8xf32>
    %c0_47 = arith.constant 0 : index
    %c0_48 = arith.constant 0 : index
    %42 = vector.load %arg11[%c0_47, %c0_48] : memref<144x8xf32, #tpu.memory_space<vmem>>, vector<144x8xf32>
    tpu.vector_store %arg11[%c0_47, %c0_48], %41 {strides = array<i32>} : memref<144x8xf32, #tpu.memory_space<vmem>>, vector<144x8xf32>,
    %c8_49 = arith.constant 8 : index
    %c0_50 = arith.constant 0 : index
    %43 = vector.load %arg10[%c8_49, %c0_50] : memref<192x8xbf16, #tpu.memory_space<vmem>>, vector<144x8xbf16>
    %c1_51 = arith.constant 1 : index
    %c0_52 = arith.constant 0 : index
    %c0_53 = arith.constant 0 : index
    %44 = vector.load %arg5[%c1_51, %c0_52, %c0_53] : memref<9x8x8xbf16, #tpu.memory_space<vmem>>, vector<1x8x8xbf16>
    %45 = vector.shape_cast %44 : vector<1x8x8xbf16> to vector<8x8xbf16>
    %cst_54 = arith.constant dense<0.000000e+00> : vector<144x8xf32>
    %46 = tpu.matmul %43, %45, %cst_54 {dimension_numbers = #tpu.dot_dimension_numbers<[1], [0], [0], [1], [0, 0, 1, 1], [], []>} : vector<144x8xbf16>, vector<8x8xbf16>, vector<144x8xf32> -> vector<144x8xf32>
    %c0_55 = arith.constant 0 : index
    %c0_56 = arith.constant 0 : index
    %47 = vector.load %arg11[%c0_55, %c0_56] : memref<144x8xf32, #tpu.memory_space<vmem>>, vector<144x8xf32>
    %48 = arith.addf %47, %46 : vector<144x8xf32>
    %c0_57 = arith.constant 0 : index
    %c0_58 = arith.constant 0 : index
    %49 = vector.load %arg11[%c0_57, %c0_58] : memref<144x8xf32, #tpu.memory_space<vmem>>, vector<144x8xf32>
    tpu.vector_store %arg11[%c0_57, %c0_58], %48 {strides = array<i32>} : memref<144x8xf32, #tpu.memory_space<vmem>>, vector<144x8xf32>,
    %c9 = arith.constant 9 : index
    %c0_59 = arith.constant 0 : index
    %50 = vector.load %arg10[%c9, %c0_59] : memref<192x8xbf16, #tpu.memory_space<vmem>>, vector<144x8xbf16>
    %c2_60 = arith.constant 2 : index
    %c0_61 = arith.constant 0 : index
    %c0_62 = arith.constant 0 : index
    %51 = vector.load %arg5[%c2_60, %c0_61, %c0_62] : memref<9x8x8xbf16, #tpu.memory_space<vmem>>, vector<1x8x8xbf16>
    %52 = vector.shape_cast %51 : vector<1x8x8xbf16> to vector<8x8xbf16>
    %cst_63 = arith.constant dense<0.000000e+00> : vector<144x8xf32>
    %53 = tpu.matmul %50, %52, %cst_63 {dimension_numbers = #tpu.dot_dimension_numbers<[1], [0], [0], [1], [0, 0, 1, 1], [], []>} : vector<144x8xbf16>, vector<8x8xbf16>, vector<144x8xf32> -> vector<144x8xf32>
    %c0_64 = arith.constant 0 : index
    %c0_65 = arith.constant 0 : index
    %54 = vector.load %arg11[%c0_64, %c0_65] : memref<144x8xf32, #tpu.memory_space<vmem>>, vector<144x8xf32>
    %55 = arith.addf %54, %53 : vector<144x8xf32>
    %c0_66 = arith.constant 0 : index
    %c0_67 = arith.constant 0 : index
    %56 = vector.load %arg11[%c0_66, %c0_67] : memref<144x8xf32, #tpu.memory_space<vmem>>, vector<144x8xf32>
    tpu.vector_store %arg11[%c0_66, %c0_67], %55 {strides = array<i32>} : memref<144x8xf32, #tpu.memory_space<vmem>>, vector<144x8xf32>,
    %c25 = arith.constant 25 : index
    %c0_68 = arith.constant 0 : index
    %57 = vector.load %arg10[%c25, %c0_68] : memref<192x8xbf16, #tpu.memory_space<vmem>>, vector<144x8xbf16>
    %c3 = arith.constant 3 : index
    %c0_69 = arith.constant 0 : index
    %c0_70 = arith.constant 0 : index
    %58 = vector.load %arg5[%c3, %c0_69, %c0_70] : memref<9x8x8xbf16, #tpu.memory_space<vmem>>, vector<1x8x8xbf16>
    %59 = vector.shape_cast %58 : vector<1x8x8xbf16> to vector<8x8xbf16>
    %cst_71 = arith.constant dense<0.000000e+00> : vector<144x8xf32>
    %60 = tpu.matmul %57, %59, %cst_71 {dimension_numbers = #tpu.dot_dimension_numbers<[1], [0], [0], [1], [0, 0, 1, 1], [], []>} : vector<144x8xbf16>, vector<8x8xbf16>, vector<144x8xf32> -> vector<144x8xf32>
    %c0_72 = arith.constant 0 : index
    %c0_73 = arith.constant 0 : index
    %61 = vector.load %arg11[%c0_72, %c0_73] : memref<144x8xf32, #tpu.memory_space<vmem>>, vector<144x8xf32>
    %62 = arith.addf %61, %60 : vector<144x8xf32>
    %c0_74 = arith.constant 0 : index
    %c0_75 = arith.constant 0 : index
    %63 = vector.load %arg11[%c0_74, %c0_75] : memref<144x8xf32, #tpu.memory_space<vmem>>, vector<144x8xf32>
    tpu.vector_store %arg11[%c0_74, %c0_75], %62 {strides = array<i32>} : memref<144x8xf32, #tpu.memory_space<vmem>>, vector<144x8xf32>,
    %c26 = arith.constant 26 : index
    %c0_76 = arith.constant 0 : index
    %64 = vector.load %arg10[%c26, %c0_76] : memref<192x8xbf16, #tpu.memory_space<vmem>>, vector<144x8xbf16>
    %c4 = arith.constant 4 : index
    %c0_77 = arith.constant 0 : index
    %c0_78 = arith.constant 0 : index
    %65 = vector.load %arg5[%c4, %c0_77, %c0_78] : memref<9x8x8xbf16, #tpu.memory_space<vmem>>, vector<1x8x8xbf16>
    %66 = vector.shape_cast %65 : vector<1x8x8xbf16> to vector<8x8xbf16>
    %cst_79 = arith.constant dense<0.000000e+00> : vector<144x8xf32>
    %67 = tpu.matmul %64, %66, %cst_79 {dimension_numbers = #tpu.dot_dimension_numbers<[1], [0], [0], [1], [0, 0, 1, 1], [], []>} : vector<144x8xbf16>, vector<8x8xbf16>, vector<144x8xf32> -> vector<144x8xf32>
    %c0_80 = arith.constant 0 : index
    %c0_81 = arith.constant 0 : index
    %68 = vector.load %arg11[%c0_80, %c0_81] : memref<144x8xf32, #tpu.memory_space<vmem>>, vector<144x8xf32>
    %69 = arith.addf %68, %67 : vector<144x8xf32>
    %c0_82 = arith.constant 0 : index
    %c0_83 = arith.constant 0 : index
    %70 = vector.load %arg11[%c0_82, %c0_83] : memref<144x8xf32, #tpu.memory_space<vmem>>, vector<144x8xf32>
    tpu.vector_store %arg11[%c0_82, %c0_83], %69 {strides = array<i32>} : memref<144x8xf32, #tpu.memory_space<vmem>>, vector<144x8xf32>,
    %c27 = arith.constant 27 : index
    %c0_84 = arith.constant 0 : index
    %71 = vector.load %arg10[%c27, %c0_84] : memref<192x8xbf16, #tpu.memory_space<vmem>>, vector<144x8xbf16>
    %c5 = arith.constant 5 : index
    %c0_85 = arith.constant 0 : index
    %c0_86 = arith.constant 0 : index
    %72 = vector.load %arg5[%c5, %c0_85, %c0_86] : memref<9x8x8xbf16, #tpu.memory_space<vmem>>, vector<1x8x8xbf16>
    %73 = vector.shape_cast %72 : vector<1x8x8xbf16> to vector<8x8xbf16>
    %cst_87 = arith.constant dense<0.000000e+00> : vector<144x8xf32>
    %74 = tpu.matmul %71, %73, %cst_87 {dimension_numbers = #tpu.dot_dimension_numbers<[1], [0], [0], [1], [0, 0, 1, 1], [], []>} : vector<144x8xbf16>, vector<8x8xbf16>, vector<144x8xf32> -> vector<144x8xf32>
    %c0_88 = arith.constant 0 : index
    %c0_89 = arith.constant 0 : index
    %75 = vector.load %arg11[%c0_88, %c0_89] : memref<144x8xf32, #tpu.memory_space<vmem>>, vector<144x8xf32>
    %76 = arith.addf %75, %74 : vector<144x8xf32>
    %c0_90 = arith.constant 0 : index
    %c0_91 = arith.constant 0 : index
    %77 = vector.load %arg11[%c0_90, %c0_91] : memref<144x8xf32, #tpu.memory_space<vmem>>, vector<144x8xf32>
    tpu.vector_store %arg11[%c0_90, %c0_91], %76 {strides = array<i32>} : memref<144x8xf32, #tpu.memory_space<vmem>>, vector<144x8xf32>,
    %c43 = arith.constant 43 : index
    %c0_92 = arith.constant 0 : index
    %78 = vector.load %arg10[%c43, %c0_92] : memref<192x8xbf16, #tpu.memory_space<vmem>>, vector<144x8xbf16>
    %c6 = arith.constant 6 : index
    %c0_93 = arith.constant 0 : index
    %c0_94 = arith.constant 0 : index
    %79 = vector.load %arg5[%c6, %c0_93, %c0_94] : memref<9x8x8xbf16, #tpu.memory_space<vmem>>, vector<1x8x8xbf16>
    %80 = vector.shape_cast %79 : vector<1x8x8xbf16> to vector<8x8xbf16>
    %cst_95 = arith.constant dense<0.000000e+00> : vector<144x8xf32>
    %81 = tpu.matmul %78, %80, %cst_95 {dimension_numbers = #tpu.dot_dimension_numbers<[1], [0], [0], [1], [0, 0, 1, 1], [], []>} : vector<144x8xbf16>, vector<8x8xbf16>, vector<144x8xf32> -> vector<144x8xf32>
    %c0_96 = arith.constant 0 : index
    %c0_97 = arith.constant 0 : index
    %82 = vector.load %arg11[%c0_96, %c0_97] : memref<144x8xf32, #tpu.memory_space<vmem>>, vector<144x8xf32>
    %83 = arith.addf %82, %81 : vector<144x8xf32>
    %c0_98 = arith.constant 0 : index
    %c0_99 = arith.constant 0 : index
    %84 = vector.load %arg11[%c0_98, %c0_99] : memref<144x8xf32, #tpu.memory_space<vmem>>, vector<144x8xf32>
    tpu.vector_store %arg11[%c0_98, %c0_99], %83 {strides = array<i32>} : memref<144x8xf32, #tpu.memory_space<vmem>>, vector<144x8xf32>,
    %c44 = arith.constant 44 : index
    %c0_100 = arith.constant 0 : index
    %85 = vector.load %arg10[%c44, %c0_100] : memref<192x8xbf16, #tpu.memory_space<vmem>>, vector<144x8xbf16>
    %c7_101 = arith.constant 7 : index
    %c0_102 = arith.constant 0 : index
    %c0_103 = arith.constant 0 : index
    %86 = vector.load %arg5[%c7_101, %c0_102, %c0_103] : memref<9x8x8xbf16, #tpu.memory_space<vmem>>, vector<1x8x8xbf16>
    %87 = vector.shape_cast %86 : vector<1x8x8xbf16> to vector<8x8xbf16>
    %cst_104 = arith.constant dense<0.000000e+00> : vector<144x8xf32>
    %88 = tpu.matmul %85, %87, %cst_104 {dimension_numbers = #tpu.dot_dimension_numbers<[1], [0], [0], [1], [0, 0, 1, 1], [], []>} : vector<144x8xbf16>, vector<8x8xbf16>, vector<144x8xf32> -> vector<144x8xf32>
    %c0_105 = arith.constant 0 : index
    %c0_106 = arith.constant 0 : index
    %89 = vector.load %arg11[%c0_105, %c0_106] : memref<144x8xf32, #tpu.memory_space<vmem>>, vector<144x8xf32>
    %90 = arith.addf %89, %88 : vector<144x8xf32>
    %c0_107 = arith.constant 0 : index
    %c0_108 = arith.constant 0 : index
    %91 = vector.load %arg11[%c0_107, %c0_108] : memref<144x8xf32, #tpu.memory_space<vmem>>, vector<144x8xf32>
    tpu.vector_store %arg11[%c0_107, %c0_108], %90 {strides = array<i32>} : memref<144x8xf32, #tpu.memory_space<vmem>>, vector<144x8xf32>,
    %c45 = arith.constant 45 : index
    %c0_109 = arith.constant 0 : index
    %92 = vector.load %arg10[%c45, %c0_109] : memref<192x8xbf16, #tpu.memory_space<vmem>>, vector<144x8xbf16>
    %c8_110 = arith.constant 8 : index
    %c0_111 = arith.constant 0 : index
    %c0_112 = arith.constant 0 : index
    %93 = vector.load %arg5[%c8_110, %c0_111, %c0_112] : memref<9x8x8xbf16, #tpu.memory_space<vmem>>, vector<1x8x8xbf16>
    %94 = vector.shape_cast %93 : vector<1x8x8xbf16> to vector<8x8xbf16>
    %cst_113 = arith.constant dense<0.000000e+00> : vector<144x8xf32>
    %95 = tpu.matmul %92, %94, %cst_113 {dimension_numbers = #tpu.dot_dimension_numbers<[1], [0], [0], [1], [0, 0, 1, 1], [], []>} : vector<144x8xbf16>, vector<8x8xbf16>, vector<144x8xf32> -> vector<144x8xf32>
    %c0_114 = arith.constant 0 : index
    %c0_115 = arith.constant 0 : index
    %96 = vector.load %arg11[%c0_114, %c0_115] : memref<144x8xf32, #tpu.memory_space<vmem>>, vector<144x8xf32>
    %97 = arith.addf %96, %95 : vector<144x8xf32>
    %c0_116 = arith.constant 0 : index
    %c0_117 = arith.constant 0 : index
    %98 = vector.load %arg11[%c0_116, %c0_117] : memref<144x8xf32, #tpu.memory_space<vmem>>, vector<144x8xf32>
    tpu.vector_store %arg11[%c0_116, %c0_117], %97 {strides = array<i32>} : memref<144x8xf32, #tpu.memory_space<vmem>>, vector<144x8xf32>,
    %c0_118 = arith.constant 0 : index
    %c0_119 = arith.constant 0 : index
    %99 = vector.load %arg11[%c0_118, %c0_119] : memref<144x8xf32, #tpu.memory_space<vmem>>, vector<144x8xf32>
    %c0_120 = arith.constant 0 : index
    %c0_121 = arith.constant 0 : index
    %100 = vector.load %arg6[%c0_120, %c0_121] : memref<1x8xf32, #tpu.memory_space<vmem>>, vector<1x8xf32>
    %101 = vector.broadcast %100 : vector<1x8xf32> to vector<144x8xf32>
    %102 = arith.addf %99, %101 : vector<144x8xf32>
    %cst_122 = arith.constant 0.000000e+00 : f32
    %103 = vector.broadcast %cst_122 : f32 to vector<144x8xf32>
    %104 = arith.maximumf %102, %103 : vector<144x8xf32>
    %c0_123 = arith.constant 0 : index
    %c0_124 = arith.constant 0 : index
    %c0_125 = arith.constant 0 : index
    %105 = vector.load %arg8[%c0_123, %c0_124, %c0_125] : memref<1x144x8xf32, #tpu.memory_space<vmem>>, vector<1x144x8xf32>
    %106 = vector.shape_cast %105 : vector<1x144x8xf32> to vector<144x8xf32>
    %107 = vector.shape_cast %104 : vector<144x8xf32> to vector<1x144x8xf32>
    tpu.vector_store %arg8[%c0_123, %c0_124, %c0_125], %107 {strides = array<i32>} : memref<1x144x8xf32, #tpu.memory_space<vmem>>, vector<1x144x8xf32>,
    return
  }
  func.func @transform_0(%arg0: i32, %arg1: i32) -> (i32, i32, i32, i32) {
    %c0_i32 = arith.constant 0 : i32
    %c0_i32_0 = arith.constant 0 : i32
    %c0_i32_1 = arith.constant 0 : i32
    return %arg0, %arg1, %c0_i32, %c0_i32_0 : i32, i32, i32, i32
  }
  func.func @transform_1(%arg0: i32, %arg1: i32) -> (i32, i32, i32) {
    %c0_i32 = arith.constant 0 : i32
    %c0_i32_0 = arith.constant 0 : i32
    %c0_i32_1 = arith.constant 0 : i32
    %c0_i32_2 = arith.constant 0 : i32
    return %c0_i32, %c0_i32_0, %c0_i32_1 : i32, i32, i32
  }
  func.func @transform_2(%arg0: i32, %arg1: i32) -> (i32, i32) {
    %c0_i32 = arith.constant 0 : i32
    %c0_i32_0 = arith.constant 0 : i32
    %c0_i32_1 = arith.constant 0 : i32
    return %c0_i32, %c0_i32_0 : i32, i32
  }
  func.func @transform_3(%arg0: i32, %arg1: i32) -> (i32, i32, i32) {
    %c0_i32 = arith.constant 0 : i32
    %c0_i32_0 = arith.constant 0 : i32
    %c0_i32_1 = arith.constant 0 : i32
    %c0_i32_2 = arith.constant 0 : i32
    return %c0_i32, %c0_i32_0, %c0_i32_1 : i32, i32, i32
  }
  func.func @transform_4(%arg0: i32, %arg1: i32) -> (i32, i32) {
    %c0_i32 = arith.constant 0 : i32
    %c0_i32_0 = arith.constant 0 : i32
    %c0_i32_1 = arith.constant 0 : i32
    return %c0_i32, %c0_i32_0 : i32, i32
  }
  func.func @transform_5(%arg0: i32, %arg1: i32) -> (i32, i32, i32) {
    %c0_i32 = arith.constant 0 : i32
    %c0_i32_0 = arith.constant 0 : i32
    %c0_i32_1 = arith.constant 0 : i32
    return %arg1, %c0_i32, %c0_i32_0 : i32, i32, i32
  }
  func.func @transform_6(%arg0: i32, %arg1: i32) -> (i32, i32, i32) {
    %c0_i32 = arith.constant 0 : i32
    %c0_i32_0 = arith.constant 0 : i32
    return %arg0, %arg1, %c0_i32 : i32, i32, i32
  }
}

</mosaic_0001>

<bundles_post_ra>
// kernel: double_conv_pallas.1
= control target key start
LH: loop header
LB: loop body
LE: loop exit
PB: predicated region body
PF: predicated region fallthrough
CT: control target
= control target key end

     0   :  { %s5788_s21 = smov 0   ;;  %s5790_s22 = smov 0   ;;  %s6880_s0 = inlined_call_operand.vmem [shape: bf16[2,2,224,12], index: 0, kind: input, shape index: {}]   ;;  %s6881_s1 = inlined_call_operand.vmem [shape: bf16[3,12,8], index: 1, kind: input, shape index: {}]   ;;  %s6882_s2 = inlined_call_operand.vmem [shape: f32[1,8], index: 2, kind: input, shape index: {}]   ;;  %s6883_s3 = inlined_call_operand.vmem [shape: bf16[9,8,8], index: 3, kind: input, shape index: {}]   ;;  %s6884_s4 = inlined_call_operand.vmem [shape: f32[1,8], index: 4, kind: input, shape index: {}]   ;;  %s6885_s5 = inlined_call_operand.vmem [shape: f32[2,180,1], index: 5, kind: input, shape index: {}]   ;;  %s6886_s6 = inlined_call_operand.vmem [shape: f32[2,288,8], index: 6, kind: output, shape index: {}]  }
   0x1   :  { %s5792_s23 = smov 0   ;;  %s5794_s24 = smov 0  }
   0x2   :  { %s5796_s25 = smov 0  }
   0x3 LB: > { %s25_s26 = sadd.s32 1, %s5740_s23  ;;  %s28_s27 = sadd.s32 1, %s5744_s24  ;;  %s5748_s25 = sphi %s5796_s25, %s16_s25   ;;  %s5744_s24 = sphi %s5794_s24, %s6890_s24   ;;  %s5740_s23 = sphi %s5792_s23, %s6889_s23   ;;  %s5736_s22 = sphi %s5790_s22, %s6888_s22   ;;  %s5732_s21 = sphi %s5788_s21, %s6887_s21  }
   0x4   : > { %p26_p0 = scmp.ge.s32.totalorder %s25_s26, 2  ;;  %p4667_p1 = scmp.ge.s32.totalorder %s5748_s25, 1 }
   0x5   : > { %p242_p2 = scmp.lt.s32.totalorder %s5748_s25, 5 }
   0x6   : > { %s6892_s26 = smov (%p26_p0, %s25_s26), 0  ;;  %s6894_s27 = smov (!%p26_p0, %s28_s27), %s5744_s24 }
   0x7   : > { %p243_p3 = pnand %p4667_p1, %p242_p2  ;;  %p30_p4 = scmp.ge.s32.totalorder %s6894_s27, 2 }
   0x8   : > { %p285_p5 = scmp.lt.s32.totalorder (!%p243_p3), %s5736_s22, 1  ;;  %p287_p6 = scmp.lt.s32.totalorder (!%p243_p3), %s5732_s21, 1 }
   0x9   : > { %s6896_s27 = smov (%p30_p4, %s6894_s27), 0  ;;  %246 = sbr.rel (%p243_p3) target bundleno = 882 (0x372), region = 44 }
   0xe   : > { %v5582_v0 = vld [vmem:[%s6881_s1] sm:$0x3f]   ;;  %vm435_vm0 = vcmask 1045504   ;;  %v5584_v2 = vld [vmem:[%s6881_s1 + $0x8] sm:$0x3f]   ;;  %s6898_s22 = smov (!%p285_p5, %s5736_s22), 1 }
   0xf   : > { %5529 = vmatprep.subr.msk.bf16.mxu0 %vm435_vm0, %v5582_v0  ;;  %v437_v1 = vsel %vm435_vm0, %v5582_v0, 0  ;;  %s288_s8 = scalar_select %p287_p6, %s5732_s21, 1  ;;  %v742_v3 = vsel %vm435_vm0, %v5584_v2, 0  ;;  %5531 = vmatprep.subr.msk.bf16.mxu1 %vm435_vm0, %v5584_v2  ;;  %vm590_vm1 = vcmask 60416   ;;  %v5750_v4 = vmov 0  }
  0x10   : > { %5108 = vmatpush3.bf16.msra.mxu0 %v437_v1  ;;  %s5534_s9 = smul.u32 56, %s6898_s22  ;;  %5528 = vmatpush3.bf16.msra.mxu1 %v742_v3  ;;  %1539 = vst.msk [vmem:[#allocation3] sm:$0xf] %vm590_vm1, %v5750_v4  ;;  %vm398_vm2 = vcmask 97280   ;;  %v5850_v5 = vld [vmem:[%s6881_s1 + $0x10] sm:$0x3f]  }
  0x11   : > { %5530 = vmatprep.subr.msk.bf16.mxu0 %vm435_vm0, %v5584_v2  ;;  %5580 = vset.pattern.permute.xlu0 %v5750_v4  ;;  %s5533_s10 = smul.u32 28, %s288_s8  ;;  %vm676_vm3 = vcmask 1046528   ;;  %vm1832_vm4 = vcmask 1043456   ;;  %vm5752_vm5 = vmmov 0   ;;  %vm567_vm6 = vcmask 64512  }
  0x12   : > { %5581 = vset.pattern.permute.xlu1 %v5750_v4  ;;  %s5535_s11 = smul.u32 184, %s288_s8  ;;  %vm1715_vm7 = vsmask.f32 4352  ;;  %vm1643_vm8 = vcmask 58368   ;;  %vm2282_vm9 = vsmask.f32 7424 }
  0x13   : > { %s291_s12 = sadd.s32 %s5534_s9, %s5533_s10  ;;  %vm3228_vm10 = vsmask.f32 6400  ;;  %vm4200_vm11 = vsmask.f32 5376  ;;  %s299_s8 = smul.u32 18, %s5732_s21 }
  0x14   : > { %s4668_s13 = sshll.u32 %s291_s12, 2  ;;  %s5840_s16 = scalar_lea.vmem %s6885_s5, %s5535_s11 }
  0x15   : > { %s5845_s19 = scalar_lea.vmem %s6880_s0, %s4668_s13  ;;  %v1366_v6 = vld [vmem:[%s5840_s16] sm:$0xff]  ;;  %v1368_v7 = vld [vmem:[%s5840_s16 + $0x10] sm:$0xff]  ;;  %v1367_v9 = vld [vmem:[%s5840_s16 + $0x8] sm:$0xff]  ;;  %p302_p7 = scmp.lt.s32.totalorder %s299_s8, 35 }
  0x16   : > { %v5583_v8 = vld [vmem:[%s5845_s19] sm:$0xff]   ;;  %1391 = vperm.xlu0 %5580, %v1366_v6   ;;  %1401 = vperm.xlu1 %5581, %v1368_v7   ;;  %v5585_v10 = vld [vmem:[%s5845_s19 + $0x8] sm:$0xff]   ;;  %v5586_v11 = vld [vmem:[%s5845_s19 + $0x10] sm:$0xff]   ;;  %v1091_v6 = vsel %vm435_vm0, %v5850_v5, 0  ;;  %s5536_s9 = smul.u32 36, %s6898_s22 }
  0x17   : > { %5109 = vmatprep.mubr.msk.bf16.mxu0 %vm398_vm2, %v5583_v8  ;;  %v5587_v12 = vld [vmem:[%s5845_s19 + $0x18] sm:$0xff]   ;;  %v5590_v14 = vld [vmem:[%s5845_s19 + $0x20] sm:$0xff]   ;;  %v5592_v18 = vld [vmem:[%s5845_s19 + $0x28] sm:$0xff]   ;;  %s6900_s8 = smov (!%p302_p7, %s299_s8), 35 }
  0x18   : > { %5110 = vmatmul.mubr.msk.bf16.vlgmr.msra.gmra.mxu0 %vm398_vm2, %v5585_v10  ;;  %v5865_v13 = vld [vmem:[%s5845_s19 + $0x18] sm:$0xff]   ;;  %v5588_v15 = vld [vmem:[%s5845_s19 + $0x20] sm:$0xff]   ;;  %v682_v17 = vrot.slane %v5590_v14, 1  ;;  %v684_v20 = vrot.slane %v5592_v18, 1  ;;  %v5594_v21 = vld [vmem:[%s5845_s19 + $0x30] sm:$0xff]   ;;  %s305_s21 = sadd.s32 %s5536_s9, %s6900_s8 }
  0x19   : > { %5134 = vmatpush3.bf16.msra.mxu0 %v742_v3  ;;  %5113 = vmatprep.mubr.msk.bf16.mxu0 %vm398_vm2, %v5586_v11  ;;  %v680_v16 = vrot.slane %v5865_v13, 1  ;;  %v686_v23 = vrot.slane %v5594_v21, 1  ;;  %v5596_v24 = vld [vmem:[%s5845_s19 + $0x38] sm:$0xff]   ;;  %v5591_v25 = vld [vmem:[%s5845_s19 + $0x28] sm:$0xff]   ;;  %v5598_v28 = vld [vmem:[%s5845_s19 + $0x40] sm:$0xff]   ;;  %s4670_s11 = sshll.u32 %s305_s21, 3 }
  0x1a   : > { %5532 = vmatprep.subr.msk.bf16.mxu0 %vm435_vm0, %v5850_v5  ;;  %1396 = vperm.xlu0 %5580, %v1367_v9   ;;  %v685_v22 = vsel %vm676_vm3, %v682_v17, %v684_v20  ;;  %v688_v27 = vrot.slane %v5596_v24, 1  ;;  %v5593_v29 = vld [vmem:[%s5845_s19 + $0x30] sm:$0xff]   ;;  %v690_v30 = vrot.slane %v5598_v28, 1  ;;  %v5600_v32 = vld [vmem:[%s5845_s19 + $0x48] sm:$0xff]   ;;  %v5595_v35 = vld [vmem:[%s5845_s19 + $0x38] sm:$0xff]   ;;  %s6795_s14 = scalar_lea.vmem %s6886_s6, %s4670_s11 }
  0x1b   : > { %v683_v19 = vsel %vm676_vm3, %v680_v16, %v682_v17  ;;  %v687_v26 = vsel %vm676_vm3, %v684_v20, %v686_v23  ;;  %v5602_v34 = vld [vmem:[%s5845_s19 + $0x50] sm:$0xff]   ;;  %v692_v36 = vrot.slane %v5600_v32, 1  ;;  %v5597_v37 = vld [vmem:[%s5845_s19 + $0x40] sm:$0xff]   ;;  %v5604_v39 = vld [vmem:[%s5845_s19 + $0x58] sm:$0xff]  }
  0x1c   : > { %5139 = vmatprep.mubr.msk.bf16.mxu1 %vm398_vm2, %v683_v19  ;;  %v689_v31 = vsel %vm676_vm3, %v686_v23, %v688_v27  ;;  %v691_v33 = vsel %vm676_vm3, %v688_v27, %v690_v30  ;;  %v694_v38 = vrot.slane %v5602_v34, 1  ;;  %v5607_v40 = vld [vmem:[%s5845_s19 + $0x60] ss:$0 sps:$4 sm:$0x77]   ;;  %v5599_v43 = vld [vmem:[%s5845_s19 + $0x48] sm:$0xff]   ;;  %v5601_v44 = vld [vmem:[%s5845_s19 + $0x50] sm:$0xff]  }
  0x1d   : > { %5140 = vmatmul.mubr.msk.bf16.vlgmr.msra.gmra.mxu1 %vm398_vm2, %v685_v22  ;;  %v693_v41 = vsel %vm676_vm3, %v690_v30, %v692_v36  ;;  %v696_v45 = vrot.slane %v5604_v39, 1  ;;  %v5606_v46 = vld [vmem:[%s5845_s19 + $0x10] sm:$0xff]   ;;  %v698_v47 = vrot.slane %v5607_v40, 1  ;;  %v5605_v48 = vld [vmem:[%s5845_s19 + $0x8] sm:$0xfe]   ;;  %v1370_v51 = vld [vmem:[%s5840_s16 + $0x20] sm:$0xff] }
  0x1e   : > { %5143 = vmatprep.mubr.msk.bf16.mxu1 %vm398_vm2, %v687_v26  ;;  %v695_v42 = vsel %vm676_vm3, %v692_v36, %v694_v38  ;;  %v1369_v52 = vld [vmem:[%s5840_s16 + $0x18] sm:$0xff]  ;;  %v677_v53 = vrot.slane %v5605_v48, 1  ;;  %v678_v54 = vrot.slane %v5606_v46, 1  ;;  %1411 = vperm.xlu0 %5580, %v1370_v51   ;;  %v1372_v55 = vld [vmem:[%s5840_s16 + $0x30] sm:$0xff]  ;;  %v1371_v56 = vld [vmem:[%s5840_s16 + $0x28] sm:$0xff]  ;;  %v5751_v48 = vmov 0.0  }
  0x1f   : > { %v697_v49 = vsel %vm676_vm3, %v694_v38, %v696_v45  ;;  %v699_v50 = vsel %vm676_vm3, %v696_v45, %v698_v47  ;;  %1406 = vperm.xlu1 %5581, %v1369_v52   ;;  %v5603_v57 = vld [vmem:[%s5845_s19 + $0x58] ss:$0 sps:$4 sm:$0x33]   ;;  %v5609_v59 = vld [vmem:[%s5845_s19 + $0x10] sm:$0xfc]   ;;  %v1374_v61 = vld [vmem:[%s5840_s16 + $0x40] sm:$0xff]  ;;  %5185 = vmatprep.subr.bf16.mxu1 %v5751_v48 }
  0x20   : > { %5114 = vmatmul.mubr.msk.bf16.gmra.mxu0 %vm398_vm2, %v5587_v12  ;;  %v679_v58 = vsel %vm676_vm3, %v677_v53, %v678_v54  ;;  %v5610_v60 = vld [vmem:[%s5845_s19 + $0x18] sm:$0xff]   ;;  %v1026_v63 = vrot.slane %v5609_v59, 2  ;;  %v1376_v1 = vld [vmem:[%s5840_s16 + $0x50] sm:$0xff]  ;;  %v1375_v2 = vld [vmem:[%s5840_s16 + $0x48] sm:$0xff]  ;;  %v681_v3 = vsel %vm676_vm3, %v678_v54, %v680_v16 }
  0x21   : > { %5117 = vmatprep.mubr.msk.bf16.mxu0 %vm398_vm2, %v5588_v15  ;;  %v1373_v62 = vld [vmem:[%s5840_s16 + $0x38] sm:$0xff]  ;;  %v1027_v0 = vrot.slane %v5610_v60, 2  ;;  %v5611_v4 = vld [vmem:[%s5845_s19 + $0x20] sm:$0xff]   ;;  %v5612_v8 = vld [vmem:[%s5845_s19 + $0x28] sm:$0xff]  }
  0x22   : > { %1421 = vperm.xlu0 %5580, %v1372_v55   ;;  %v1378_v9 = vld [vmem:[%s5840_s16 + $0x60] sm:$0xff]  ;;  %v1377_v10 = vld [vmem:[%s5840_s16 + $0x58] sm:$0xff]  ;;  %v1029_v11 = vrot.slane %v5611_v4, 2  ;;  %v1031_v12 = vrot.slane %v5612_v8, 2  ;;  %v1380_v5 = vld [vmem:[%s5840_s16 + $0x70] sm:$0xff] }
  0x23   : > { %1416 = vperm.xlu1 %5581, %v1371_v56   ;;  %v1028_v7 = vsel %vm435_vm0, %v1026_v63, %v1027_v0  ;;  %v1379_v13 = vld [vmem:[%s5840_s16 + $0x68] sm:$0xff]  ;;  %v5613_v15 = vld [vmem:[%s5845_s19 + $0x30] sm:$0xff]   ;;  %v5614_v17 = vld [vmem:[%s5845_s19 + $0x38] sm:$0xff]  }
  0x24   : > { %v1030_v14 = vsel %vm435_vm0, %v1027_v0, %v1029_v11  ;;  %v1032_v16 = vsel %vm435_vm0, %v1029_v11, %v1031_v12  ;;  %v1382_v18 = vld [vmem:[%s5840_s16 + $0x80] sm:$0xff]  ;;  %v1381_v19 = vld [vmem:[%s5840_s16 + $0x78] sm:$0xff]  ;;  %v1033_v20 = vrot.slane %v5613_v15, 2  ;;  %v1035_v21 = vrot.slane %v5614_v17, 2  ;;  %v1384_v22 = vld [vmem:[%s5840_s16 + $0x90] sm:$0xff] }
  0x25   : > { %5144 = vmatmul.mubr.msk.bf16.gmra.mxu1 %vm398_vm2, %v689_v31  ;;  %v1383_v23 = vld [vmem:[%s5840_s16 + $0x88] sm:$0xff]  ;;  %v1386_v28 = vld [vmem:[%s5840_s16 + $0xa0] sm:$0xff]  ;;  %v1388_v32 = vld [vmem:[%s5840_s16 + $0xb0] sm:$0xf] }
  0x26   : > { %5147 = vmatprep.mubr.msk.bf16.mxu1 %vm398_vm2, %v691_v33  ;;  %1431 = vperm.xlu0 %5580, %v1374_v61   ;;  %v1034_v24 = vsel %vm435_vm0, %v1031_v12, %v1033_v20  ;;  %v1036_v26 = vsel %vm435_vm0, %v1033_v20, %v1035_v21  ;;  %v5616_v27 = vld [vmem:[%s5845_s19 + $0x48] sm:$0xff]   ;;  %v4793_v51 = vld [vmem:[%s6883_s3 + $0x4] sm:$0xf] }
  0x27   : > { %1426 = vperm.xlu1 %5581, %v1373_v62   ;;  %v1039_v31 = vrot.slane %v5616_v27, 2  ;;  %v1387_v33 = vld [vmem:[%s5840_s16 + $0xa8] sm:$0xff]  ;;  %v2052_v52 = vsel %vm1832_vm4, %v4793_v51, 0 }
  0x28   : > { %5118 = vmatmul.mubr.msk.bf16.gmra.mxu0 %vm398_vm2, %v5591_v25  ;;  %v5615_v25 = vld [vmem:[%s5845_s19 + $0x40] sm:$0xff]  }
  0x29   : > { %5121 = vmatprep.mubr.msk.bf16.mxu0 %vm398_vm2, %v5593_v29  ;;  %v1385_v29 = vld [vmem:[%s5840_s16 + $0x98] sm:$0xff]  ;;  %v1037_v30 = vrot.slane %v5615_v25, 2 }
  0x2a   : > { %1441 = vperm.xlu0 %5580, %v1376_v1  }
  0x2b   : > { %1436 = vperm.xlu1 %5581, %v1375_v2   ;;  %v1038_v34 = vsel %vm435_vm0, %v1035_v21, %v1037_v30  ;;  %v1040_v36 = vsel %vm435_vm0, %v1037_v30, %v1039_v31 }
  0x2d   : > { %5148 = vmatmul.mubr.msk.bf16.gmra.mxu1 %vm398_vm2, %v693_v41  ;;  %v5619_v41 = vld [vmem:[%s5845_s19 + $0x60] sm:$0xff]  }
  0x2e   : > { %5151 = vmatprep.mubr.msk.bf16.mxu1 %vm398_vm2, %v695_v42  ;;  %1451 = vperm.xlu0 %5580, %v1378_v9  }
  0x2f   : > { %1446 = vperm.xlu1 %5581, %v1377_v10  }
  0x30   : > { %5122 = vmatmul.mubr.msk.bf16.gmra.mxu0 %vm398_vm2, %v5595_v35  ;;  %v5617_v35 = vld [vmem:[%s5845_s19 + $0x50] sm:$0xff]  }
  0x31   : > { %5125 = vmatprep.mubr.msk.bf16.mxu0 %vm398_vm2, %v5597_v37  ;;  %v5618_v37 = vld [vmem:[%s5845_s19 + $0x58] sm:$0xff]   ;;  %v1041_v38 = vrot.slane %v5617_v35, 2 }
  0x32   : > { %1461 = vperm.xlu0 %5580, %v1380_v5   ;;  %v1043_v39 = vrot.slane %v5618_v37, 2 }
  0x33   : > { %1456 = vperm.xlu1 %5581, %v1379_v13   ;;  %v1042_v40 = vsel %vm435_vm0, %v1039_v31, %v1041_v38 }
  0x34   : > { %v1044_v42 = vsel %vm435_vm0, %v1041_v38, %v1043_v39 }
  0x35   : > { %5152 = vmatmul.mubr.msk.bf16.gmra.mxu1 %vm398_vm2, %v697_v49  ;;  %v1666_v49 = vld [vmem:[%s6883_s3] sm:$0xf] }
  0x36   : > { %5155 = vmatprep.mubr.msk.bf16.mxu1 %vm398_vm2, %v699_v50  ;;  %1471 = vperm.xlu0 %5580, %v1382_v18   ;;  %v1834_v50 = vsel %vm1832_vm4, %v1666_v49, 0 }
  0x37   : > { %1466 = vperm.xlu1 %5581, %v1381_v19   ;;  %5186 = vmatpush3.bf16.msra.mxu1 %v1834_v50 }
  0x38   : > { %5126 = vmatmul.mubr.msk.bf16.gmra.mxu0 %vm398_vm2, %v5599_v43  ;;  %v5620_v43 = vld [vmem:[%s5845_s19 + $0x68] ss:$0 sps:$4 sm:$0xff]   ;;  %5261 = vmatprep.subr.bf16.mxu1 %v5751_v48 }
  0x39   : > { %5129 = vmatprep.mubr.msk.bf16.mxu0 %vm398_vm2, %v5601_v44  ;;  %v1045_v44 = vrot.slane %v5619_v41, 2  ;;  %v1047_v45 = vrot.slane %v5620_v43, 2 }
  0x3a   : > { %1481 = vperm.xlu0 %5580, %v1384_v22  }
  0x3b   : > { %1476 = vperm.xlu1 %5581, %v1383_v23   ;;  %v1046_v46 = vsel %vm435_vm0, %v1043_v39, %v1045_v44 }
  0x3d   : > { %5156 = vmatmul.mubr.msk.bf16.gmra.mxu1 %vm398_vm2, %v698_v47  ;;  %v1048_v47 = vsel %vm435_vm0, %v1045_v44, %v1047_v45 }
  0x3e   : > { %1491 = vperm.xlu0 %5580, %v1386_v28   ;;  %5187 = vmatprep.mubr.msk.bf16.mxu1 %vm5752_vm5, %v5751_v48 }
  0x3f   : > { %1486 = vperm.xlu1 %5581, %v1385_v29  }
  0x40   : > { %5130 = vmatmul.mubr.msk.bf16.gmra.mxu0 %vm398_vm2, %v5603_v57 }
  0x41   : > { %5135 = vmatprep.mubr.msk.bf16.mxu0 %vm398_vm2, %v679_v58 }
  0x42   : > { %1501 = vperm.xlu0 %5580, %v1388_v32  }
  0x43   : > { %1496 = vperm.xlu1 %5581, %v1387_v33  }
  0x48   : > { %5136 = vmatmul.mubr.msk.bf16.vlgmr.msra.gmra.mxu0 %vm398_vm2, %v681_v3 }
  0x49   : > { %5160 = vmatpush3.bf16.msra.mxu0 %v1091_v6  ;;  %5161 = vmatprep.mubr.msk.bf16.mxu0 %vm398_vm2, %v1028_v7 }
  0x4a   : > { %5223 = vmatprep.subr.bf16.mxu0 %v5751_v48 }
  0x50   : > { %5162 = vmatmul.mubr.msk.bf16.vlgmr.msra.gmra.mxu0 %vm398_vm2, %v1030_v14 }
  0x51   : > { %5165 = vmatprep.mubr.msk.bf16.mxu0 %vm398_vm2, %v1032_v16  ;;  %5224 = vmatpush3.bf16.msra.mxu0 %v2052_v52 }
  0x52   : > { %5299 = vmatprep.subr.bf16.mxu0 %v5751_v48 }
  0x58   : > { %5166 = vmatmul.mubr.msk.bf16.gmra.mxu0 %vm398_vm2, %v1034_v24 }
  0x59   : > { %5169 = vmatprep.mubr.msk.bf16.mxu0 %vm398_vm2, %v1036_v26 }
  0x60   : > { %5170 = vmatmul.mubr.msk.bf16.gmra.mxu0 %vm398_vm2, %v1038_v34 }
  0x61   : > { %5173 = vmatprep.mubr.msk.bf16.mxu0 %vm398_vm2, %v1040_v36 }
  0x68   : > { %5174 = vmatmul.mubr.msk.bf16.gmra.mxu0 %vm398_vm2, %v1042_v40 }
  0x69   : > { %5177 = vmatprep.mubr.msk.bf16.mxu0 %vm398_vm2, %v1044_v42 }
  0x70   : > { %5178 = vmatmul.mubr.msk.bf16.gmra.mxu0 %vm398_vm2, %v1046_v46 }
  0x71   : > { %5181 = vmatprep.mubr.msk.bf16.mxu0 %vm398_vm2, %v1048_v47 }
  0x78   : > { %5182 = vmatmul.mubr.msk.bf16.gmra.mxu0 %vm398_vm2, %v1047_v45 }
  0x79   : > { %5225 = vmatprep.mubr.msk.bf16.mxu0 %vm5752_vm5, %v5751_v48 }
  0xd8   : > { %v5111_v53 = vpop.f32.mrf.mxu0 }
  0xd9   : > { %570 = vst.msk [vmem:[#allocation2 + $0x10] sm:$0xff] %vm567_vm6, %v5111_v53 }
  0xda   : > { %v473_v54 = vpop.f32.mrf.mxu0 }
  0xdb   : > { %568 = vst.msk [vmem:[#allocation2] sm:$0xff] %vm567_vm6, %v473_v54 }
  0xdc   : > { %v5112_v55 = vpop.f32.mrf.mxu0 }
  0xdd   : > { %571 = vst.msk [vmem:[#allocation2 + $0x18] sm:$0xff] %vm567_vm6, %v5112_v55  ;;  %v5141_v59 = vpop.f32.mrf.mxu1 }
  0xde   : > { %v476_v56 = vpop.f32.mrf.mxu0 }
  0xdf   : > { %569 = vst.msk [vmem:[#allocation2 + $0x8] sm:$0xff] %vm567_vm6, %v476_v56  ;;  %v794_v61 = vpop.f32.mrf.mxu1 }
  0xe0   : > { %v5115_v57 = vpop.f32.mrf.mxu0 }
  0xe1   : > { %574 = vst.msk [vmem:[#allocation2 + $0x30] sm:$0xff] %vm567_vm6, %v5115_v57  ;;  %v5142_v63 = vpop.f32.mrf.mxu1  ;;  %v6031_v57 = vpop.permute.xlu0 %1391 }
  0xe2   : > { %v489_v58 = vpop.f32.mrf.mxu0 }
  0xe3   : > { %572 = vst.msk [vmem:[#allocation2 + $0x20] sm:$0xff] %vm567_vm6, %v489_v58  ;;  %v797_v3 = vpop.f32.mrf.mxu1 }
  0xe4   : > { %v5116_v60 = vpop.f32.mrf.mxu0 }
  0xe5   : > { %575 = vst.msk [vmem:[#allocation2 + $0x38] sm:$0xff] %vm567_vm6, %v5116_v60  ;;  %v5145_v8 = vpop.f32.mrf.mxu1 }
  0xe6   : > { %v492_v62 = vpop.f32.mrf.mxu0 }
  0xe7   : > { %573 = vst.msk [vmem:[#allocation2 + $0x28] sm:$0xff] %vm567_vm6, %v492_v62  ;;  %v810_v12 = vpop.f32.mrf.mxu1 }
  0xe8   : > { %v5119_v0 = vpop.f32.mrf.mxu0  ;;  %v878_v1 = vld [vmem:[#allocation2 + $0x30] sm:$0xff] }
  0xe9   : > { %578 = vst.msk [vmem:[#allocation2 + $0x50] sm:$0xff] %vm567_vm6, %v5119_v0  ;;  %v901_v2 = vadd.f32 %v5141_v59, %v878_v1  ;;  %v5146_v15 = vpop.f32.mrf.mxu1 }
  0xea   : > { %v505_v4 = vpop.f32.mrf.mxu0  ;;  %v876_v6 = vld [vmem:[#allocation2 + $0x20] sm:$0xff] }
  0xeb   : > { %924 = vst.msk [vmem:[#allocation2 + $0x30] sm:$0xff] %vm567_vm6, %v901_v2  ;;  %576 = vst.msk [vmem:[#allocation2 + $0x40] sm:$0xff] %vm567_vm6, %v505_v4  ;;  %v899_v7 = vadd.f32 %v876_v6, %v794_v61  ;;  %v813_v19 = vpop.f32.mrf.mxu1 }
  0xec   : > { %v5120_v9 = vpop.f32.mrf.mxu0  ;;  %v879_v10 = vld [vmem:[#allocation2 + $0x38] sm:$0xff] }
  0xed   : > { %922 = vst.msk [vmem:[#allocation2 + $0x20] sm:$0xff] %vm567_vm6, %v899_v7  ;;  %579 = vst.msk [vmem:[#allocation2 + $0x58] sm:$0xff] %vm567_vm6, %v5120_v9  ;;  %v902_v11 = vadd.f32 %v5142_v63, %v879_v10  ;;  %v5149_v23 = vpop.f32.mrf.mxu1  ;;  %v872_v10 = vld [vmem:[#allocation2] sm:$0xff] }
  0xee   : > { %v508_v5 = vpop.f32.mrf.mxu0  ;;  %v877_v13 = vld [vmem:[#allocation2 + $0x28] sm:$0xff] }
  0xef   : > { %925 = vst.msk [vmem:[#allocation2 + $0x38] sm:$0xff] %vm567_vm6, %v902_v11  ;;  %577 = vst.msk [vmem:[#allocation2 + $0x48] sm:$0xff] %vm567_vm6, %v508_v5  ;;  %v900_v14 = vadd.f32 %v877_v13, %v797_v3  ;;  %v826_v27 = vpop.f32.mrf.mxu1  ;;  %v874_v3 = vld [vmem:[#allocation2 + $0x10] sm:$0xff] }
  0xf0   : > { %v5123_v16 = vpop.f32.mrf.mxu0  ;;  %v882_v17 = vld [vmem:[#allocation2 + $0x50] sm:$0xff] }
  0xf1   : > { %923 = vst.msk [vmem:[#allocation2 + $0x28] sm:$0xff] %vm567_vm6, %v900_v14  ;;  %582 = vst.msk [vmem:[#allocation2 + $0x70] sm:$0xff] %vm567_vm6, %v5123_v16  ;;  %v905_v18 = vadd.f32 %v5145_v8, %v882_v17  ;;  %v5150_v31 = vpop.f32.mrf.mxu1  ;;  %v6037_v8 = vpop.permute.xlu0 %1396 }
  0xf2   : > { %v521_v20 = vpop.f32.mrf.mxu0  ;;  %v880_v21 = vld [vmem:[#allocation2 + $0x40] sm:$0xff] }
  0xf3   : > { %928 = vst.msk [vmem:[#allocation2 + $0x50] sm:$0xff] %vm567_vm6, %v905_v18  ;;  %580 = vst.msk [vmem:[#allocation2 + $0x60] sm:$0xff] %vm567_vm6, %v521_v20  ;;  %v903_v22 = vadd.f32 %v880_v21, %v810_v12  ;;  %v829_v35 = vpop.f32.mrf.mxu1  ;;  %v6039_v12 = vpop.permute.xlu1 %1401 }
  0xf4   : > { %v5124_v24 = vpop.f32.mrf.mxu0  ;;  %v883_v25 = vld [vmem:[#allocation2 + $0x58] sm:$0xff] }
  0xf5   : > { %926 = vst.msk [vmem:[#allocation2 + $0x40] sm:$0xff] %vm567_vm6, %v903_v22  ;;  %583 = vst.msk [vmem:[#allocation2 + $0x78] sm:$0xff] %vm567_vm6, %v5124_v24  ;;  %v906_v26 = vadd.f32 %v5146_v15, %v883_v25  ;;  %v5153_v39 = vpop.f32.mrf.mxu1  ;;  %v875_v15 = vld [vmem:[#allocation2 + $0x18] sm:$0xff] }
  0xf6   : > { %v524_v28 = vpop.f32.mrf.mxu0  ;;  %v881_v29 = vld [vmem:[#allocation2 + $0x48] sm:$0xff] }
  0xf7   : > { %929 = vst.msk [vmem:[#allocation2 + $0x58] sm:$0xff] %vm567_vm6, %v906_v26  ;;  %581 = vst.msk [vmem:[#allocation2 + $0x68] sm:$0xff] %vm567_vm6, %v524_v28  ;;  %v904_v30 = vadd.f32 %v881_v29, %v813_v19  ;;  %v842_v43 = vpop.f32.mrf.mxu1  ;;  %v873_v19 = vld [vmem:[#allocation2 + $0x8] sm:$0xff]  ;;  %v6050_v25 = vpop.permute.xlu1 %1406 }
  0xf8   : > { %v5127_v32 = vpop.f32.mrf.mxu0  ;;  %v886_v33 = vld [vmem:[#allocation2 + $0x70] sm:$0xff] }
  0xf9   : > { %927 = vst.msk [vmem:[#allocation2 + $0x48] sm:$0xff] %vm567_vm6, %v904_v30  ;;  %586 = vst.msk [vmem:[#allocation2 + $0x90] sm:$0xff] %vm567_vm6, %v5127_v32  ;;  %v909_v34 = vadd.f32 %v5149_v23, %v886_v33  ;;  %v5154_v47 = vpop.f32.mrf.mxu1  ;;  %v6046_v23 = vpop.permute.xlu0 %1411 }
  0xfa   : > { %v537_v36 = vpop.f32.mrf.mxu0  ;;  %v884_v37 = vld [vmem:[#allocation2 + $0x60] sm:$0xff] }
  0xfb   : > { %932 = vst.msk [vmem:[#allocation2 + $0x70] sm:$0xff] %vm567_vm6, %v909_v34  ;;  %584 = vst.msk [vmem:[#allocation2 + $0x80] sm:$0xff] %vm567_vm6, %v537_v36  ;;  %v907_v38 = vadd.f32 %v884_v37, %v826_v27  ;;  %v845_v52 = vpop.f32.mrf.mxu1  ;;  %v6056_v36 = vpop.permute.xlu1 %1416 }
  0xfc   : > { %v5128_v40 = vpop.f32.mrf.mxu0  ;;  %v887_v41 = vld [vmem:[#allocation2 + $0x78] sm:$0xff] }
  0xfd   : > { %930 = vst.msk [vmem:[#allocation2 + $0x60] sm:$0xff] %vm567_vm6, %v907_v38  ;;  %587 = vst.msk [vmem:[#allocation2 + $0x98] sm:$0xff] %vm567_vm6, %v5128_v40  ;;  %v910_v42 = vadd.f32 %v5150_v31, %v887_v41  ;;  %v5157_v56 = vpop.f32.mrf.mxu1  ;;  %v6053_v32 = vpop.permute.xlu0 %1421 }
  0xfe   : > { %v540_v44 = vpop.f32.mrf.mxu0  ;;  %v885_v45 = vld [vmem:[#allocation2 + $0x68] sm:$0xff] }
  0xff   : > { %933 = vst.msk [vmem:[#allocation2 + $0x78] sm:$0xff] %vm567_vm6, %v910_v42  ;;  %585 = vst.msk [vmem:[#allocation2 + $0x88] sm:$0xff] %vm567_vm6, %v540_v44  ;;  %v908_v46 = vadd.f32 %v885_v45, %v829_v35  ;;  %v858_v61 = vpop.f32.mrf.mxu1  ;;  %v6062_v42 = vld [vmem:[%s6882_s2] ss:$0 sm:$0xff] }
 0x100   : > { %v5131_v49 = vpop.f32.mrf.mxu0  ;;  %v890_v50 = vld [vmem:[#allocation2 + $0x90] sm:$0xff]  ;;  %v1225_v44 = vld [vmem:[#allocation2 + $0x20] sm:$0xff] }
 0x101   : > { %931 = vst.msk [vmem:[#allocation2 + $0x68] sm:$0xff] %vm567_vm6, %v908_v46  ;;  %v913_v51 = vadd.f32 %v5153_v39, %v890_v50  ;;  %v5158_v1 = vpop.f32.mrf.mxu1  ;;  %v1227_v39 = vld [vmem:[#allocation2 + $0x30] sm:$0xff]  ;;  %v6066_v46 = vpop.permute.xlu0 %1431  ;;  %v1228_v50 = vld [vmem:[#allocation2 + $0x38] sm:$0xff] }
 0x102   : > { %591 = vst.msk [vmem:[#allocation2 + $0xb0] sm:$0xf] %vm590_vm1, %v5131_v49  ;;  %v553_v53 = vpop.f32.mrf.mxu0  ;;  %v888_v54 = vld [vmem:[#allocation2 + $0x80] sm:$0xff] }
 0x103   : > { %936 = vst.msk [vmem:[#allocation2 + $0x90] sm:$0xff] %vm567_vm6, %v913_v51  ;;  %588 = vst.msk [vmem:[#allocation2 + $0xa0] sm:$0xff] %vm567_vm6, %v553_v53  ;;  %v911_v55 = vadd.f32 %v888_v54, %v842_v43  ;;  %v861_v16 = vpop.f32.mrf.mxu1  ;;  %v6070_v53 = vpop.permute.xlu1 %1426 }
 0x104   : > { %v5132_v58 = vpop.f32.mrf.mxu0  ;;  %v891_v59 = vld [vmem:[#allocation2 + $0x98] sm:$0xff] }
 0x105   : > { %934 = vst.msk [vmem:[#allocation2 + $0x80] sm:$0xff] %vm567_vm6, %v911_v55  ;;  %v914_v60 = vadd.f32 %v5154_v47, %v891_v59 }
 0x106   : > { %v556_v62 = vpop.f32.mrf.mxu0  ;;  %v889_v63 = vld [vmem:[#allocation2 + $0x88] sm:$0xff] }
 0x107   : > { %937 = vst.msk [vmem:[#allocation2 + $0x98] sm:$0xff] %vm567_vm6, %v914_v60  ;;  %589 = vst.msk [vmem:[#allocation2 + $0xa8] sm:$0xff] %vm567_vm6, %v556_v62  ;;  %v912_v0 = vadd.f32 %v889_v63, %v845_v52  ;;  %v1231_v63 = vld [vmem:[#allocation2 + $0x50] sm:$0xff] }
 0x108   : > { %v5137_v2 = vpop.f32.mrf.mxu0 }
 0x109   : > { %v894_v4 = vld [vmem:[#allocation2 + $0xb0] sm:$0xf]  ;;  %935 = vst.msk [vmem:[#allocation2 + $0x88] sm:$0xff] %vm567_vm6, %v912_v0  ;;  %v897_v6 = vadd.f32 %v5137_v2, %v874_v3 }
 0x10a   : > { %v917_v7 = vadd.f32 %v5157_v56, %v894_v4  ;;  %v778_v9 = vpop.f32.mrf.mxu0  ;;  %v892_v11 = vld [vmem:[#allocation2 + $0xa0] sm:$0xff]  ;;  %v1226_v56 = vld [vmem:[#allocation2 + $0x28] sm:$0xff]  ;;  %v6077_v4 = vpop.permute.xlu0 %1441 }
 0x10b   : > { %920 = vst.msk [vmem:[#allocation2 + $0x10] sm:$0xff] %vm567_vm6, %v897_v6  ;;  %v895_v5 = vadd.f32 %v872_v10, %v778_v9  ;;  %v915_v13 = vadd.f32 %v892_v11, %v858_v61 }
 0x10c   : > { %940 = vst.msk [vmem:[#allocation2 + $0xb0] sm:$0xf] %vm590_vm1, %v917_v7  ;;  %v5138_v14 = vpop.f32.mrf.mxu0 }
 0x10d   : > { %918 = vst.msk [vmem:[#allocation2] sm:$0xff] %vm567_vm6, %v895_v5  ;;  %938 = vst.msk [vmem:[#allocation2 + $0xa0] sm:$0xff] %vm567_vm6, %v915_v13  ;;  %v898_v17 = vadd.f32 %v5138_v14, %v875_v15  ;;  %v6082_v14 = vpop.permute.xlu1 %1436 }
 0x10e   : > { %v781_v18 = vpop.f32.mrf.mxu0  ;;  %v893_v20 = vld [vmem:[#allocation2 + $0xa8] sm:$0xff] }
 0x10f   : > { %921 = vst.msk [vmem:[#allocation2 + $0x18] sm:$0xff] %vm567_vm6, %v898_v17  ;;  %v896_v21 = vadd.f32 %v873_v19, %v781_v18  ;;  %v916_v22 = vadd.f32 %v893_v20, %v861_v16 }
 0x110   : > { %v5163_v24 = vpop.f32.mrf.mxu0 }
 0x111   : > { %919 = vst.msk [vmem:[#allocation2 + $0x8] sm:$0xff] %vm567_vm6, %v896_v21  ;;  %939 = vst.msk [vmem:[#allocation2 + $0xa8] sm:$0xff] %vm567_vm6, %v916_v22  ;;  %v1232_v22 = vld [vmem:[#allocation2 + $0x58] sm:$0xff] }
 0x112   : > { %v1223_v26 = vld [vmem:[#allocation2 + $0x10] sm:$0xff]  ;;  %v1127_v27 = vpop.f32.mrf.mxu0 }
 0x113   : > { %v1246_v28 = vadd.f32 %v5163_v24, %v1223_v26 }
 0x114   : > { %v1221_v29 = vld [vmem:[#allocation2] sm:$0xff]  ;;  %v5164_v30 = vpop.f32.mrf.mxu0 }
 0x115   : > { %1269 = vst.msk [vmem:[#allocation2 + $0x10] sm:$0xff] %vm567_vm6, %v1246_v28  ;;  %v1244_v31 = vadd.f32 %v1221_v29, %v1127_v27 }
 0x116   : > { %v1224_v33 = vld [vmem:[#allocation2 + $0x18] sm:$0xff]  ;;  %v1130_v34 = vpop.f32.mrf.mxu0 }
 0x117   : > { %1267 = vst.msk [vmem:[#allocation2] sm:$0xff] %vm567_vm6, %v1244_v31  ;;  %v1247_v35 = vadd.f32 %v5164_v30, %v1224_v33 }
 0x118   : > { %v1222_v37 = vld [vmem:[#allocation2 + $0x8] sm:$0xff]  ;;  %v5167_v38 = vpop.f32.mrf.mxu0 }
 0x119   : > { %1270 = vst.msk [vmem:[#allocation2 + $0x18] sm:$0xff] %vm567_vm6, %v1247_v35  ;;  %v1245_v40 = vadd.f32 %v1222_v37, %v1130_v34  ;;  %v1250_v41 = vadd.f32 %v5167_v38, %v1227_v39  ;;  %v1230_v34 = vld [vmem:[#allocation2 + $0x48] sm:$0xff] }
 0x11a   : > { %v1143_v43 = vpop.f32.mrf.mxu0 }
 0x11b   : > { %1268 = vst.msk [vmem:[#allocation2 + $0x8] sm:$0xff] %vm567_vm6, %v1245_v40  ;;  %1273 = vst.msk [vmem:[#allocation2 + $0x30] sm:$0xff] %vm567_vm6, %v1250_v41  ;;  %v1248_v45 = vadd.f32 %v1225_v44, %v1143_v43  ;;  %v1235_v44 = vld [vmem:[#allocation2 + $0x70] sm:$0xff] }
 0x11c   : > { %v1292_v47 = vld [vmem:[#allocation2 + $0x10] sm:$0xff]  ;;  %v5168_v49 = vpop.f32.mrf.mxu0 }
 0x11d   : > { %v1322_v51 = vadd.f32 %v6062_v42, %v1292_v47  ;;  %1271 = vst.msk [vmem:[#allocation2 + $0x20] sm:$0xff] %vm567_vm6, %v1248_v45  ;;  %v1251_v52 = vadd.f32 %v5168_v49, %v1228_v50  ;;  %v6099_v45 = vpop.permute.xlu1 %1446 }
 0x11e   : > { %v1290_v54 = vld [vmem:[#allocation2] sm:$0xff]  ;;  %v1146_v55 = vpop.f32.mrf.mxu0 }
 0x11f   : > { %v1345_v58 = vmax.f32 %v1322_v51, 0.0  ;;  %v1320_v59 = vadd.f32 %v6062_v42, %v1290_v54  ;;  %1274 = vst.msk [vmem:[#allocation2 + $0x38] sm:$0xff] %vm567_vm6, %v1251_v52  ;;  %v1249_v60 = vadd.f32 %v1226_v56, %v1146_v55  ;;  %v1233_v55 = vld [vmem:[#allocation2 + $0x60] sm:$0xff]  ;;  %v1236_v56 = vld [vmem:[#allocation2 + $0x78] sm:$0xff] }
 0x120   : > { %v1293_v61 = vld [vmem:[#allocation2 + $0x18] sm:$0xff]  ;;  %v5171_v62 = vpop.f32.mrf.mxu0 }
 0x121   : > { %v1506_v0 = vmul.f32 %v6039_v12, %v1345_v58  ;;  %v1343_v1 = vmax.f32 %v1320_v59, 0.0  ;;  %v1323_v2 = vadd.f32 %v6062_v42, %v1293_v61  ;;  %1272 = vst.msk [vmem:[#allocation2 + $0x28] sm:$0xff] %vm567_vm6, %v1249_v60  ;;  %v1254_v3 = vadd.f32 %v5171_v62, %v1231_v63  ;;  %v1229_v12 = vld [vmem:[#allocation2 + $0x40] sm:$0xff]  ;;  %v1234_v60 = vld [vmem:[#allocation2 + $0x68] sm:$0xff] }
 0x122   : > { %v1291_v6 = vld [vmem:[#allocation2 + $0x8] sm:$0xff]  ;;  %v1296_v7 = vld [vmem:[#allocation2 + $0x30] sm:$0xff]  ;;  %v1159_v9 = vpop.f32.mrf.mxu0 }
 0x123   : > { %v4957_v10 = vpack.c.bf16 %v1506_v0, %v1506_v0  ;;  %v1504_v11 = vmul.f32 %v6031_v57, %v1343_v1  ;;  %v1346_v5 = vmax.f32 %v1323_v2, 0.0  ;;  %v1321_v13 = vadd.f32 %v6062_v42, %v1291_v6  ;;  %1277 = vst.msk [vmem:[#allocation2 + $0x50] sm:$0xff] %vm567_vm6, %v1254_v3  ;;  %v4832_v61 = vld [vmem:[%s6883_s3 + $0xc] sm:$0xf] }
 0x124   : > { %v1326_v15 = vadd.f32 %v6062_v42, %v1296_v7  ;;  %v1294_v16 = vld [vmem:[#allocation2 + $0x20] sm:$0xff]  ;;  %v1252_v17 = vadd.f32 %v1229_v12, %v1159_v9  ;;  %v5172_v18 = vpop.f32.mrf.mxu0  ;;  %v1239_v7 = vld [vmem:[#allocation2 + $0x90] sm:$0xff]  ;;  %v6122_v12 = vpop.permute.xlu1 %1456 }
 0x125   : > { %1623 = vst.msk [vmem:[#allocation3 + $0xc] sm:$0xf] %vm590_vm1, %v4957_v10  ;;  %v4955_v19 = vpack.c.bf16 %v1504_v11, %v1504_v11  ;;  %v1507_v20 = vmul.f32 %v6050_v25, %v1346_v5  ;;  %v1344_v21 = vmax.f32 %v1321_v13, 0.0  ;;  %v1324_v57 = vadd.f32 %v6062_v42, %v1294_v16  ;;  %v6092_v25 = vpop.permute.xlu0 %1451  ;;  %v4812_v5 = vld [vmem:[%s6883_s3 + $0x8] sm:$0xf] }
 0x126   : > { %v1349_v24 = vmax.f32 %v1326_v15, 0.0  ;;  %v1297_v26 = vld [vmem:[#allocation2 + $0x38] sm:$0xff]  ;;  %1275 = vst.msk [vmem:[#allocation2 + $0x40] sm:$0xff] %vm567_vm6, %v1252_v17  ;;  %v1255_v27 = vadd.f32 %v5172_v18, %v1232_v22  ;;  %v1162_v28 = vpop.f32.mrf.mxu0  ;;  %v1237_v18 = vld [vmem:[#allocation2 + $0x80] sm:$0xff]  ;;  %v2721_v22 = vsel %vm1832_vm4, %v4832_v61, 0 }
 0x127   : > { %1621 = vst.msk [vmem:[#allocation3 + $0x4] sm:$0xf] %vm590_vm1, %v4955_v19  ;;  %v4958_v29 = vpack.c.bf16 %v1507_v20, %v1507_v20  ;;  %v1505_v30 = vmul.f32 %v6037_v8, %v1344_v21  ;;  %v1347_v31 = vmax.f32 %v1324_v57, 0.0  ;;  %v1327_v33 = vadd.f32 %v6062_v42, %v1297_v26 }
 0x128   : > { %v1510_v35 = vmul.f32 %v6053_v32, %v1349_v24  ;;  %v1295_v37 = vld [vmem:[#allocation2 + $0x28] sm:$0xff]  ;;  %1278 = vst.msk [vmem:[#allocation2 + $0x58] sm:$0xff] %vm567_vm6, %v1255_v27  ;;  %v1253_v38 = vadd.f32 %v1230_v34, %v1162_v28  ;;  %v5175_v39 = vpop.f32.mrf.mxu0 }
 0x129   : > { %1624 = vst.msk [vmem:[#allocation3 + $0x10] sm:$0xf] %vm590_vm1, %v4958_v29  ;;  %v4956_v40 = vpack.c.bf16 %v1505_v30, %v1505_v30  ;;  %v1508_v41 = vmul.f32 %v6046_v23, %v1347_v31  ;;  %v1350_v43 = vmax.f32 %v1327_v33, 0.0  ;;  %v1325_v8 = vadd.f32 %v6062_v42, %v1295_v37  ;;  %v6112_v2 = vpop.permute.xlu0 %1461  ;;  %v1240_v29 = vld [vmem:[#allocation2 + $0x98] sm:$0xff] }
 0x12a   : > { %v4961_v47 = vpack.c.bf16 %v1510_v35, %v1510_v35  ;;  %v1300_v49 = vld [vmem:[#allocation2 + $0x50] sm:$0xff]  ;;  %1276 = vst.msk [vmem:[#allocation2 + $0x48] sm:$0xff] %vm567_vm6, %v1253_v38  ;;  %v1258_v32 = vadd.f32 %v5175_v39, %v1235_v44  ;;  %v1175_v50 = vpop.f32.mrf.mxu0 }
 0x12b   : > { %1622 = vst.msk [vmem:[#allocation3 + $0x8] sm:$0xf] %vm590_vm1, %v4956_v40  ;;  %v4959_v51 = vpack.c.bf16 %v1508_v41, %v1508_v41  ;;  %v1511_v52 = vmul.f32 %v6070_v53, %v1350_v43  ;;  %v1348_v54 = vmax.f32 %v1325_v8, 0.0  ;;  %v1330_v23 = vadd.f32 %v6062_v42, %v1300_v49  ;;  %v1238_v43 = vld [vmem:[#allocation2 + $0x88] sm:$0xff] }
 0x12c   : > { %1627 = vst.msk [vmem:[#allocation3 + $0x1c] sm:$0xf] %vm590_vm1, %v4961_v47  ;;  %v1256_v58 = vadd.f32 %v1233_v55, %v1175_v50  ;;  %v5176_v59 = vpop.f32.mrf.mxu0  ;;  %v6142_v8 = vsel %vm1832_vm4, %v4812_v5, 0 }
 0x12d   : > { %1281 = vst.msk [vmem:[#allocation2 + $0x70] sm:$0xff] %vm567_vm6, %v1258_v32  ;;  %v4962_v62 = vpack.c.bf16 %v1511_v52, %v1511_v52  ;;  %v1509_v53 = vmul.f32 %v6056_v36, %v1348_v54  ;;  %v1353_v63 = vmax.f32 %v1330_v23, 0.0  ;;  %v1298_v0 = vld [vmem:[#allocation2 + $0x40] sm:$0xff]  ;;  %v1259_v1 = vadd.f32 %v5176_v59, %v1236_v56  ;;  %v6136_v38 = vpop.permute.xlu0 %1471 }
 0x12e   : > { %1625 = vst.msk [vmem:[#allocation3 + $0x14] sm:$0xf] %vm590_vm1, %v4959_v51  ;;  %v1328_v3 = vadd.f32 %v6062_v42, %v1298_v0  ;;  %v1178_v6 = vpop.f32.mrf.mxu0  ;;  %v5622_v9 = vld [vmem:[#allocation3] sm:$0xf8]  }
 0x12f   : > { %1279 = vst.msk [vmem:[#allocation2 + $0x60] sm:$0xff] %vm567_vm6, %v1256_v58  ;;  %v1514_v10 = vmul.f32 %v6077_v4, %v1353_v63  ;;  %v1301_v11 = vld [vmem:[#allocation2 + $0x58] sm:$0xff]  ;;  %1282 = vst.msk [vmem:[#allocation2 + $0x78] sm:$0xff] %vm567_vm6, %v1259_v1  ;;  %v1257_v36 = vadd.f32 %v1234_v60, %v1178_v6  ;;  %v4960_v13 = vpack.c.bf16 %v1509_v53, %v1509_v53  ;;  %v1717_v19 = vshrl.u32 %v5622_v9, 16  ;;  %v1243_v58 = vld [vmem:[#allocation2 + $0xb0] sm:$0xf] }
 0x130   : > { %1628 = vst.msk [vmem:[#allocation3 + $0x20] sm:$0xf] %vm590_vm1, %v4962_v62  ;;  %v1351_v15 = vmax.f32 %v1328_v3, 0.0  ;;  %v1331_v16 = vadd.f32 %v6062_v42, %v1301_v11  ;;  %v5179_v17 = vpop.f32.mrf.mxu0  ;;  %v1720_v20 = vshll.u32 %v5622_v9, 16 }
 0x131   : > { %v4965_v21 = vpack.c.bf16 %v1514_v10, %v1514_v10  ;;  %v1299_v4 = vld [vmem:[#allocation2 + $0x48] sm:$0xff]  ;;  %1280 = vst.msk [vmem:[#allocation2 + $0x68] sm:$0xff] %vm567_vm6, %v1257_v36  ;;  %v1262_v57 = vadd.f32 %v5179_v17, %v1239_v7  ;;  %v6132_v35 = vrot.slane %v1717_v19, 3  ;;  %v1241_v36 = vld [vmem:[#allocation2 + $0xa0] sm:$0xff] }
 0x132   : > { %1626 = vst.msk [vmem:[#allocation3 + $0x18] sm:$0xf] %vm590_vm1, %v4960_v13  ;;  %v1512_v24 = vmul.f32 %v6066_v46, %v1351_v15  ;;  %v1354_v26 = vmax.f32 %v1331_v16, 0.0  ;;  %v1329_v27 = vadd.f32 %v6062_v42, %v1299_v4  ;;  %v1191_v28 = vpop.f32.mrf.mxu0  ;;  %v5621_v30 = vld [vmem:[#allocation3 + $0x4] sm:$0xff]   ;;  %v6134_v37 = vrot.slane %v1720_v20, 4  ;;  %v1482_v13 = vpop.permute.xlu0 %1481  ;;  %v5624_v19 = vld [vmem:[#allocation3 + $0xc] sm:$0xff]  }
 0x133   : > { %1631 = vst.msk [vmem:[#allocation3 + $0x2c] sm:$0xf] %vm590_vm1, %v4965_v21  ;;  %v1260_v33 = vadd.f32 %v1237_v18, %v1191_v28  ;;  %v5623_v34 = vld [vmem:[#allocation3 + $0x8] sm:$0xff]   ;;  %5226 = vmatmul.mubr.msk.bf16.vlgmr.msra.gmra.mxu0 %vm567_vm6, %v5621_v30 }
 0x134   : > { %v1304_v31 = vld [vmem:[#allocation2 + $0x70] sm:$0xff]  ;;  %1285 = vst.msk [vmem:[#allocation2 + $0x90] sm:$0xff] %vm567_vm6, %v1262_v57  ;;  %v4963_v46 = vpack.c.bf16 %v1512_v24, %v1512_v24  ;;  %v1515_v39 = vmul.f32 %v6099_v45, %v1354_v26  ;;  %v5180_v41 = vpop.f32.mrf.mxu0  ;;  %v1352_v47 = vmax.f32 %v1329_v27, 0.0  ;;  %v1725_v50 = vshrl.u32 %v5623_v34, 16  ;;  %5229 = vmatprep.mubr.msk.bf16.mxu0 %vm5752_vm5, %v5751_v48  ;;  %5300 = vmatpush3.bf16.msra.mxu0 %v2721_v22  ;;  %v1467_v45 = vpop.permute.xlu1 %1466 }
 0x135   : > { %v1334_v40 = vadd.f32 %v6062_v42, %v1304_v31  ;;  %v5625_v44 = vld [vmem:[#allocation3 + $0x10] sm:$0xff]   ;;  %1283 = vst.msk [vmem:[#allocation2 + $0x80] sm:$0xff] %vm567_vm6, %v1260_v33  ;;  %v1263_v32 = vadd.f32 %v5180_v41, %v1240_v29  ;;  %v1728_v51 = vshll.u32 %v5623_v34, 16  ;;  %v1723_v59 = vor.u32 %v6134_v37, %v6132_v35  ;;  %5375 = vmatprep.subr.bf16.mxu0 %v5751_v48 }
 0x136   : > { %v1302_v49 = vld [vmem:[#allocation2 + $0x60] sm:$0xff]  ;;  %1629 = vst.msk [vmem:[#allocation3 + $0x24] sm:$0xf] %vm590_vm1, %v4963_v46  ;;  %v4966_v52 = vpack.c.bf16 %v1515_v39, %v1515_v39  ;;  %v1305_v55 = vld [vmem:[#allocation2 + $0x78] sm:$0xff]  ;;  %v1194_v56 = vpop.f32.mrf.mxu0  ;;  %v1727_v62 = vrot.slane %v1725_v50, 3  ;;  %v1734_v6 = vshrl.u32 %v5625_v44, 16  ;;  %v1513_v15 = vmul.f32 %v6082_v14, %v1352_v47 }
 0x137   : > { %v1357_v54 = vmax.f32 %v1334_v40, 0.0  ;;  %v1332_v23 = vadd.f32 %v6062_v42, %v1302_v49  ;;  %v1335_v60 = vadd.f32 %v6062_v42, %v1305_v55  ;;  %1286 = vst.msk [vmem:[#allocation2 + $0x98] sm:$0xff] %vm567_vm6, %v1263_v32  ;;  %v1261_v61 = vadd.f32 %v1238_v43, %v1194_v56  ;;  %v1242_v46 = vld [vmem:[#allocation2 + $0xa8] sm:$0xff] }
 0x138   : > { %v1730_v53 = vrot.slane %v1728_v51, 4  ;;  %1632 = vst.msk [vmem:[#allocation3 + $0x30] sm:$0xf] %vm590_vm1, %v4966_v52  ;;  %v1303_v1 = vld [vmem:[#allocation2 + $0x68] sm:$0xff]  ;;  %v5183_v3 = vpop.f32.mrf.mxu0  ;;  %v1737_v7 = vshll.u32 %v5625_v44, 16  ;;  %v1736_v20 = vrot.slane %v1734_v6, 3  ;;  %v1477_v26 = vpop.permute.xlu1 %1476 }
 0x139   : > { %v1518_v63 = vmul.f32 %v6112_v2, %v1357_v54  ;;  %v1355_v0 = vmax.f32 %v1332_v23, 0.0  ;;  %v1358_v9 = vmax.f32 %v1335_v60, 0.0  ;;  %v1333_v10 = vadd.f32 %v6062_v42, %v1303_v1  ;;  %1284 = vst.msk [vmem:[#allocation2 + $0x88] sm:$0xff] %vm567_vm6, %v1261_v61  ;;  %v5627_v24 = vld [vmem:[#allocation3 + $0x18] sm:$0xff]   ;;  %v1492_v44 = vpop.permute.xlu0 %1491 }
 0x13a   : > { %v1266_v11 = vadd.f32 %v5183_v3, %v1243_v58  ;;  %v6158_v5 = vor.u32 %v1730_v53, %v1727_v62  ;;  %v1207_v18 = vpop.f32.mrf.mxu0  ;;  %v1739_v29 = vrot.slane %v1737_v7, 4  ;;  %v1743_v32 = vshrl.u32 %v5627_v24, 16  ;;  %v5626_v56 = vld [vmem:[#allocation3 + $0x14] sm:$0xff]  }
 0x13b   : > { %v4969_v16 = vpack.c.bf16 %v1518_v63, %v1518_v63  ;;  %v1516_v2 = vmul.f32 %v6092_v25, %v1355_v0  ;;  %v1308_v17 = vld [vmem:[#allocation2 + $0x90] sm:$0xff]  ;;  %v1519_v21 = vmul.f32 %v1467_v45, %v1358_v9  ;;  %v1356_v4 = vmax.f32 %v1333_v10, 0.0  ;;  %5230 = vmatmul.mubr.msk.bf16.gmra.mxu0 %vm567_vm6, %v5624_v19 }
 0x13c   : > { %v1338_v57 = vadd.f32 %v6062_v42, %v1308_v17  ;;  %1289 = vst.msk [vmem:[#allocation2 + $0xb0] sm:$0xf] %vm590_vm1, %v1266_v11  ;;  %v1264_v22 = vadd.f32 %v1241_v36, %v1207_v18  ;;  %v1306_v14 = vld [vmem:[#allocation2 + $0x80] sm:$0xff]  ;;  %v5184_v28 = vpop.f32.mrf.mxu0  ;;  %v1732_v25 = vsel %vm1715_vm7, %v1723_v59, %v6158_v5  ;;  %5233 = vmatprep.mubr.msk.bf16.mxu0 %vm5752_vm5, %v5751_v48  ;;  %v1487_v23 = vpop.permute.xlu1 %1486  ;;  %v1745_v53 = vrot.slane %v1743_v32, 3  ;;  %v5628_v19 = vld [vmem:[#allocation3 + $0x1c] sm:$0xff]  }
 0x13d   : > { %1635 = vst.msk [vmem:[#allocation3 + $0x3c] sm:$0xf] %vm590_vm1, %v4969_v16  ;;  %v4967_v27 = vpack.c.bf16 %v1516_v2, %v1516_v2  ;;  %v4970_v30 = vpack.c.bf16 %v1519_v21, %v1519_v21  ;;  %v1517_v31 = vmul.f32 %v6122_v12, %v1356_v4  ;;  %v1336_v34 = vadd.f32 %v6062_v42, %v1306_v14  ;;  %v5629_v0 = vld [vmem:[#allocation3 + $0x20] sm:$0xff]   ;;  %v1502_v9 = vpop.permute.xlu0 %1501 }
 0x13e   : > { %v1361_v33 = vmax.f32 %v1338_v57, 0.0  ;;  %1287 = vst.msk [vmem:[#allocation2 + $0xa0] sm:$0xff] %vm567_vm6, %v1264_v22  ;;  %5188 = vmatmul.mubr.msk.bf16.vlgmr.msra.gmra.mxu1 %vm567_vm6, %v1732_v25  ;;  %v1309_v35 = vld [vmem:[#allocation2 + $0x98] sm:$0xff]  ;;  %v1210_v37 = vpop.f32.mrf.mxu0  ;;  %v4964_v12 = vpack.c.bf16 %v1513_v15, %v1513_v15  ;;  %v1740_v49 = vor.u32 %v1739_v29, %v1736_v20  ;;  %v1752_v15 = vshrl.u32 %v5629_v0, 16 }
 0x13f   : > { %1633 = vst.msk [vmem:[#allocation3 + $0x34] sm:$0xf] %vm590_vm1, %v4967_v27  ;;  %5262 = vmatpush3.bf16.msra.mxu1 %v6142_v8  ;;  %5191 = vmatprep.mubr.msk.bf16.mxu1 %vm5752_vm5, %v5751_v48  ;;  %1636 = vst.msk [vmem:[#allocation3 + $0x40] sm:$0xf] %vm590_vm1, %v4970_v30  ;;  %v1359_v40 = vmax.f32 %v1336_v34, 0.0  ;;  %v1339_v41 = vadd.f32 %v6062_v42, %v1309_v35  ;;  %v1265_v43 = vadd.f32 %v1242_v46, %v1210_v37 }
 0x140   : > { %v1522_v39 = vmul.f32 %v1482_v13, %v1361_v33  ;;  %5337 = vmatprep.subr.bf16.mxu1 %v5751_v48  ;;  %v1307_v47 = vld [vmem:[#allocation2 + $0x88] sm:$0xff]  ;;  %v1746_v8 = vshll.u32 %v5627_v24, 16  ;;  %1630 = vst.msk [vmem:[#allocation3 + $0x28] sm:$0xf] %vm590_vm1, %v4964_v12  ;;  %v4968_v50 = vpack.c.bf16 %v1517_v31, %v1517_v31  ;;  %v1755_v16 = vshll.u32 %v5629_v0, 16  ;;  %v1497_v4 = vpop.permute.xlu1 %1496 }
 0x141   : > { %v1520_v45 = vmul.f32 %v6136_v38, %v1359_v40  ;;  %v1362_v52 = vmax.f32 %v1339_v41, 0.0  ;;  %v1337_v54 = vadd.f32 %v6062_v42, %v1307_v47  ;;  %1288 = vst.msk [vmem:[#allocation2 + $0xa8] sm:$0xff] %vm567_vm6, %v1265_v43  ;;  %v1741_v38 = vsel %vm1715_vm7, %v6158_v5, %v1740_v49  ;;  %v5632_v12 = vld [vmem:[#allocation3 + $0x2c] sm:$0xff]  }
 0x142   : > { %v4973_v51 = vpack.c.bf16 %v1522_v39, %v1522_v39  ;;  %1634 = vst.msk [vmem:[#allocation3 + $0x38] sm:$0xf] %vm590_vm1, %v4968_v50  ;;  %v1748_v63 = vrot.slane %v1746_v8, 4  ;;  %v1754_v22 = vrot.slane %v1752_v15, 3  ;;  %v1757_v24 = vrot.slane %v1755_v16, 4 }
 0x143   : > { %v1312_v55 = vld [vmem:[#allocation2 + $0xb0] sm:$0xf]  ;;  %v4971_v58 = vpack.c.bf16 %v1520_v45, %v1520_v45  ;;  %v1523_v59 = vmul.f32 %v1487_v23, %v1362_v52  ;;  %v1360_v60 = vmax.f32 %v1337_v54, 0.0  ;;  %5234 = vmatmul.mubr.msk.bf16.gmra.mxu0 %vm567_vm6, %v5626_v56  ;;  %v4872_v16 = vld [vmem:[%s6883_s3 + $0x14] sm:$0xf] }
 0x144   : > { %1639 = vst.msk [vmem:[#allocation3 + $0x4c] sm:$0xf] %vm590_vm1, %v4973_v51  ;;  %v1342_v61 = vadd.f32 %v6062_v42, %v1312_v55  ;;  %5237 = vmatprep.mubr.msk.bf16.mxu0 %vm5752_vm5, %v5751_v48  ;;  %v1749_v13 = vor.u32 %v1748_v63, %v1745_v53  ;;  %v1758_v14 = vor.u32 %v1757_v24, %v1754_v22 }
 0x145   : > { %v1310_v62 = vld [vmem:[#allocation2 + $0xa0] sm:$0xff]  ;;  %1637 = vst.msk [vmem:[#allocation3 + $0x44] sm:$0xf] %vm590_vm1, %v4971_v58  ;;  %v4974_v1 = vpack.c.bf16 %v1523_v59, %v1523_v59  ;;  %v1521_v3 = vmul.f32 %v1477_v26, %v1360_v60 }
 0x146   : > { %v1365_v6 = vmax.f32 %v1342_v61, 0.0  ;;  %v1340_v7 = vadd.f32 %v6062_v42, %v1310_v62  ;;  %5192 = vmatmul.mubr.msk.bf16.gmra.mxu1 %vm567_vm6, %v1741_v38  ;;  %v1750_v57 = vsel %vm1715_vm7, %v1740_v49, %v1749_v13  ;;  %v5633_v30 = vld [vmem:[#allocation3 + $0x30] sm:$0xff]   ;;  %v1759_v31 = vsel %vm1715_vm7, %v1749_v13, %v1758_v14  ;;  %v5636_v55 = vld [vmem:[#allocation3 + $0x3c] sm:$0xff]  }
 0x147   : > { %5195 = vmatprep.mubr.msk.bf16.mxu1 %vm5752_vm5, %v5751_v48  ;;  %1640 = vst.msk [vmem:[#allocation3 + $0x50] sm:$0xf] %vm590_vm1, %v4974_v1  ;;  %v4972_v36 = vpack.c.bf16 %v1521_v3, %v1521_v3  ;;  %v5631_v26 = vld [vmem:[#allocation3 + $0x28] sm:$0xff]   ;;  %v1770_v35 = vshrl.u32 %v5633_v30, 16  ;;  %v1773_v46 = vshll.u32 %v5633_v30, 16  ;;  %v5641_v62 = vld [vmem:[#allocation3 + $0x14] sm:$0xff]  }
 0x148   : > { %v1526_v10 = vmul.f32 %v1502_v9, %v1365_v6  ;;  %v1363_v11 = vmax.f32 %v1340_v7, 0.0  ;;  %v1311_v5 = vld [vmem:[#allocation2 + $0xa8] sm:$0xff]  ;;  %v1761_v28 = vshrl.u32 %v5631_v26, 16  ;;  %v1764_v25 = vshll.u32 %v5631_v26, 16  ;;  %v5630_v29 = vld [vmem:[#allocation3 + $0x24] sm:$0xff]  }
 0x149   : > { %v1341_v18 = vadd.f32 %v6062_v42, %v1311_v5  ;;  %1638 = vst.msk [vmem:[#allocation3 + $0x48] sm:$0xf] %vm590_vm1, %v4972_v36  ;;  %v1772_v39 = vrot.slane %v1770_v35, 3  ;;  %v1775_v41 = vrot.slane %v1773_v46, 4  ;;  %v5635_v43 = vld [vmem:[#allocation3 + $0x38] sm:$0xff]   ;;  %v5640_v61 = vld [vmem:[#allocation3 + $0xc] sm:$0xff]  }
 0x14a   : > { %v4977_v2 = vpack.c.bf16 %v1526_v10, %v1526_v10  ;;  %v1524_v17 = vmul.f32 %v1492_v44, %v1363_v11  ;;  %v1763_v33 = vrot.slane %v1761_v28, 3  ;;  %v1766_v34 = vrot.slane %v1764_v25, 4  ;;  %v5634_v32 = vld [vmem:[#allocation3 + $0x34] sm:$0xff]   ;;  %v5642_v6 = vld [vmem:[#allocation3 + $0x4] sm:$0xff]  }
 0x14b   : > { %v1364_v21 = vmax.f32 %v1341_v18, 0.0  ;;  %5238 = vmatmul.mubr.msk.bf16.gmra.mxu0 %vm567_vm6, %v5628_v19  ;;  %v1776_v44 = vor.u32 %v1775_v41, %v1772_v39  ;;  %v1779_v47 = vshrl.u32 %v5635_v43, 16  ;;  %v1782_v49 = vshll.u32 %v5635_v43, 16  ;;  %v5643_v18 = vld [vmem:[#allocation3 + $0xc] sm:$0xff]   ;;  %v4852_v28 = vld [vmem:[%s6883_s3 + $0x10] sm:$0xf] }
 0x14c   : > { %v4975_v20 = vpack.c.bf16 %v1524_v17, %v1524_v17  ;;  %1644 = vst.msk [vmem:[#allocation3 + $0x5c] sm:$0x3] %vm1643_vm8, %v4977_v2  ;;  %5241 = vmatprep.mubr.msk.bf16.mxu0 %vm5752_vm5, %v5751_v48  ;;  %v1767_v37 = vor.u32 %v1766_v34, %v1763_v33  ;;  %v5637_v45 = vld [vmem:[#allocation3 + $0x40] sm:$0xff]   ;;  %v2620_v0 = vshll.u32 %v5640_v61, 16  ;;  %v2625_v3 = vshll.u32 %v5641_v62, 16  ;;  %v5645_v25 = vld [vmem:[#allocation3 + $0x14] sm:$0xff]  }
 0x14d   : > { %v1525_v27 = vmul.f32 %v1497_v4, %v1364_v21  ;;  %v1781_v50 = vrot.slane %v1779_v47, 3  ;;  %v1784_v51 = vrot.slane %v1782_v49, 4  ;;  %v1788_v54 = vshrl.u32 %v5637_v45, 16  ;;  %v5644_v17 = vld [vmem:[#allocation3 + $0x1c] sm:$0xff]   ;;  %v5648_v39 = vld [vmem:[#allocation3 + $0x2c] sm:$0xff]  }
 0x14e   : > { %1641 = vst.msk [vmem:[#allocation3 + $0x54] sm:$0xf] %vm590_vm1, %v4975_v20  ;;  %5196 = vmatmul.mubr.msk.bf16.gmra.mxu1 %vm567_vm6, %v1750_v57  ;;  %v1768_v40 = vsel %vm1715_vm7, %v1758_v14, %v1767_v37  ;;  %v1777_v8 = vsel %vm1715_vm7, %v1767_v37, %v1776_v44  ;;  %v1791_v23 = vshll.u32 %v5637_v45, 16  ;;  %v2622_v11 = vrot.slane %v2620_v0, 1  ;;  %v5647_v47 = vld [vmem:[#allocation3 + $0x1c] sm:$0xff]  }
 0x14f   : > { %5199 = vmatprep.mubr.msk.bf16.mxu1 %vm5752_vm5, %v5751_v48  ;;  %v4976_v42 = vpack.c.bf16 %v1525_v27, %v1525_v27  ;;  %v1785_v52 = vor.u32 %v1784_v51, %v1781_v50  ;;  %v1790_v58 = vrot.slane %v1788_v54, 3  ;;  %v2618_v36 = vshrl.u32 %v5640_v61, 16  ;;  %v5650_v54 = vld [vmem:[#allocation3 + $0x34] sm:$0xff]  }
 0x150   : > { %v1793_v59 = vrot.slane %v1791_v23, 4  ;;  %v5639_v60 = vld [vmem:[#allocation3 + $0x48] ss:$0 sps:$4 sm:$0xff]   ;;  %v2627_v5 = vrot.slane %v2625_v3, 1  ;;  %v2286_v15 = vshll.u32 %v5642_v6, 16  ;;  %v3346_v20 = vsel %vm1832_vm4, %v4872_v16, 0 }
 0x151   : > { %1642 = vst.msk [vmem:[#allocation3 + $0x58] sm:$0xf] %vm590_vm1, %v4976_v42  ;;  %v1786_v56 = vsel %vm1715_vm7, %v1776_v44, %v1785_v52  ;;  %v1797_v53 = vshrl.u32 %v5639_v60, 16  ;;  %v1800_v63 = vshll.u32 %v5639_v60, 16  ;;  %v5638_v1 = vld [vmem:[#allocation3 + $0x44] sm:$0xff]   ;;  %v2623_v2 = vor.u32 %v2622_v11, %v2618_v36  ;;  %v5652_v3 = vld [vmem:[#allocation3 + $0x3c] sm:$0xff]  }
 0x152   : > { %v1794_v38 = vor.u32 %v1793_v59, %v1790_v58  ;;  %v2288_v4 = vrot.slane %v2286_v15, 1  ;;  %v2629_v57 = vshrl.u32 %v5641_v62, 16  ;;  %v2633_v22 = vshll.u32 %v5644_v17, 16  ;;  %v5646_v42 = vld [vmem:[#allocation3 + $0x24] sm:$0xff]  }
 0x153   : > { %5242 = vmatmul.mubr.msk.bf16.gmra.mxu0 %vm567_vm6, %v5630_v29  ;;  %v1799_v9 = vrot.slane %v1797_v53, 3  ;;  %v1802_v10 = vrot.slane %v1800_v63, 4  ;;  %v2628_v19 = vsel %vm2282_vm9, %v2623_v2, %v2627_v5  ;;  %v2284_v24 = vshrl.u32 %v5642_v6, 16  ;;  %v5654_v16 = vld [vmem:[#allocation3 + $0x44] sm:$0xff]  }
 0x154   : > { %5245 = vmatprep.mubr.msk.bf16.mxu0 %vm5752_vm5, %v5751_v48  ;;  %v1795_v7 = vsel %vm1715_vm7, %v1785_v52, %v1794_v38  ;;  %v2291_v26 = vshll.u32 %v5643_v18, 16  ;;  %v2631_v27 = vor.u32 %v2629_v57, %v2627_v5  ;;  %v2635_v29 = vrot.slane %v2633_v22, 1 }
 0x155   : > { %v1803_v13 = vor.u32 %v1802_v10, %v1799_v9  ;;  %v2289_v14 = vor.u32 %v2288_v4, %v2284_v24  ;;  %v2641_v34 = vshll.u32 %v5646_v42, 16  ;;  %v2299_v37 = vshll.u32 %v5645_v25, 16 }
 0x156   : > { %5200 = vmatmul.mubr.msk.bf16.gmra.mxu1 %vm567_vm6, %v1759_v31  ;;  %v2293_v30 = vrot.slane %v2291_v26, 1  ;;  %v2998_v31 = vsel %vm1832_vm4, %v4852_v28, 0  ;;  %v2636_v33 = vsel %vm2282_vm9, %v2631_v27, %v2635_v29  ;;  %v2637_v46 = vshrl.u32 %v5644_v17, 16  ;;  %v5653_v17 = vld [vmem:[#allocation3 + $0x34] sm:$0xff]  }
 0x157   : > { %5203 = vmatprep.mubr.msk.bf16.mxu1 %vm5752_vm5, %v5751_v48  ;;  %v1804_v21 = vsel %vm1715_vm7, %v1794_v38, %v1803_v13  ;;  %v2301_v41 = vrot.slane %v2299_v37, 1  ;;  %v2649_v50 = vshll.u32 %v5648_v39, 16  ;;  %v2303_v51 = vshrl.u32 %v5645_v25, 16  ;;  %v5655_v25 = vld [vmem:[#allocation3 + $0x3c] sm:$0xff]  }
 0x158   : > { %v2294_v35 = vsel %vm2282_vm9, %v2289_v14, %v2293_v30  ;;  %v2639_v43 = vor.u32 %v2637_v46, %v2635_v29  ;;  %v2307_v45 = vshll.u32 %v5647_v47, 16  ;;  %v2657_v60 = vshll.u32 %v5650_v54, 16  ;;  %v5656_v14 = vld [vmem:[#allocation3 + $0x4c] sm:$0xff]   ;;  %v5658_v46 = vld [vmem:[#allocation3 + $0x54] ss:$0 sps:$4 sm:$0x11]  }
 0x159   : > { %v2305_v23 = vor.u32 %v2303_v51, %v2301_v41  ;;  %v2653_v38 = vshrl.u32 %v5648_v39, 16  ;;  %v2311_v63 = vshrl.u32 %v5647_v47, 16  ;;  %v2661_v11 = vshrl.u32 %v5650_v54, 16  ;;  %v5657_v39 = vld [vmem:[#allocation3 + $0x44] sm:$0xff]   ;;  %v5661_v47 = vld [vmem:[#allocation3 + $0x14] sm:$0xff]  }
 0x15a   : > { %v2309_v58 = vrot.slane %v2307_v45, 1  ;;  %v2659_v53 = vrot.slane %v2657_v60, 1  ;;  %v2665_v36 = vshll.u32 %v5652_v3, 16  ;;  %v2331_v57 = vshll.u32 %v5653_v17, 16 }
 0x15b   : > { %5246 = vmatmul.mubr.msk.bf16.gmra.mxu0 %vm567_vm6, %v5632_v12  ;;  %v2643_v12 = vrot.slane %v2641_v34, 1  ;;  %v2669_v22 = vshrl.u32 %v5652_v3, 16  ;;  %v2335_v34 = vshrl.u32 %v5653_v17, 16  ;;  %v3238_v45 = vshrl.u32 %v5661_v47, 16 }
 0x15c   : > { %5249 = vmatprep.mubr.msk.bf16.mxu0 %vm5752_vm5, %v5751_v48  ;;  %v2310_v61 = vsel %vm2282_vm9, %v2305_v23, %v2309_v58  ;;  %v2313_v6 = vor.u32 %v2311_v63, %v2309_v58  ;;  %v2663_v15 = vor.u32 %v2661_v11, %v2659_v53  ;;  %v2333_v27 = vrot.slane %v2331_v57, 1  ;;  %v5659_v60 = vld [vmem:[#allocation3 + $0x4c] ss:$0 sps:$4 sm:$0x11]  }
 0x15d   : > { %v2644_v49 = vsel %vm2282_vm9, %v2639_v43, %v2643_v12  ;;  %v2343_v54 = vshrl.u32 %v5655_v25, 16  ;;  %v2351_v3 = vshrl.u32 %v5657_v39, 16 }
 0x15e   : > { %5204 = vmatmul.mubr.msk.bf16.gmra.mxu1 %vm567_vm6, %v1768_v40  ;;  %v2295_v40 = vshrl.u32 %v5643_v18, 16  ;;  %v2667_v18 = vrot.slane %v2665_v36, 1 }
 0x15f   : > { %5207 = vmatprep.mubr.msk.bf16.mxu1 %vm5752_vm5, %v5751_v48 }
 0x160   : > { %v2297_v44 = vor.u32 %v2295_v40, %v2293_v30 }
 0x163   : > { %5250 = vmatmul.mubr.msk.bf16.gmra.mxu0 %vm567_vm6, %v5634_v32  ;;  %v2302_v32 = vsel %vm2282_vm9, %v2297_v44, %v2301_v41  ;;  %v2689_v44 = vshll.u32 %v5658_v46, 16 }
 0x164   : > { %5253 = vmatprep.mubr.msk.bf16.mxu0 %vm5752_vm5, %v5751_v48 }
 0x165   : > { %v2691_v51 = vrot.slane %v2689_v44, 1 }
 0x166   : > { %5208 = vmatmul.mubr.msk.bf16.gmra.mxu1 %vm567_vm6, %v1777_v8  ;;  %v2645_v8 = vshrl.u32 %v5646_v42, 16  ;;  %v2671_v42 = vor.u32 %v2669_v22, %v2667_v18 }
 0x167   : > { %5211 = vmatprep.mubr.msk.bf16.mxu1 %vm5752_vm5, %v5751_v48 }
 0x168   : > { %v2647_v52 = vor.u32 %v2645_v8, %v2643_v12  ;;  %v2337_v12 = vor.u32 %v2335_v34, %v2333_v27  ;;  %v5660_v8 = vld [vmem:[#allocation3 + $0xc] sm:$0xfe]  }
 0x169   : > { %v3233_v58 = vshll.u32 %v5660_v8, 16 }
 0x16b   : > { %5254 = vmatmul.mubr.msk.bf16.gmra.mxu0 %vm567_vm6, %v5636_v55  ;;  %v5649_v55 = vld [vmem:[#allocation3 + $0x24] sm:$0xff]  }
 0x16c   : > { %5257 = vmatprep.mubr.msk.bf16.mxu0 %vm5752_vm5, %v5751_v48  ;;  %v2315_v62 = vshll.u32 %v5649_v55, 16  ;;  %v2319_v5 = vshrl.u32 %v5649_v55, 16 }
 0x16e   : > { %5212 = vmatmul.mubr.msk.bf16.gmra.mxu1 %vm567_vm6, %v1786_v56  ;;  %v2651_v56 = vrot.slane %v2649_v50, 1  ;;  %v2317_v0 = vrot.slane %v2315_v62, 1  ;;  %v2685_v50 = vshrl.u32 %v5656_v14, 16  ;;  %v3240_v62 = vrot.slane %v3238_v45, 1 }
 0x16f   : > { %5215 = vmatprep.mubr.msk.bf16.mxu1 %vm5752_vm5, %v5751_v48 }
 0x170   : > { %v2652_v59 = vsel %vm2282_vm9, %v2647_v52, %v2651_v56  ;;  %v2318_v10 = vsel %vm2282_vm9, %v2313_v6, %v2317_v0  ;;  %v2321_v2 = vor.u32 %v2319_v5, %v2317_v0  ;;  %v3241_v52 = vshll.u32 %v5661_v47, 16 }
 0x171   : > { %v3235_v0 = vrot.slane %v3233_v58, 2  ;;  %v2355_v6 = vshll.u32 %v5659_v60, 16  ;;  %v5674_v60 = vld [vmem:[#allocation3 + $0x44] sm:$0xff]  }
 0x173   : > { %5258 = vmatmul.mubr.msk.bf16.gmra.mxu0 %vm567_vm6, %v5638_v1  ;;  %v2655_v1 = vor.u32 %v2653_v38, %v2651_v56  ;;  %v3230_v56 = vshrl.u32 %v5660_v8, 16  ;;  %v3243_v38 = vrot.slane %v3241_v52, 2  ;;  %v5672_v52 = vld [vmem:[#allocation3 + $0x3c] sm:$0xff]  }
 0x174   : > { %5301 = vmatprep.mubr.msk.bf16.mxu0 %vm5752_vm5, %v5751_v48 }
 0x175   : > { %v2660_v9 = vsel %vm2282_vm9, %v2655_v1, %v2659_v53  ;;  %v3232_v63 = vrot.slane %v3230_v56, 1  ;;  %v5664_v1 = vld [vmem:[#allocation3 + $0x1c] sm:$0xff]   ;;  %v3286_v56 = vshll.u32 %v5672_v52, 16 }
 0x176   : > { %5216 = vmatmul.mubr.msk.bf16.gmra.mxu1 %vm567_vm6, %v1795_v7  ;;  %v5651_v7 = vld [vmem:[#allocation3 + $0x2c] sm:$0xff]   ;;  %v3247_v36 = vshrl.u32 %v5664_v1, 16  ;;  %v3250_v5 = vshll.u32 %v5664_v1, 16 }
 0x177   : > { %5219 = vmatprep.mubr.msk.bf16.mxu1 %vm5752_vm5, %v5751_v48  ;;  %v2323_v13 = vshll.u32 %v5651_v7, 16  ;;  %v2327_v26 = vshrl.u32 %v5651_v7, 16  ;;  %v3244_v7 = vor.u32 %v3243_v38, %v3240_v62  ;;  %v3236_v11 = vor.u32 %v3235_v0, %v3232_v63  ;;  %v5671_v62 = vld [vmem:[#allocation3 + $0x34] sm:$0xff]  }
 0x178   : > { %v3292_v63 = vshrl.u32 %v5674_v60, 16  ;;  %v3295_v0 = vshll.u32 %v5674_v60, 16  ;;  %v2960_v1 = vrot.slane %v5671_v62, 1 }
 0x17b   : > { %5302 = vmatmul.mubr.msk.bf16.vlgmr.msra.gmra.mxu0 %vm567_vm6, %v2628_v19  ;;  %v2325_v19 = vrot.slane %v2323_v13, 1  ;;  %v2357_v13 = vrot.slane %v2355_v6, 1 }
 0x17c   : > { %5305 = vmatprep.mubr.msk.bf16.mxu0 %vm5752_vm5, %v5751_v48  ;;  %5376 = vmatpush3.bf16.msra.mxu0 %v3346_v20  ;;  %v2668_v20 = vsel %vm2282_vm9, %v2663_v15, %v2667_v18  ;;  %v3245_v15 = vsel %vm3228_vm10, %v3236_v11, %v3244_v7  ;;  %v5663_v18 = vld [vmem:[#allocation3 + $0x14] sm:$0xff]   ;;  %v5676_v11 = vld [vmem:[#allocation3 + $0x4c] sm:$0xff]  }
 0x17d   : > { %5451 = vmatprep.subr.bf16.mxu0 %v5751_v48  ;;  %v2326_v4 = vsel %vm2282_vm9, %v2321_v2, %v2325_v19  ;;  %v2329_v28 = vor.u32 %v2327_v26, %v2325_v19  ;;  %v3249_v19 = vrot.slane %v3247_v36, 1  ;;  %v2952_v22 = vrot.slane %v5663_v18, 1  ;;  %v5673_v36 = vld [vmem:[#allocation3 + $0x3c] sm:$0xff]  }
 0x17e   : > { %5220 = vmatmul.mubr.msk.bf16.gmra.mxu1 %vm567_vm6, %v1804_v21  ;;  %v2673_v21 = vshll.u32 %v5654_v16, 16 }
 0x17f   : > { %5263 = vmatprep.mubr.msk.bf16.mxu1 %vm5752_vm5, %v5751_v48  ;;  %v2334_v30 = vsel %vm2282_vm9, %v2329_v28, %v2333_v27 }
 0x180   : > { %v2675_v24 = vrot.slane %v2673_v21, 1  ;;  %v5662_v21 = vld [vmem:[#allocation3 + $0xc] sm:$0xfe]  }
 0x181   : > { %v2951_v27 = vrot.slane %v5662_v21, 1 }
 0x182   : > { %v2676_v29 = vsel %vm2282_vm9, %v2671_v42, %v2675_v24 }
 0x183   : > { %5306 = vmatmul.mubr.msk.bf16.gmra.mxu0 %vm567_vm6, %v2636_v33  ;;  %v2681_v33 = vshll.u32 %v5656_v14, 16 }
 0x184   : > { %5309 = vmatprep.mubr.msk.bf16.mxu0 %vm5752_vm5, %v5751_v48 }
 0x185   : > { %v2683_v40 = vrot.slane %v2681_v33, 1 }
 0x186   : > { %5264 = vmatmul.mubr.msk.bf16.vlgmr.msra.gmra.mxu1 %vm567_vm6, %v2294_v35  ;;  %v2339_v35 = vshll.u32 %v5655_v25, 16 }
 0x187   : > { %5338 = vmatpush3.bf16.msra.mxu1 %v2998_v31  ;;  %5267 = vmatprep.mubr.msk.bf16.mxu1 %vm5752_vm5, %v5751_v48  ;;  %v2677_v31 = vshrl.u32 %v5654_v16, 16  ;;  %v2687_v55 = vor.u32 %v2685_v50, %v2683_v40  ;;  %v5666_v16 = vld [vmem:[#allocation3 + $0x24] sm:$0xff]  }
 0x188   : > { %5413 = vmatprep.subr.bf16.mxu1 %v5751_v48  ;;  %v2341_v41 = vrot.slane %v2339_v35, 1  ;;  %v3259_v57 = vshll.u32 %v5666_v16, 16 }
 0x189   : > { %v2679_v37 = vor.u32 %v2677_v31, %v2675_v24  ;;  %v4892_v24 = vld [vmem:[%s6883_s3 + $0x18] sm:$0xf] }
 0x18a   : > { %v3693_v42 = vsel %vm1832_vm4, %v4892_v24, 0  ;;  %v3261_v25 = vrot.slane %v3259_v57, 2  ;;  %v5665_v31 = vld [vmem:[#allocation3 + $0x1c] sm:$0xff]  }
 0x18b   : > { %5310 = vmatmul.mubr.msk.bf16.gmra.mxu0 %vm567_vm6, %v2644_v49  ;;  %v2684_v43 = vsel %vm2282_vm9, %v2679_v37, %v2683_v40  ;;  %v2342_v49 = vsel %vm2282_vm9, %v2337_v12, %v2341_v41  ;;  %v2954_v37 = vrot.slane %v5665_v31, 1  ;;  %v5670_v12 = vld [vmem:[#allocation3 + $0x34] sm:$0xff]   ;;  %v5667_v40 = vld [vmem:[#allocation3 + $0x24] sm:$0xff]  }
 0x18c   : > { %5313 = vmatprep.mubr.msk.bf16.mxu0 %vm5752_vm5, %v5751_v48  ;;  %v3274_v44 = vshrl.u32 %v5670_v12, 16  ;;  %v3277_v47 = vshll.u32 %v5670_v12, 16 }
 0x18e   : > { %5268 = vmatmul.mubr.msk.bf16.gmra.mxu1 %vm567_vm6, %v2302_v32  ;;  %v2347_v32 = vshll.u32 %v5657_v39, 16  ;;  %v2955_v39 = vsel %vm676_vm3, %v2952_v22, %v2954_v37  ;;  %v3276_v50 = vrot.slane %v3274_v44, 1 }
 0x18f   : > { %5271 = vmatprep.mubr.msk.bf16.mxu1 %vm5752_vm5, %v5751_v48 }
 0x190   : > { %v2349_v23 = vrot.slane %v2347_v32, 1 }
 0x193   : > { %5314 = vmatmul.mubr.msk.bf16.gmra.mxu0 %vm567_vm6, %v2652_v59  ;;  %v2345_v59 = vor.u32 %v2343_v54, %v2341_v41  ;;  %v5669_v54 = vld [vmem:[#allocation3 + $0x2c] sm:$0xff]  }
 0x194   : > { %5317 = vmatprep.mubr.msk.bf16.mxu0 %vm5752_vm5, %v5751_v48  ;;  %v2958_v58 = vrot.slane %v5669_v54, 1 }
 0x195   : > { %v2350_v53 = vsel %vm2282_vm9, %v2345_v59, %v2349_v23 }
 0x196   : > { %5272 = vmatmul.mubr.msk.bf16.gmra.mxu1 %vm567_vm6, %v2310_v61  ;;  %v2692_v61 = vsel %vm2282_vm9, %v2687_v55, %v2691_v51  ;;  %v3279_v51 = vrot.slane %v3277_v47, 2  ;;  %v3283_v55 = vshrl.u32 %v5672_v52, 16  ;;  %v5680_v47 = vld [vmem:[#allocation3 + $0x14] sm:$0xfc]   ;;  %v5681_v52 = vld [vmem:[#allocation3 + $0x1c] sm:$0xff]  }
 0x197   : > { %5275 = vmatprep.mubr.msk.bf16.mxu1 %vm5752_vm5, %v5751_v48 }
 0x198   : > { %v3285_v38 = vrot.slane %v3283_v55, 1  ;;  %v5683_v55 = vld [vmem:[#allocation3 + $0x1c] sm:$0xff]  }
 0x19b   : > { %5318 = vmatmul.mubr.msk.bf16.gmra.mxu0 %vm567_vm6, %v2660_v9  ;;  %v2353_v9 = vor.u32 %v2351_v3, %v2349_v23  ;;  %v3280_v23 = vor.u32 %v3279_v51, %v3276_v50  ;;  %v5682_v50 = vld [vmem:[#allocation3 + $0x14] sm:$0xfe]  }
 0x19c   : > { %5321 = vmatprep.mubr.msk.bf16.mxu0 %vm5752_vm5, %v5751_v48  ;;  %v3580_v62 = vshll.u32 %v5682_v50, 16 }
 0x19d   : > { %v2358_v17 = vsel %vm2282_vm9, %v2353_v9, %v2357_v13  ;;  %v3297_v9 = vrot.slane %v3295_v0, 2  ;;  %v3301_v13 = vshrl.u32 %v5676_v11, 16 }
 0x19e   : > { %5276 = vmatmul.mubr.msk.bf16.gmra.mxu1 %vm567_vm6, %v2318_v10  ;;  %v4912_v10 = vld [vmem:[%s6883_s3 + $0x1c] sm:$0xf] }
 0x19f   : > { %5279 = vmatprep.mubr.msk.bf16.mxu1 %vm5752_vm5, %v5751_v48  ;;  %v3970_v2 = vsel %vm1832_vm4, %v4912_v10, 0  ;;  %v2961_v10 = vsel %vm676_vm3, %v2958_v58, %v2960_v1  ;;  %v3303_v21 = vrot.slane %v3301_v13, 1  ;;  %v3582_v13 = vrot.slane %v3580_v62, 2  ;;  %v5689_v62 = vld [vmem:[#allocation3 + $0x34] sm:$0xff]  }
 0x1a3   : > { %5322 = vmatmul.mubr.msk.bf16.gmra.mxu0 %vm567_vm6, %v2668_v20  ;;  %v3252_v20 = vrot.slane %v3250_v5, 2 }
 0x1a4   : > { %5325 = vmatprep.mubr.msk.bf16.mxu0 %vm5752_vm5, %v5751_v48 }
 0x1a5   : > { %v3253_v26 = vor.u32 %v3252_v20, %v3249_v19  ;;  %v5675_v20 = vld [vmem:[#allocation3 + $0x44] sm:$0xff]  }
 0x1a6   : > { %5280 = vmatmul.mubr.msk.bf16.gmra.mxu1 %vm567_vm6, %v2326_v4  ;;  %v3256_v4 = vshrl.u32 %v5666_v16, 16  ;;  %v2962_v16 = vrot.slane %v5673_v36, 1 }
 0x1a7   : > { %5283 = vmatprep.mubr.msk.bf16.mxu1 %vm5752_vm5, %v5751_v48  ;;  %v3254_v14 = vsel %vm3228_vm10, %v3244_v7, %v3253_v26  ;;  %v3294_v7 = vrot.slane %v3292_v63, 1  ;;  %v3924_v63 = vrot.slane %v5681_v52, 2 }
 0x1a8   : > { %v3258_v28 = vrot.slane %v3256_v4, 1  ;;  %v2963_v18 = vsel %vm676_vm3, %v2960_v1, %v2962_v16 }
 0x1a9   : > { %v3298_v5 = vor.u32 %v3297_v9, %v3294_v7 }
 0x1aa   : > { %v3262_v33 = vor.u32 %v3261_v25, %v3258_v28 }
 0x1ab   : > { %5326 = vmatmul.mubr.msk.bf16.gmra.mxu0 %vm567_vm6, %v2676_v29  ;;  %v2953_v29 = vsel %vm676_vm3, %v2951_v27, %v2952_v22  ;;  %v2964_v27 = vrot.slane %v5675_v20, 1 }
 0x1ac   : > { %5329 = vmatprep.mubr.msk.bf16.mxu0 %vm5752_vm5, %v5751_v48  ;;  %v3263_v46 = vsel %vm3228_vm10, %v3253_v26, %v3262_v33 }
 0x1ae   : > { %5284 = vmatmul.mubr.msk.bf16.gmra.mxu1 %vm567_vm6, %v2334_v30  ;;  %v5668_v30 = vld [vmem:[#allocation3 + $0x2c] sm:$0xff]  }
 0x1af   : > { %5287 = vmatprep.mubr.msk.bf16.mxu1 %vm5752_vm5, %v5751_v48  ;;  %v3265_v34 = vshrl.u32 %v5668_v30, 16  ;;  %v3268_v35 = vshll.u32 %v5668_v30, 16  ;;  %v2965_v30 = vsel %vm676_vm3, %v2962_v16, %v2964_v27 }
 0x1b1   : > { %v3267_v41 = vrot.slane %v3265_v34, 1 }
 0x1b3   : > { %5330 = vmatmul.mubr.msk.bf16.gmra.mxu0 %vm567_vm6, %v2684_v43  ;;  %v3270_v43 = vrot.slane %v3268_v35, 2  ;;  %v5677_v35 = vld [vmem:[#allocation3 + $0x4c] sm:$0xff]  }
 0x1b4   : > { %5333 = vmatprep.mubr.msk.bf16.mxu0 %vm5752_vm5, %v5751_v48 }
 0x1b5   : > { %v3271_v32 = vor.u32 %v3270_v43, %v3267_v41  ;;  %v2966_v41 = vrot.slane %v5677_v35, 1 }
 0x1b6   : > { %5288 = vmatmul.mubr.msk.bf16.gmra.mxu1 %vm567_vm6, %v2342_v49  ;;  %v2956_v49 = vrot.slane %v5667_v40, 1 }
 0x1b7   : > { %5291 = vmatprep.mubr.msk.bf16.mxu1 %vm5752_vm5, %v5751_v48  ;;  %v3272_v8 = vsel %vm3228_vm10, %v3262_v33, %v3271_v32  ;;  %v3281_v59 = vsel %vm3228_vm10, %v3271_v32, %v3280_v23 }
 0x1b8   : > { %v2957_v45 = vsel %vm676_vm3, %v2954_v37, %v2956_v49 }
 0x1bb   : > { %5334 = vmatmul.mubr.msk.bf16.gmra.mxu0 %vm567_vm6, %v2692_v61  ;;  %v2959_v61 = vsel %vm676_vm3, %v2956_v49, %v2958_v58  ;;  %v2967_v49 = vsel %vm676_vm3, %v2964_v27, %v2966_v41  ;;  %v3923_v58 = vrot.slane %v5680_v47, 2 }
 0x1bc   : > { %5377 = vmatprep.mubr.msk.bf16.mxu0 %vm5752_vm5, %v5751_v48 }
 0x1bd   : > { %v3925_v9 = vsel %vm435_vm0, %v3923_v58, %v3924_v63  ;;  %v5688_v58 = vld [vmem:[#allocation3 + $0x34] sm:$0xff]  }
 0x1be   : > { %5292 = vmatmul.mubr.msk.bf16.gmra.mxu1 %vm567_vm6, %v2350_v53  ;;  %v3288_v53 = vrot.slane %v3286_v56, 2 }
 0x1bf   : > { %5295 = vmatprep.mubr.msk.bf16.mxu1 %vm5752_vm5, %v5751_v48 }
 0x1c0   : > { %v3289_v3 = vor.u32 %v3288_v53, %v3285_v38 }
 0x1c2   : > { %v3290_v6 = vsel %vm3228_vm10, %v3280_v23, %v3289_v3 }
 0x1c3   : > { %5378 = vmatmul.mubr.msk.bf16.vlgmr.msra.gmra.mxu0 %vm567_vm6, %v3245_v15  ;;  %v3304_v15 = vshll.u32 %v5676_v11, 16 }
 0x1c4   : > { %5381 = vmatprep.mubr.msk.bf16.mxu0 %vm5752_vm5, %v5751_v48  ;;  %5452 = vmatpush3.bf16.msra.mxu0 %v3970_v2  ;;  %v3299_v2 = vsel %vm3228_vm10, %v3289_v3, %v3298_v5  ;;  %v3585_v3 = vshrl.u32 %v5683_v55, 16 }
 0x1c5   : > { %v3306_v4 = vrot.slane %v3304_v15, 2  ;;  %v5685_v15 = vld [vmem:[#allocation3 + $0x24] sm:$0xff]  }
 0x1c6   : > { %5296 = vmatmul.mubr.msk.bf16.gmra.mxu1 %vm567_vm6, %v2358_v17  ;;  %v5678_v17 = vld [vmem:[#allocation3 + $0x54] ss:$0 sps:$4 sm:$0x33]   ;;  %v3597_v27 = vshll.u32 %v5685_v15, 16 }
 0x1c7   : > { %5339 = vmatprep.mubr.msk.bf16.mxu1 %vm5752_vm5, %v5751_v48  ;;  %v3310_v22 = vshrl.u32 %v5678_v17, 16  ;;  %v3313_v24 = vshll.u32 %v5678_v17, 16 }
 0x1c9   : > { %v3312_v25 = vrot.slane %v3310_v22, 1 }
 0x1cb   : > { %5382 = vmatmul.mubr.msk.bf16.gmra.mxu0 %vm567_vm6, %v3254_v14 }
 0x1cc   : > { %5385 = vmatprep.mubr.msk.bf16.mxu0 %vm5752_vm5, %v5751_v48 }
 0x1ce   : > { %5340 = vmatmul.mubr.msk.bf16.vlgmr.msra.gmra.mxu1 %vm567_vm6, %v2953_v29  ;;  %v3315_v29 = vrot.slane %v3313_v24, 2  ;;  %v4932_v24 = vld [vmem:[%s6883_s3 + $0x20] sm:$0xf] }
 0x1cf   : > { %5414 = vmatpush3.bf16.msra.mxu1 %v3693_v42  ;;  %5343 = vmatprep.mubr.msk.bf16.mxu1 %vm5752_vm5, %v5751_v48  ;;  %v3307_v42 = vor.u32 %v3306_v4, %v3303_v21 }
 0x1d0   : > { %5489 = vmatprep.subr.bf16.mxu1 %v5751_v48 }
 0x1d1   : > { %v3308_v28 = vsel %vm3228_vm10, %v3298_v5, %v3307_v42 }
 0x1d3   : > { %5386 = vmatmul.mubr.msk.bf16.gmra.mxu0 %vm567_vm6, %v3263_v46  ;;  %v3316_v46 = vor.u32 %v3315_v29, %v3312_v25 }
 0x1d4   : > { %5389 = vmatprep.mubr.msk.bf16.mxu0 %vm5752_vm5, %v5751_v48 }
 0x1d5   : > { %v3317_v44 = vsel %vm3228_vm10, %v3307_v42, %v3316_v46  ;;  %v3599_v46 = vrot.slane %v3597_v27, 2 }
 0x1d6   : > { %5344 = vmatmul.mubr.msk.bf16.gmra.mxu1 %vm567_vm6, %v2955_v39 }
 0x1d7   : > { %5347 = vmatprep.mubr.msk.bf16.mxu1 %vm5752_vm5, %v5751_v48 }
 0x1db   : > { %5390 = vmatmul.mubr.msk.bf16.gmra.mxu0 %vm567_vm6, %v3272_v8  ;;  %v5679_v8 = vld [vmem:[#allocation3 + $0x54] ss:$0 sps:$4 sm:$0x11]  }
 0x1dc   : > { %5393 = vmatprep.mubr.msk.bf16.mxu0 %vm5752_vm5, %v5751_v48  ;;  %v2968_v60 = vrot.slane %v5679_v8, 1 }
 0x1de   : > { %5348 = vmatmul.mubr.msk.bf16.gmra.mxu1 %vm567_vm6, %v2957_v45  ;;  %v2969_v11 = vsel %vm676_vm3, %v2966_v41, %v2968_v60 }
 0x1df   : > { %5351 = vmatprep.mubr.msk.bf16.mxu1 %vm5752_vm5, %v5751_v48 }
 0x1e3   : > { %5394 = vmatmul.mubr.msk.bf16.gmra.mxu0 %vm567_vm6, %v3281_v59 }
 0x1e4   : > { %5397 = vmatprep.mubr.msk.bf16.mxu0 %vm5752_vm5, %v5751_v48 }
 0x1e6   : > { %5352 = vmatmul.mubr.msk.bf16.gmra.mxu1 %vm567_vm6, %v2959_v61  ;;  %v3577_v61 = vshrl.u32 %v5682_v50, 16 }
 0x1e7   : > { %5355 = vmatprep.mubr.msk.bf16.mxu1 %vm5752_vm5, %v5751_v48 }
 0x1e8   : > { %v3579_v5 = vrot.slane %v3577_v61, 1 }
 0x1ea   : > { %v3583_v22 = vor.u32 %v3582_v13, %v3579_v5 }
 0x1eb   : > { %5398 = vmatmul.mubr.msk.bf16.gmra.mxu0 %vm567_vm6, %v3290_v6  ;;  %v3588_v6 = vshll.u32 %v5683_v55, 16 }
 0x1ec   : > { %5401 = vmatprep.mubr.msk.bf16.mxu0 %vm5752_vm5, %v5751_v48 }
 0x1ed   : > { %v3590_v20 = vrot.slane %v3588_v6, 2  ;;  %v3930_v6 = vrot.slane %v5688_v58, 2 }
 0x1ee   : > { %5356 = vmatmul.mubr.msk.bf16.gmra.mxu1 %vm567_vm6, %v2961_v10  ;;  %v6422_v10 = vld [vmem:[#allocation3 + $0x24] sm:$0xff]  }
 0x1ef   : > { %5359 = vmatprep.mubr.msk.bf16.mxu1 %vm5752_vm5, %v5751_v48  ;;  %v3926_v4 = vrot.slane %v6422_v10, 2  ;;  %v3615_v10 = vshll.u32 %v5689_v62, 16 }
 0x1f3   : > { %v2088_v19 = vpop.f32.mrf.mxu0  ;;  %5402 = vmatmul.mubr.msk.bf16.gmra.mxu0 %vm567_vm6, %v3299_v2 }
 0x1f4   : > { %5405 = vmatprep.mubr.msk.bf16.mxu0 %vm5752_vm5, %v5751_v48 }
 0x1f5   : > { %v5227_v57 = vpop.f32.mrf.mxu0 }
 0x1f6   : > { %5360 = vmatmul.mubr.msk.bf16.gmra.mxu1 %vm567_vm6, %v2963_v18 }
 0x1f7   : > { %5363 = vmatprep.mubr.msk.bf16.mxu1 %vm5752_vm5, %v5751_v48  ;;  %v2091_v26 = vpop.f32.mrf.mxu0 }
 0x1f9   : > { %v5228_v14 = vpop.f32.mrf.mxu0 }
 0x1fb   : > { %v6394_v31 = vpop.f32.mrf.mxu0  ;;  %5406 = vmatmul.mubr.msk.bf16.gmra.mxu0 %vm567_vm6, %v3308_v28 }
 0x1fc   : > { %5409 = vmatprep.mubr.msk.bf16.mxu0 %vm5752_vm5, %v5751_v48 }
 0x1fd   : > { %v5231_v34 = vpop.f32.mrf.mxu0 }
 0x1fe   : > { %v1870_v33 = vpop.f32.mrf.mxu1  ;;  %5364 = vmatmul.mubr.msk.bf16.gmra.mxu1 %vm567_vm6, %v2965_v30 }
 0x1ff   : > { %1941 = vst.msk [vmem:[#allocation4] sm:$0xff] %vm567_vm6, %v1870_v33  ;;  %5367 = vmatprep.mubr.msk.bf16.mxu1 %vm5752_vm5, %v5751_v48  ;;  %v6403_v12 = vpop.f32.mrf.mxu0  ;;  %v3927_v33 = vsel %vm435_vm0, %v3924_v63, %v3926_v4 }
 0x200   : > { %v5189_v37 = vpop.f32.mrf.mxu1 }
 0x201   : > { %v5232_v40 = vpop.f32.mrf.mxu0 }
 0x202   : > { %v1873_v39 = vpop.f32.mrf.mxu1  ;;  %v5686_v40 = vld [vmem:[#allocation3 + $0x2c] sm:$0xff]  }
 0x203   : > { %1942 = vst.msk [vmem:[#allocation4 + $0x8] sm:$0xff] %vm567_vm6, %v1873_v39  ;;  %v6408_v32 = vpop.f32.mrf.mxu0  ;;  %5410 = vmatmul.mubr.msk.bf16.gmra.mxu0 %vm567_vm6, %v3317_v44  ;;  %v5687_v44 = vld [vmem:[#allocation3 + $0x2c] sm:$0xff]  }
 0x204   : > { %v5190_v43 = vpop.f32.mrf.mxu1  ;;  %5453 = vmatprep.mubr.msk.bf16.mxu0 %vm5752_vm5, %v5751_v48 }
 0x205   : > { %v5235_v23 = vpop.f32.mrf.mxu0 }
 0x206   : > { %v2159_v51 = vld [vmem:[#allocation4] sm:$0xff]  ;;  %v1878_v45 = vpop.f32.mrf.mxu1  ;;  %5368 = vmatmul.mubr.msk.bf16.gmra.mxu1 %vm567_vm6, %v2967_v49  ;;  %v3606_v23 = vshll.u32 %v5687_v44, 16 }
 0x207   : > { %v2177_v54 = vadd.f32 %v2159_v51, %v2088_v19  ;;  %1943 = vst.msk [vmem:[#allocation4 + $0x10] sm:$0xff] %vm567_vm6, %v1878_v45  ;;  %5371 = vmatprep.mubr.msk.bf16.mxu1 %vm5752_vm5, %v5751_v48  ;;  %v6418_v59 = vpop.f32.mrf.mxu0  ;;  %v3587_v19 = vrot.slane %v3585_v3, 1  ;;  %v3928_v45 = vrot.slane %v5686_v40, 2  ;;  %v5693_v40 = vld [vmem:[#allocation3 + $0x44] sm:$0xff]  }
 0x208   : > { %v5193_v56 = vpop.f32.mrf.mxu1 }
 0x209   : > { %2195 = vst.msk [vmem:[#allocation4] sm:$0xff] %vm567_vm6, %v2177_v54  ;;  %v5236_v1 = vpop.f32.mrf.mxu0  ;;  %v3591_v29 = vor.u32 %v3590_v20, %v3587_v19  ;;  %v3603_v54 = vshrl.u32 %v5687_v44, 16  ;;  %v3929_v56 = vsel %vm435_vm0, %v3926_v4, %v3928_v45  ;;  %v3617_v20 = vrot.slane %v3615_v10, 2 }
 0x20a   : > { %v2160_v38 = vld [vmem:[#allocation4 + $0x8] sm:$0xff]  ;;  %v1881_v53 = vpop.f32.mrf.mxu1  ;;  %v3608_v1 = vrot.slane %v3606_v23, 2 }
 0x20b   : > { %v2178_v0 = vadd.f32 %v2160_v38, %v2091_v26  ;;  %1944 = vst.msk [vmem:[#allocation4 + $0x18] sm:$0xff] %vm567_vm6, %v1881_v53  ;;  %v6426_v36 = vpop.f32.mrf.mxu0  ;;  %5454 = vmatmul.mubr.msk.bf16.vlgmr.msra.gmra.mxu0 %vm567_vm6, %v3925_v9  ;;  %v3594_v26 = vshrl.u32 %v5685_v15, 16  ;;  %v3592_v34 = vsel %vm3228_vm10, %v3583_v22, %v3591_v29  ;;  %v3612_v9 = vshrl.u32 %v5689_v62, 16 }
 0x20c   : > { %v5194_v7 = vpop.f32.mrf.mxu1  ;;  %5457 = vmatprep.mubr.msk.bf16.mxu0 %vm5752_vm5, %v5751_v48 }
 0x20d   : > { %2196 = vst.msk [vmem:[#allocation4 + $0x8] sm:$0xff] %vm567_vm6, %v2178_v0  ;;  %v5239_v18 = vpop.f32.mrf.mxu0  ;;  %v3596_v37 = vrot.slane %v3594_v26, 1  ;;  %v3605_v0 = vrot.slane %v3603_v54, 1  ;;  %v3614_v19 = vrot.slane %v3612_v9, 1  ;;  %v5691_v26 = vld [vmem:[#allocation3 + $0x3c] sm:$0xff]  }
 0x20e   : > { %v2161_v16 = vld [vmem:[#allocation4 + $0x10] sm:$0xff]  ;;  %v1886_v2 = vpop.f32.mrf.mxu1  ;;  %5372 = vmatmul.mubr.msk.bf16.gmra.mxu1 %vm567_vm6, %v2969_v11 }
 0x20f   : > { %v2179_v17 = vadd.f32 %v2161_v16, %v6394_v31  ;;  %1945 = vst.msk [vmem:[#allocation4 + $0x20] sm:$0xff] %vm567_vm6, %v1886_v2  ;;  %5415 = vmatprep.mubr.msk.bf16.mxu1 %vm5752_vm5, %v5751_v48  ;;  %v6438_v57 = vpop.f32.mrf.mxu0  ;;  %v4318_v31 = vsel %vm1832_vm4, %v4932_v24, 0  ;;  %v3600_v8 = vor.u32 %v3599_v46, %v3596_v37  ;;  %v3609_v15 = vor.u32 %v3608_v1, %v3605_v0  ;;  %v5692_v46 = vld [vmem:[#allocation3 + $0x44] sm:$0xff]   ;;  %v5694_v1 = vld [vmem:[#allocation3 + $0x4c] sm:$0xff]  }
 0x210   : > { %v5197_v21 = vpop.f32.mrf.mxu1  ;;  %v3931_v2 = vsel %vm435_vm0, %v3928_v45, %v3930_v6 }
 0x211   : > { %2197 = vst.msk [vmem:[#allocation4 + $0x10] sm:$0xff] %vm567_vm6, %v2179_v17  ;;  %v5240_v25 = vpop.f32.mrf.mxu0  ;;  %v3601_v60 = vsel %vm3228_vm10, %v3591_v29, %v3600_v8  ;;  %v3610_v17 = vsel %vm3228_vm10, %v3600_v8, %v3609_v15 }
 0x212   : > { %v2162_v42 = vld [vmem:[#allocation4 + $0x18] sm:$0xff]  ;;  %v1889_v14 = vpop.f32.mrf.mxu1 }
 0x213   : > { %v2180_v28 = vadd.f32 %v2162_v42, %v6403_v12  ;;  %1946 = vst.msk [vmem:[#allocation4 + $0x28] sm:$0xff] %vm567_vm6, %v1889_v14  ;;  %v6449_v35 = vpop.f32.mrf.mxu0  ;;  %5458 = vmatmul.mubr.msk.bf16.gmra.mxu0 %vm567_vm6, %v3927_v33  ;;  %v3618_v14 = vor.u32 %v3617_v20, %v3614_v19  ;;  %v3621_v33 = vshrl.u32 %v5691_v26, 16  ;;  %v6537_v20 = vld [vmem:[#allocation3 + $0x54] sm:$0xff]  }
 0x214   : > { %v5198_v30 = vpop.f32.mrf.mxu1  ;;  %5461 = vmatprep.mubr.msk.bf16.mxu0 %vm5752_vm5, %v5751_v48 }
 0x215   : > { %2198 = vst.msk [vmem:[#allocation4 + $0x18] sm:$0xff] %vm567_vm6, %v2180_v28  ;;  %v5243_v43 = vpop.f32.mrf.mxu0 }
 0x216   : > { %v2163_v12 = vld [vmem:[#allocation4 + $0x20] sm:$0xff]  ;;  %v1894_v39 = vpop.f32.mrf.mxu1  ;;  %5416 = vmatmul.mubr.msk.bf16.vlgmr.msra.gmra.mxu1 %vm567_vm6, %v3592_v34  ;;  %v3624_v34 = vshll.u32 %v5691_v26, 16 }
 0x217   : > { %v2181_v41 = vadd.f32 %v2163_v12, %v6408_v32  ;;  %1947 = vst.msk [vmem:[#allocation4 + $0x30] sm:$0xff] %vm567_vm6, %v1894_v39  ;;  %5490 = vmatpush3.bf16.msra.mxu1 %v4318_v31  ;;  %5419 = vmatprep.mubr.msk.bf16.mxu1 %vm5752_vm5, %v5751_v48  ;;  %v6460_v49 = vpop.f32.mrf.mxu0  ;;  %v3619_v12 = vsel %vm3228_vm10, %v3609_v15, %v3618_v14 }
 0x218   : > { %v5201_v47 = vpop.f32.mrf.mxu1  ;;  %v3626_v8 = vrot.slane %v3624_v34, 2 }
 0x219   : > { %2199 = vst.msk [vmem:[#allocation4 + $0x20] sm:$0xff] %vm567_vm6, %v2181_v41  ;;  %v5244_v32 = vpop.f32.mrf.mxu0 }
 0x21a   : > { %v2164_v50 = vld [vmem:[#allocation4 + $0x28] sm:$0xff]  ;;  %v1897_v51 = vpop.f32.mrf.mxu1  ;;  %v3633_v32 = vshll.u32 %v5693_v40, 16 }
 0x21b   : > { %v2182_v52 = vadd.f32 %v2164_v50, %v6418_v59  ;;  %1948 = vst.msk [vmem:[#allocation4 + $0x38] sm:$0xff] %vm567_vm6, %v1897_v51  ;;  %v6467_v61 = vpop.f32.mrf.mxu0  ;;  %5462 = vmatmul.mubr.msk.bf16.gmra.mxu0 %vm567_vm6, %v3929_v56  ;;  %v3934_v51 = vrot.slane %v5692_v46, 2 }
 0x21c   : > { %v5202_v55 = vpop.f32.mrf.mxu1  ;;  %5465 = vmatprep.mubr.msk.bf16.mxu0 %vm5752_vm5, %v5751_v48 }
 0x21d   : > { %2200 = vst.msk [vmem:[#allocation4 + $0x28] sm:$0xff] %vm567_vm6, %v2182_v52  ;;  %v5247_v63 = vpop.f32.mrf.mxu0  ;;  %v3630_v52 = vshrl.u32 %v5693_v40, 16 }
 0x21e   : > { %v2165_v38 = vld [vmem:[#allocation4 + $0x30] sm:$0xff]  ;;  %v1902_v59 = vpop.f32.mrf.mxu1  ;;  %5420 = vmatmul.mubr.msk.bf16.gmra.mxu1 %vm567_vm6, %v3601_v60 }
 0x21f   : > { %v2183_v53 = vadd.f32 %v2165_v38, %v6426_v36  ;;  %1949 = vst.msk [vmem:[#allocation4 + $0x40] sm:$0xff] %vm567_vm6, %v1902_v59  ;;  %5423 = vmatprep.mubr.msk.bf16.mxu1 %vm5752_vm5, %v5751_v48  ;;  %v6478_v7 = vpop.f32.mrf.mxu0  ;;  %v3632_v59 = vrot.slane %v3630_v52, 1 }
 0x220   : > { %v5205_v3 = vpop.f32.mrf.mxu1 }
 0x221   : > { %2201 = vst.msk [vmem:[#allocation4 + $0x30] sm:$0xff] %vm567_vm6, %v2183_v53  ;;  %v5248_v13 = vpop.f32.mrf.mxu0  ;;  %v3635_v53 = vrot.slane %v3633_v32, 2  ;;  %v5699_v32 = vld [vmem:[#allocation3 + $0x5c] ss:$0 sps:$4 sm:$0x33]  }
 0x222   : > { %v2166_v11 = vld [vmem:[#allocation4 + $0x38] sm:$0xff]  ;;  %v1905_v5 = vpop.f32.mrf.mxu1  ;;  %v3936_v13 = vrot.slane %v5694_v1, 2 }
 0x223   : > { %v2184_v36 = vadd.f32 %v2166_v11, %v6438_v57  ;;  %1950 = vst.msk [vmem:[#allocation4 + $0x48] sm:$0xff] %vm567_vm6, %v1905_v5  ;;  %v6485_v18 = vpop.f32.mrf.mxu0  ;;  %5466 = vmatmul.mubr.msk.bf16.gmra.mxu0 %vm567_vm6, %v3931_v2  ;;  %v5690_v57 = vld [vmem:[#allocation3 + $0x3c] sm:$0xff]   ;;  %v3636_v11 = vor.u32 %v3635_v53, %v3632_v59  ;;  %v3657_v53 = vshrl.u32 %v5699_v32, 16 }
 0x224   : > { %v5206_v16 = vpop.f32.mrf.mxu1  ;;  %5469 = vmatprep.mubr.msk.bf16.mxu0 %vm5752_vm5, %v5751_v48  ;;  %v3932_v29 = vrot.slane %v5690_v57, 2  ;;  %v3937_v19 = vsel %vm435_vm0, %v3934_v51, %v3936_v13  ;;  %v5697_v57 = vld [vmem:[#allocation3 + $0x54] sm:$0xff]  }
 0x225   : > { %2202 = vst.msk [vmem:[#allocation4 + $0x38] sm:$0xff] %vm567_vm6, %v2184_v36  ;;  %v5251_v24 = vpop.f32.mrf.mxu0 }
 0x226   : > { %v2167_v21 = vld [vmem:[#allocation4 + $0x40] sm:$0xff]  ;;  %v1910_v4 = vpop.f32.mrf.mxu1  ;;  %5424 = vmatmul.mubr.msk.bf16.gmra.mxu1 %vm567_vm6, %v3610_v17  ;;  %v3933_v37 = vsel %vm435_vm0, %v3930_v6, %v3932_v29 }
 0x227   : > { %v2185_v22 = vadd.f32 %v2167_v21, %v6449_v35  ;;  %1951 = vst.msk [vmem:[#allocation4 + $0x50] sm:$0xff] %vm567_vm6, %v1910_v4  ;;  %5427 = vmatprep.mubr.msk.bf16.mxu1 %vm5752_vm5, %v5751_v48  ;;  %v6496_v42 = vpop.f32.mrf.mxu0 }
 0x228   : > { %v5209_v27 = vpop.f32.mrf.mxu1 }
 0x229   : > { %2203 = vst.msk [vmem:[#allocation4 + $0x40] sm:$0xff] %vm567_vm6, %v2185_v22  ;;  %v5252_v31 = vpop.f32.mrf.mxu0 }
 0x22a   : > { %v2168_v28 = vld [vmem:[#allocation4 + $0x48] sm:$0xff]  ;;  %v1913_v25 = vpop.f32.mrf.mxu1  ;;  %v3651_v31 = vshll.u32 %v5697_v57, 16 }
 0x22b   : > { %v2186_v30 = vadd.f32 %v2168_v28, %v6460_v49  ;;  %1952 = vst.msk [vmem:[#allocation4 + $0x58] sm:$0xff] %vm567_vm6, %v1913_v25  ;;  %v6503_v39 = vpop.f32.mrf.mxu0  ;;  %5470 = vmatmul.mubr.msk.bf16.gmra.mxu0 %vm567_vm6, %v3933_v37  ;;  %v3623_v49 = vrot.slane %v3621_v33, 1  ;;  %v3938_v25 = vrot.slane %v6537_v20, 2 }
 0x22c   : > { %v5210_v35 = vpop.f32.mrf.mxu1  ;;  %5473 = vmatprep.mubr.msk.bf16.mxu0 %vm5752_vm5, %v5751_v48 }
 0x22d   : > { %2204 = vst.msk [vmem:[#allocation4 + $0x48] sm:$0xff] %vm567_vm6, %v2186_v30  ;;  %v5255_v47 = vpop.f32.mrf.mxu0  ;;  %v3627_v58 = vor.u32 %v3626_v8, %v3623_v49  ;;  %v3648_v30 = vshrl.u32 %v5697_v57, 16  ;;  %v2494_v8 = vld [vmem:[#allocation4] sm:$0xff]  ;;  %v2497_v57 = vld [vmem:[#allocation4 + $0x18] sm:$0xff] }
 0x22e   : > { %v2169_v41 = vld [vmem:[#allocation4 + $0x50] sm:$0xff]  ;;  %v1918_v43 = vpop.f32.mrf.mxu1  ;;  %5428 = vmatmul.mubr.msk.bf16.gmra.mxu1 %vm567_vm6, %v3619_v12 }
 0x22f   : > { %v2187_v44 = vadd.f32 %v2169_v41, %v6467_v61  ;;  %1953 = vst.msk [vmem:[#allocation4 + $0x60] sm:$0xff] %vm567_vm6, %v1918_v43  ;;  %5431 = vmatprep.mubr.msk.bf16.mxu1 %vm5752_vm5, %v5751_v48  ;;  %v6514_v45 = vpop.f32.mrf.mxu0  ;;  %v3935_v61 = vsel %vm435_vm0, %v3932_v29, %v3934_v51  ;;  %v3628_v62 = vsel %vm3228_vm10, %v3618_v14, %v3627_v58  ;;  %v3650_v43 = vrot.slane %v3648_v30, 1 }
 0x230   : > { %v5213_v50 = vpop.f32.mrf.mxu1  ;;  %v3637_v21 = vsel %vm3228_vm10, %v3627_v58, %v3636_v11 }
 0x231   : > { %2205 = vst.msk [vmem:[#allocation4 + $0x50] sm:$0xff] %vm567_vm6, %v2187_v44  ;;  %v5256_v56 = vpop.f32.mrf.mxu0  ;;  %v3653_v44 = vrot.slane %v3651_v31, 2  ;;  %v5698_v50 = vld [vmem:[#allocation3 + $0x5c] ss:$0 sps:$4 sm:$0x33]  }
 0x232   : > { %v2170_v54 = vld [vmem:[#allocation4 + $0x58] sm:$0xff]  ;;  %v1921_v23 = vpop.f32.mrf.mxu1 }
 0x233   : > { %v2188_v55 = vadd.f32 %v2170_v54, %v6478_v7  ;;  %1954 = vst.msk [vmem:[#allocation4 + $0x68] sm:$0xff] %vm567_vm6, %v1921_v23  ;;  %v6521_v38 = vpop.f32.mrf.mxu0  ;;  %5474 = vmatmul.mubr.msk.bf16.gmra.mxu0 %vm567_vm6, %v3935_v61  ;;  %v5695_v7 = vld [vmem:[#allocation3 + $0x4c] sm:$0xff]   ;;  %v3940_v61 = vrot.slane %v5698_v50, 2 }
 0x234   : > { %v5214_v60 = vpop.f32.mrf.mxu1  ;;  %5477 = vmatprep.mubr.msk.bf16.mxu0 %vm5752_vm5, %v5751_v48  ;;  %v3639_v2 = vshrl.u32 %v5695_v7, 16  ;;  %v3642_v17 = vshll.u32 %v5695_v7, 16  ;;  %v5700_v7 = vld [vmem:[#allocation3 + $0x14] sm:$0xfc]  }
 0x235   : > { %2206 = vst.msk [vmem:[#allocation4 + $0x58] sm:$0xff] %vm567_vm6, %v2188_v55  ;;  %v5259_v6 = vpop.f32.mrf.mxu0  ;;  %v3654_v55 = vor.u32 %v3653_v44, %v3650_v43  ;;  %v2495_v60 = vld [vmem:[#allocation4 + $0x8] sm:$0xff]  ;;  %v3941_v1 = vsel %vm435_vm0, %v3938_v25, %v3940_v61 }
 0x236   : > { %v2171_v63 = vld [vmem:[#allocation4 + $0x60] sm:$0xff]  ;;  %v1926_v0 = vpop.f32.mrf.mxu1  ;;  %5432 = vmatmul.mubr.msk.bf16.gmra.mxu1 %vm567_vm6, %v3628_v62  ;;  %v3644_v14 = vrot.slane %v3642_v17, 2 }
 0x237   : > { %v2189_v3 = vadd.f32 %v2171_v63, %v6485_v18  ;;  %1955 = vst.msk [vmem:[#allocation4 + $0x70] sm:$0xff] %vm567_vm6, %v1926_v0  ;;  %5435 = vmatprep.mubr.msk.bf16.mxu1 %vm5752_vm5, %v5751_v48  ;;  %v6532_v10 = vpop.f32.mrf.mxu0  ;;  %v3660_v63 = vshll.u32 %v5699_v32, 16 }
 0x238   : > { %v5217_v9 = vpop.f32.mrf.mxu1 }
 0x239   : > { %2207 = vst.msk [vmem:[#allocation4 + $0x60] sm:$0xff] %vm567_vm6, %v2189_v3  ;;  %v5260_v16 = vpop.f32.mrf.mxu0 }
 0x23a   : > { %v2172_v5 = vld [vmem:[#allocation4 + $0x68] sm:$0xff]  ;;  %v1929_v36 = vpop.f32.mrf.mxu1 }
 0x23b   : > { %v2190_v15 = vadd.f32 %v2172_v5, %v6496_v42  ;;  %1956 = vst.msk [vmem:[#allocation4 + $0x78] sm:$0xff] %vm567_vm6, %v1929_v36  ;;  %v6541_v4 = vpop.f32.mrf.mxu0  ;;  %5478 = vmatmul.mubr.msk.bf16.gmra.mxu0 %vm567_vm6, %v3937_v19  ;;  %v3641_v42 = vrot.slane %v3639_v2, 1  ;;  %v3659_v36 = vrot.slane %v3657_v53, 1  ;;  %v4205_v19 = vshll.u32 %v5700_v7, 16 }
 0x23c   : > { %v5218_v18 = vpop.f32.mrf.mxu1  ;;  %5481 = vmatprep.mubr.msk.bf16.mxu0 %vm5752_vm5, %v5751_v48 }
 0x23d   : > { %2208 = vst.msk [vmem:[#allocation4 + $0x68] sm:$0xff] %vm567_vm6, %v2190_v15  ;;  %v5303_v27 = vpop.f32.mrf.mxu0  ;;  %v3645_v46 = vor.u32 %v3644_v14, %v3641_v42  ;;  %v5701_v15 = vld [vmem:[#allocation3 + $0x1c] sm:$0xff]   ;;  %v4202_v18 = vshrl.u32 %v5700_v7, 16 }
 0x23e   : > { %v2173_v22 = vld [vmem:[#allocation4 + $0x70] sm:$0xff]  ;;  %v1934_v24 = vpop.f32.mrf.mxu1  ;;  %5436 = vmatmul.mubr.msk.bf16.gmra.mxu1 %vm567_vm6, %v3637_v21  ;;  %v4210_v27 = vshrl.u32 %v5701_v15, 16  ;;  %v4213_v42 = vshll.u32 %v5701_v15, 16 }
 0x23f   : > { %v2191_v26 = vadd.f32 %v2173_v22, %v6503_v39  ;;  %1957 = vst.msk [vmem:[#allocation4 + $0x80] sm:$0xff] %vm567_vm6, %v1934_v24  ;;  %5439 = vmatprep.mubr.msk.bf16.mxu1 %vm5752_vm5, %v5751_v48  ;;  %v6553_v29 = vpop.f32.mrf.mxu0  ;;  %v3939_v39 = vsel %vm435_vm0, %v3936_v13, %v3938_v25  ;;  %v3646_v40 = vsel %vm3228_vm10, %v3636_v11, %v3645_v46  ;;  %v3662_v13 = vrot.slane %v3660_v63, 2 }
 0x240   : > { %v5221_v28 = vpop.f32.mrf.mxu1  ;;  %v3655_v3 = vsel %vm3228_vm10, %v3645_v46, %v3654_v55  ;;  %v4204_v31 = vrot.slane %v4202_v18, 2 }
 0x241   : > { %2209 = vst.msk [vmem:[#allocation4 + $0x70] sm:$0xff] %vm567_vm6, %v2191_v26  ;;  %v5304_v37 = vpop.f32.mrf.mxu0  ;;  %v3663_v26 = vor.u32 %v3662_v13, %v3659_v36 }
 0x242   : > { %v2174_v33 = vld [vmem:[#allocation4 + $0x78] sm:$0xff]  ;;  %v1937_v34 = vpop.f32.mrf.mxu1  ;;  %v2498_v37 = vld [vmem:[#allocation4 + $0x20] sm:$0xff] }
 0x243   : > { %v2192_v35 = vadd.f32 %v2174_v33, %v6514_v45  ;;  %1958 = vst.msk [vmem:[#allocation4 + $0x88] sm:$0xff] %vm567_vm6, %v1937_v34  ;;  %v6560_v41 = vpop.f32.mrf.mxu0  ;;  %5482 = vmatmul.mubr.msk.bf16.gmra.mxu0 %vm567_vm6, %v3939_v39  ;;  %v3664_v25 = vsel %vm3228_vm10, %v3654_v55, %v3663_v26  ;;  %v4207_v33 = vrot.slane %v4205_v19, 3  ;;  %v4212_v39 = vrot.slane %v4210_v27, 2 }
 0x244   : > { %v5222_v12 = vpop.f32.mrf.mxu1  ;;  %5485 = vmatprep.mubr.msk.bf16.mxu0 %vm5752_vm5, %v5751_v48 }
 0x245   : > { %2210 = vst.msk [vmem:[#allocation4 + $0x78] sm:$0xff] %vm567_vm6, %v2192_v35  ;;  %v5307_v52 = vpop.f32.mrf.mxu0 }
 0x246   : > { %v2175_v47 = vld [vmem:[#allocation4 + $0x80] sm:$0xff]  ;;  %v2423_v49 = vpop.f32.mrf.mxu1  ;;  %5440 = vmatmul.mubr.msk.bf16.gmra.mxu1 %vm567_vm6, %v3646_v40  ;;  %v4215_v40 = vrot.slane %v4213_v42, 3 }
 0x247   : > { %v2193_v51 = vadd.f32 %v2175_v47, %v6521_v38  ;;  %v2512_v45 = vadd.f32 %v2494_v8, %v2423_v49  ;;  %5443 = vmatprep.mubr.msk.bf16.mxu1 %vm5752_vm5, %v5751_v48  ;;  %v6571_v23 = vpop.f32.mrf.mxu0 }
 0x248   : > { %v5265_v54 = vpop.f32.mrf.mxu1 }
 0x249   : > { %2211 = vst.msk [vmem:[#allocation4 + $0x80] sm:$0xff] %vm567_vm6, %v2193_v51  ;;  %2530 = vst.msk [vmem:[#allocation4] sm:$0xff] %vm567_vm6, %v2512_v45  ;;  %v5308_v59 = vpop.f32.mrf.mxu0  ;;  %v2499_v45 = vld [vmem:[#allocation4 + $0x28] sm:$0xff]  ;;  %v4216_v54 = vor.u32 %v4215_v40, %v4212_v39 }
 0x24a   : > { %v2176_v56 = vld [vmem:[#allocation4 + $0x88] sm:$0xff]  ;;  %v2426_v58 = vpop.f32.mrf.mxu1  ;;  %v2500_v59 = vld [vmem:[#allocation4 + $0x30] sm:$0xff] }
 0x24b   : > { %v2194_v62 = vadd.f32 %v2176_v56, %v6532_v10  ;;  %v2513_v38 = vadd.f32 %v2495_v60, %v2426_v58  ;;  %v6578_v6 = vpop.f32.mrf.mxu0  ;;  %5486 = vmatmul.mubr.msk.bf16.gmra.mxu0 %vm567_vm6, %v3941_v1  ;;  %v2496_v10 = vld [vmem:[#allocation4 + $0x10] sm:$0xff] }
 0x24c   : > { %v5266_v0 = vpop.f32.mrf.mxu1 }
 0x24d   : > { %2212 = vst.msk [vmem:[#allocation4 + $0x88] sm:$0xff] %vm567_vm6, %v2194_v62  ;;  %2531 = vst.msk [vmem:[#allocation4 + $0x8] sm:$0xff] %vm567_vm6, %v2513_v38  ;;  %v5311_v5 = vpop.f32.mrf.mxu0  ;;  %v5703_v0 = vld [vmem:[#allocation3 + $0x2c] sm:$0xff]  }
 0x24e   : > { %v2431_v9 = vpop.f32.mrf.mxu1  ;;  %5444 = vmatmul.mubr.msk.bf16.gmra.mxu1 %vm567_vm6, %v3655_v3  ;;  %v4228_v13 = vshrl.u32 %v5703_v0, 16  ;;  %v4231_v15 = vshll.u32 %v5703_v0, 16  ;;  %v5706_v0 = vld [vmem:[#allocation3 + $0x44] sm:$0xff]  }
 0x24f   : > { %v2514_v11 = vadd.f32 %v2496_v10, %v2431_v9  ;;  %5447 = vmatprep.mubr.msk.bf16.mxu1 %vm5752_vm5, %v5751_v48  ;;  %v6585_v17 = vpop.f32.mrf.mxu0 }
 0x250   : > { %v5269_v16 = vpop.f32.mrf.mxu1  ;;  %v2828_v2 = vld [vmem:[#allocation4] sm:$0xff]  ;;  %v4230_v26 = vrot.slane %v4228_v13, 2  ;;  %v4233_v27 = vrot.slane %v4231_v15, 3  ;;  %v4258_v15 = vshll.u32 %v5706_v0, 16 }
 0x251   : > { %2532 = vst.msk [vmem:[#allocation4 + $0x10] sm:$0xff] %vm567_vm6, %v2514_v11  ;;  %v2846_v20 = vadd.f32 %v2828_v2, %v6541_v4  ;;  %v5312_v24 = vpop.f32.mrf.mxu0  ;;  %v5702_v4 = vld [vmem:[#allocation3 + $0x24] sm:$0xff]   ;;  %v2501_v11 = vld [vmem:[#allocation4 + $0x38] sm:$0xff] }
 0x252   : > { %v2434_v21 = vpop.f32.mrf.mxu1  ;;  %v4219_v49 = vshrl.u32 %v5702_v4, 16  ;;  %v4222_v8 = vshll.u32 %v5702_v4, 16  ;;  %v2503_v4 = vld [vmem:[#allocation4 + $0x48] sm:$0xff] }
 0x253   : > { %v2515_v22 = vadd.f32 %v2497_v57, %v2434_v21  ;;  %2864 = vst.msk [vmem:[#allocation4] sm:$0xff] %vm567_vm6, %v2846_v20  ;;  %v6591_v30 = vpop.f32.mrf.mxu0  ;;  %v5704_v20 = vld [vmem:[#allocation3 + $0x34] sm:$0xff]   ;;  %v2502_v57 = vld [vmem:[#allocation4 + $0x40] sm:$0xff] }
 0x254   : > { %v5270_v14 = vpop.f32.mrf.mxu1  ;;  %v2829_v28 = vld [vmem:[#allocation4 + $0x8] sm:$0xff]  ;;  %v4221_v61 = vrot.slane %v4219_v49, 2  ;;  %v4224_v62 = vrot.slane %v4222_v8, 3  ;;  %v2504_v49 = vld [vmem:[#allocation4 + $0x50] sm:$0xff] }
 0x255   : > { %2533 = vst.msk [vmem:[#allocation4 + $0x18] sm:$0xff] %vm567_vm6, %v2515_v22  ;;  %v2847_v34 = vadd.f32 %v2829_v28, %v6553_v29  ;;  %v5315_v12 = vpop.f32.mrf.mxu0  ;;  %v4208_v29 = vor.u32 %v4207_v33, %v4204_v31 }
 0x256   : > { %v2439_v35 = vpop.f32.mrf.mxu1  ;;  %5448 = vmatmul.mubr.msk.bf16.gmra.mxu1 %vm567_vm6, %v3664_v25  ;;  %v4225_v9 = vor.u32 %v4224_v62, %v4221_v61  ;;  %v4240_v25 = vshll.u32 %v5704_v20, 16 }
 0x257   : > { %v2516_v46 = vadd.f32 %v2498_v37, %v2439_v35  ;;  %5491 = vmatprep.mubr.msk.bf16.mxu1 %vm5752_vm5, %v5751_v48  ;;  %2865 = vst.msk [vmem:[#allocation4 + $0x8] sm:$0xff] %vm567_vm6, %v2847_v34  ;;  %v6599_v47 = vpop.f32.mrf.mxu0  ;;  %v4217_v58 = vsel %vm4200_vm11, %v4208_v29, %v4216_v54  ;;  %v4234_v37 = vor.u32 %v4233_v27, %v4230_v26 }
 0x258   : > { %v5273_v43 = vpop.f32.mrf.mxu1  ;;  %v2830_v44 = vld [vmem:[#allocation4 + $0x10] sm:$0xff]  ;;  %v4226_v18 = vsel %vm4200_vm11, %v4216_v54, %v4225_v9 }
 0x259   : > { %2534 = vst.msk [vmem:[#allocation4 + $0x20] sm:$0xff] %vm567_vm6, %v2516_v46  ;;  %v2848_v50 = vadd.f32 %v2830_v44, %v6560_v41  ;;  %v5316_v32 = vpop.f32.mrf.mxu0  ;;  %v4235_v39 = vsel %vm4200_vm11, %v4225_v9, %v4234_v37  ;;  %v4242_v44 = vrot.slane %v4240_v25, 3 }
 0x25a   : > { %v2442_v51 = vpop.f32.mrf.mxu1 }
 0x25b   : > { %v2517_v52 = vadd.f32 %v2499_v45, %v2442_v51  ;;  %2866 = vst.msk [vmem:[#allocation4 + $0x10] sm:$0xff] %vm567_vm6, %v2848_v50  ;;  %v6605_v60 = vpop.f32.mrf.mxu0  ;;  %v5705_v51 = vld [vmem:[#allocation3 + $0x3c] sm:$0xff]  }
 0x25c   : > { %v5274_v55 = vpop.f32.mrf.mxu1  ;;  %v2831_v56 = vld [vmem:[#allocation4 + $0x18] sm:$0xff]  ;;  %v4246_v62 = vshrl.u32 %v5705_v51, 16 }
 0x25d   : > { %2535 = vst.msk [vmem:[#allocation4 + $0x28] sm:$0xff] %vm567_vm6, %v2517_v52  ;;  %v2849_v41 = vadd.f32 %v2831_v56, %v6571_v23  ;;  %v5319_v63 = vpop.f32.mrf.mxu0  ;;  %v2505_v56 = vld [vmem:[#allocation4 + $0x58] sm:$0xff] }
 0x25e   : > { %v2447_v38 = vpop.f32.mrf.mxu1  ;;  %5492 = vmatmul.mubr.msk.bf16.vlgmr.msra.gmra.mxu1 %vm567_vm6, %v4217_v58 }
 0x25f   : > { %v2518_v53 = vadd.f32 %v2500_v59, %v2447_v38  ;;  %5495 = vmatprep.mubr.msk.bf16.mxu1 %vm5752_vm5, %v5751_v48  ;;  %2867 = vst.msk [vmem:[#allocation4 + $0x18] sm:$0xff] %vm567_vm6, %v2849_v41  ;;  %v6613_v7 = vpop.f32.mrf.mxu0  ;;  %v4249_v41 = vshll.u32 %v5705_v51, 16  ;;  %v5708_v51 = vld [vmem:[#allocation3 + $0x54] sm:$0xff]  }
 0x260   : > { %v5277_v1 = vpop.f32.mrf.mxu1  ;;  %v2832_v3 = vld [vmem:[#allocation4 + $0x20] sm:$0xff] }
 0x261   : > { %2536 = vst.msk [vmem:[#allocation4 + $0x30] sm:$0xff] %vm567_vm6, %v2518_v53  ;;  %v2850_v23 = vadd.f32 %v2832_v3, %v6578_v6  ;;  %v5320_v36 = vpop.f32.mrf.mxu0  ;;  %v2506_v3 = vld [vmem:[#allocation4 + $0x60] sm:$0xff] }
 0x262   : > { %v2450_v10 = vpop.f32.mrf.mxu1 }
 0x263   : > { %v2519_v5 = vadd.f32 %v2501_v11, %v2450_v10  ;;  %2868 = vst.msk [vmem:[#allocation4 + $0x20] sm:$0xff] %vm567_vm6, %v2850_v23  ;;  %v6619_v19 = vpop.f32.mrf.mxu0  ;;  %v4248_v10 = vrot.slane %v4246_v62, 2  ;;  %v4251_v11 = vrot.slane %v4249_v41, 3  ;;  %v4276_v41 = vshll.u32 %v5708_v51, 16 }
 0x264   : > { %v5278_v16 = vpop.f32.mrf.mxu1  ;;  %v2833_v2 = vld [vmem:[#allocation4 + $0x28] sm:$0xff] }
 0x265   : > { %2537 = vst.msk [vmem:[#allocation4 + $0x38] sm:$0xff] %vm567_vm6, %v2519_v5  ;;  %v2851_v21 = vadd.f32 %v2833_v2, %v6585_v17  ;;  %v5323_v24 = vpop.f32.mrf.mxu0  ;;  %v4237_v17 = vshrl.u32 %v5704_v20, 16 }
 0x266   : > { %v2455_v6 = vpop.f32.mrf.mxu1  ;;  %5496 = vmatmul.mubr.msk.bf16.gmra.mxu1 %vm567_vm6, %v4226_v18  ;;  %v2507_v18 = vld [vmem:[#allocation4 + $0x68] sm:$0xff] }
 0x267   : > { %v2520_v22 = vadd.f32 %v2502_v57, %v2455_v6  ;;  %5499 = vmatprep.mubr.msk.bf16.mxu1 %vm5752_vm5, %v5751_v48  ;;  %2869 = vst.msk [vmem:[#allocation4 + $0x28] sm:$0xff] %vm567_vm6, %v2851_v21  ;;  %v6627_v28 = vpop.f32.mrf.mxu0  ;;  %v4239_v43 = vrot.slane %v4237_v17, 2  ;;  %v4252_v6 = vor.u32 %v4251_v11, %v4248_v10  ;;  %v2508_v17 = vld [vmem:[#allocation4 + $0x70] sm:$0xff] }
 0x268   : > { %v5281_v42 = vpop.f32.mrf.mxu1  ;;  %v2834_v14 = vld [vmem:[#allocation4 + $0x30] sm:$0xff] }
 0x269   : > { %2538 = vst.msk [vmem:[#allocation4 + $0x40] sm:$0xff] %vm567_vm6, %v2520_v22  ;;  %v2852_v31 = vadd.f32 %v2834_v14, %v6591_v30  ;;  %v5324_v35 = vpop.f32.mrf.mxu0  ;;  %v4243_v54 = vor.u32 %v4242_v44, %v4239_v43  ;;  %v4260_v42 = vrot.slane %v4258_v15, 3 }
 0x26a   : > { %v2458_v33 = vpop.f32.mrf.mxu1 }
 0x26b   : > { %v2521_v34 = vadd.f32 %v2503_v4, %v2458_v33  ;;  %2870 = vst.msk [vmem:[#allocation4 + $0x30] sm:$0xff] %vm567_vm6, %v2852_v31  ;;  %v6633_v40 = vpop.f32.mrf.mxu0  ;;  %v4244_v53 = vsel %vm4200_vm11, %v4234_v37, %v4243_v54  ;;  %v4253_v24 = vsel %vm4200_vm11, %v4243_v54, %v4252_v6  ;;  %v5707_v33 = vld [vmem:[#allocation3 + $0x4c] sm:$0xff]  }
 0x26c   : > { %v5282_v46 = vpop.f32.mrf.mxu1  ;;  %v2835_v12 = vld [vmem:[#allocation4 + $0x38] sm:$0xff]  ;;  %v4264_v44 = vshrl.u32 %v5707_v33, 16 }
 0x26d   : > { %2539 = vst.msk [vmem:[#allocation4 + $0x48] sm:$0xff] %vm567_vm6, %v2521_v34  ;;  %v2853_v29 = vadd.f32 %v2835_v12, %v6599_v47  ;;  %v5327_v50 = vpop.f32.mrf.mxu0  ;;  %v2509_v12 = vld [vmem:[#allocation4 + $0x78] sm:$0xff] }
 0x26e   : > { %v2463_v30 = vpop.f32.mrf.mxu1  ;;  %5500 = vmatmul.mubr.msk.bf16.gmra.mxu1 %vm567_vm6, %v4235_v39 }
 0x26f   : > { %v2522_v8 = vadd.f32 %v2504_v49, %v2463_v30  ;;  %5503 = vmatprep.mubr.msk.bf16.mxu1 %vm5752_vm5, %v5751_v48  ;;  %2871 = vst.msk [vmem:[#allocation4 + $0x38] sm:$0xff] %vm567_vm6, %v2853_v29  ;;  %v6641_v32 = vpop.f32.mrf.mxu0  ;;  %v4267_v29 = vshll.u32 %v5707_v33, 16 }
 0x270   : > { %v5285_v45 = vpop.f32.mrf.mxu1  ;;  %v2836_v52 = vld [vmem:[#allocation4 + $0x40] sm:$0xff] }
 0x271   : > { %2540 = vst.msk [vmem:[#allocation4 + $0x50] sm:$0xff] %vm567_vm6, %v2522_v8  ;;  %v2854_v47 = vadd.f32 %v2836_v52, %v6605_v60  ;;  %v5328_v61 = vpop.f32.mrf.mxu0  ;;  %v2510_v52 = vld [vmem:[#allocation4 + $0x80] sm:$0xff] }
 0x272   : > { %v2466_v55 = vpop.f32.mrf.mxu1 }
 0x273   : > { %v2523_v58 = vadd.f32 %v2505_v56, %v2466_v55  ;;  %2872 = vst.msk [vmem:[#allocation4 + $0x40] sm:$0xff] %vm567_vm6, %v2854_v47  ;;  %v6647_v63 = vpop.f32.mrf.mxu0  ;;  %v4266_v55 = vrot.slane %v4264_v44, 2  ;;  %v4269_v56 = vrot.slane %v4267_v29, 3  ;;  %v3108_v29 = vld [vmem:[#allocation4 + $0x18] sm:$0xff] }
 0x274   : > { %v5286_v38 = vpop.f32.mrf.mxu1  ;;  %v2837_v59 = vld [vmem:[#allocation4 + $0x48] sm:$0xff] }
 0x275   : > { %2541 = vst.msk [vmem:[#allocation4 + $0x58] sm:$0xff] %vm567_vm6, %v2523_v58  ;;  %v2855_v1 = vadd.f32 %v2837_v59, %v6613_v7  ;;  %v5331_v23 = vpop.f32.mrf.mxu0  ;;  %v4255_v7 = vshrl.u32 %v5706_v0, 16 }
 0x276   : > { %v2471_v60 = vpop.f32.mrf.mxu1  ;;  %5504 = vmatmul.mubr.msk.bf16.gmra.mxu1 %vm567_vm6, %v4244_v53  ;;  %v2511_v53 = vld [vmem:[#allocation4 + $0x88] sm:$0xff] }
 0x277   : > { %v2524_v9 = vadd.f32 %v2506_v3, %v2471_v60  ;;  %5507 = vmatprep.mubr.msk.bf16.mxu1 %vm5752_vm5, %v5751_v48  ;;  %2873 = vst.msk [vmem:[#allocation4 + $0x48] sm:$0xff] %vm567_vm6, %v2855_v1  ;;  %v6655_v13 = vpop.f32.mrf.mxu0  ;;  %v4257_v27 = vrot.slane %v4255_v7, 2  ;;  %v4270_v60 = vor.u32 %v4269_v56, %v4266_v55  ;;  %v3105_v7 = vld [vmem:[#allocation4] sm:$0xff] }
 0x278   : > { %v5289_v5 = vpop.f32.mrf.mxu1  ;;  %v2838_v36 = vld [vmem:[#allocation4 + $0x50] sm:$0xff] }
 0x279   : > { %2542 = vst.msk [vmem:[#allocation4 + $0x60] sm:$0xff] %vm567_vm6, %v2524_v9  ;;  %v2856_v16 = vadd.f32 %v2838_v36, %v6619_v19  ;;  %v5332_v21 = vpop.f32.mrf.mxu0  ;;  %v4261_v37 = vor.u32 %v4260_v42, %v4257_v27  ;;  %v4278_v5 = vrot.slane %v4276_v41, 3 }
 0x27a   : > { %v2474_v2 = vpop.f32.mrf.mxu1 }
 0x27b   : > { %v2525_v20 = vadd.f32 %v2507_v18, %v2474_v2  ;;  %2874 = vst.msk [vmem:[#allocation4 + $0x50] sm:$0xff] %vm567_vm6, %v2856_v16  ;;  %v6661_v26 = vpop.f32.mrf.mxu0  ;;  %v4262_v8 = vsel %vm4200_vm11, %v4252_v6, %v4261_v37  ;;  %v4271_v23 = vsel %vm4200_vm11, %v4261_v37, %v4270_v60  ;;  %v5709_v2 = vld [vmem:[#allocation3 + $0x5c] ss:$0 sps:$4 sm:$0x77]  }
 0x27c   : > { %v5290_v57 = vpop.f32.mrf.mxu1  ;;  %v2839_v22 = vld [vmem:[#allocation4 + $0x58] sm:$0xff]  ;;  %v4282_v42 = vshrl.u32 %v5709_v2, 16 }
 0x27d   : > { %2543 = vst.msk [vmem:[#allocation4 + $0x68] sm:$0xff] %vm567_vm6, %v2525_v20  ;;  %v2857_v14 = vadd.f32 %v2839_v22, %v6627_v28  ;;  %v5335_v31 = vpop.f32.mrf.mxu0  ;;  %v3106_v22 = vld [vmem:[#allocation4 + $0x8] sm:$0xff] }
 0x27e   : > { %v2479_v19 = vpop.f32.mrf.mxu1  ;;  %5508 = vmatmul.mubr.msk.bf16.gmra.mxu1 %vm567_vm6, %v4253_v24 }
 0x27f   : > { %v2526_v25 = vadd.f32 %v2508_v17, %v2479_v19  ;;  %5511 = vmatprep.mubr.msk.bf16.mxu1 %vm5752_vm5, %v5751_v48  ;;  %2875 = vst.msk [vmem:[#allocation4 + $0x58] sm:$0xff] %vm567_vm6, %v2857_v14  ;;  %v6669_v35 = vpop.f32.mrf.mxu0  ;;  %v4285_v14 = vshll.u32 %v5709_v2, 16 }
 0x280   : > { %v5293_v4 = vpop.f32.mrf.mxu1  ;;  %v2840_v34 = vld [vmem:[#allocation4 + $0x60] sm:$0xff] }
 0x281   : > { %2544 = vst.msk [vmem:[#allocation4 + $0x70] sm:$0xff] %vm567_vm6, %v2526_v25  ;;  %v2858_v28 = vadd.f32 %v2840_v34, %v6633_v40  ;;  %v5336_v43 = vpop.f32.mrf.mxu0  ;;  %v3107_v34 = vld [vmem:[#allocation4 + $0x10] sm:$0xff] }
 0x282   : > { %v2482_v46 = vpop.f32.mrf.mxu1 }
 0x283   : > { %v2527_v39 = vadd.f32 %v2509_v12, %v2482_v46  ;;  %2876 = vst.msk [vmem:[#allocation4 + $0x60] sm:$0xff] %vm567_vm6, %v2858_v28  ;;  %v6675_v50 = vpop.f32.mrf.mxu0  ;;  %v4284_v28 = vrot.slane %v4282_v42, 2  ;;  %v4287_v46 = vrot.slane %v4285_v14, 3 }
 0x284   : > { %v5294_v30 = vpop.f32.mrf.mxu1  ;;  %v2841_v49 = vld [vmem:[#allocation4 + $0x68] sm:$0xff] }
 0x285   : > { %2545 = vst.msk [vmem:[#allocation4 + $0x78] sm:$0xff] %vm567_vm6, %v2527_v39  ;;  %v2859_v45 = vadd.f32 %v2841_v49, %v6641_v32  ;;  %v5379_v47 = vpop.f32.mrf.mxu0  ;;  %v4273_v32 = vshrl.u32 %v5708_v51, 16 }
 0x286   : > { %v2487_v40 = vpop.f32.mrf.mxu1  ;;  %5512 = vmatmul.mubr.msk.bf16.gmra.mxu1 %vm567_vm6, %v4262_v8  ;;  %v4288_v8 = vor.u32 %v4287_v46, %v4284_v28  ;;  %v3109_v47 = vld [vmem:[#allocation4 + $0x20] sm:$0xff]  ;;  %v3115_v46 = vld [vmem:[#allocation4 + $0x50] sm:$0xff] }
 0x287   : > { %v2528_v54 = vadd.f32 %v2510_v52, %v2487_v40  ;;  %5515 = vmatprep.mubr.msk.bf16.mxu1 %vm5752_vm5, %v5751_v48  ;;  %2877 = vst.msk [vmem:[#allocation4 + $0x68] sm:$0xff] %vm567_vm6, %v2859_v45  ;;  %v6683_v62 = vpop.f32.mrf.mxu0  ;;  %v4275_v11 = vrot.slane %v4273_v32, 2 }
 0x288   : > { %v5297_v58 = vpop.f32.mrf.mxu1  ;;  %v2842_v61 = vld [vmem:[#allocation4 + $0x70] sm:$0xff] }
 0x289   : > { %2546 = vst.msk [vmem:[#allocation4 + $0x80] sm:$0xff] %vm567_vm6, %v2528_v54  ;;  %v2860_v38 = vadd.f32 %v2842_v61, %v6647_v63  ;;  %v5380_v1 = vpop.f32.mrf.mxu0  ;;  %v4279_v6 = vor.u32 %v4278_v5, %v4275_v11 }
 0x28a   : > { %v2490_v59 = vpop.f32.mrf.mxu1 }
 0x28b   : > { %v2529_v0 = vadd.f32 %v2511_v53, %v2490_v59  ;;  %2878 = vst.msk [vmem:[#allocation4 + $0x70] sm:$0xff] %vm567_vm6, %v2860_v38  ;;  %v6689_v10 = vpop.f32.mrf.mxu0  ;;  %v4280_v25 = vsel %vm4200_vm11, %v4270_v60, %v4279_v6  ;;  %v4289_v45 = vsel %vm4200_vm11, %v4279_v6, %v4288_v8  ;;  %v3110_v38 = vld [vmem:[#allocation4 + $0x28] sm:$0xff] }
 0x28c   : > { %v5298_v3 = vpop.f32.mrf.mxu1  ;;  %v2843_v9 = vld [vmem:[#allocation4 + $0x78] sm:$0xff] }
 0x28d   : > { %2547 = vst.msk [vmem:[#allocation4 + $0x88] sm:$0xff] %vm567_vm6, %v2529_v0  ;;  %v2861_v36 = vadd.f32 %v2843_v9, %v6655_v13  ;;  %v5383_v16 = vpop.f32.mrf.mxu0  ;;  %v3111_v9 = vld [vmem:[#allocation4 + $0x30] sm:$0xff] }
 0x28e   : > { %v3034_v63 = vpop.f32.mrf.mxu1  ;;  %5516 = vmatmul.mubr.msk.bf16.gmra.mxu1 %vm567_vm6, %v4271_v23 }
 0x28f   : > { %v3123_v15 = vadd.f32 %v3105_v7, %v3034_v63  ;;  %5519 = vmatprep.mubr.msk.bf16.mxu1 %vm5752_vm5, %v5751_v48  ;;  %2879 = vst.msk [vmem:[#allocation4 + $0x78] sm:$0xff] %vm567_vm6, %v2861_v36  ;;  %v3393_v21 = vpop.f32.mrf.mxu0 }
 0x290   : > { %v5341_v18 = vpop.f32.mrf.mxu1  ;;  %v2844_v20 = vld [vmem:[#allocation4 + $0x80] sm:$0xff] }
 0x291   : > { %3141 = vst.msk [vmem:[#allocation4] sm:$0xff] %vm567_vm6, %v3123_v15  ;;  %v2862_v13 = vadd.f32 %v2844_v20, %v6661_v26  ;;  %v5384_v27 = vpop.f32.mrf.mxu0  ;;  %v3112_v15 = vld [vmem:[#allocation4 + $0x38] sm:$0xff] }
 0x292   : > { %v3037_v57 = vpop.f32.mrf.mxu1 }
 0x293   : > { %v3124_v24 = vadd.f32 %v3106_v22, %v3037_v57  ;;  %2880 = vst.msk [vmem:[#allocation4 + $0x80] sm:$0xff] %vm567_vm6, %v2862_v13  ;;  %v3398_v31 = vpop.f32.mrf.mxu0  ;;  %v3113_v57 = vld [vmem:[#allocation4 + $0x40] sm:$0xff] }
 0x294   : > { %v5342_v19 = vpop.f32.mrf.mxu1  ;;  %v2845_v17 = vld [vmem:[#allocation4 + $0x88] sm:$0xff] }
 0x295   : > { %3142 = vst.msk [vmem:[#allocation4 + $0x8] sm:$0xff] %vm567_vm6, %v3124_v24  ;;  %v2863_v33 = vadd.f32 %v2845_v17, %v6669_v35  ;;  %v5387_v37 = vpop.f32.mrf.mxu0 }
 0x296   : > { %v3042_v4 = vpop.f32.mrf.mxu1  ;;  %5520 = vmatmul.mubr.msk.bf16.gmra.mxu1 %vm567_vm6, %v4280_v25  ;;  %v3114_v25 = vld [vmem:[#allocation4 + $0x48] sm:$0xff] }
 0x297   : > { %v3125_v26 = vadd.f32 %v3107_v34, %v3042_v4  ;;  %5523 = vmatprep.mubr.msk.bf16.mxu1 %vm5752_vm5, %v5751_v48  ;;  %2881 = vst.msk [vmem:[#allocation4 + $0x88] sm:$0xff] %vm567_vm6, %v2863_v33  ;;  %v3401_v43 = vpop.f32.mrf.mxu0 }
 0x298   : > { %v5345_v12 = vpop.f32.mrf.mxu1  ;;  %v3453_v39 = vld [vmem:[#allocation4] sm:$0xff] }
 0x299   : > { %3143 = vst.msk [vmem:[#allocation4 + $0x10] sm:$0xff] %vm567_vm6, %v3125_v26  ;;  %v3471_v35 = vadd.f32 %v3453_v39, %v6675_v50  ;;  %v5388_v49 = vpop.f32.mrf.mxu0 }
 0x29a   : > { %v3045_v44 = vpop.f32.mrf.mxu1  ;;  %v3116_v49 = vld [vmem:[#allocation4 + $0x58] sm:$0xff] }
 0x29b   : > { %v3126_v30 = vadd.f32 %v3108_v29, %v3045_v44  ;;  %3489 = vst.msk [vmem:[#allocation4] sm:$0xff] %vm567_vm6, %v3471_v35  ;;  %v3406_v40 = vpop.f32.mrf.mxu0 }
 0x29c   : > { %v5346_v51 = vpop.f32.mrf.mxu1  ;;  %v3454_v48 = vld [vmem:[#allocation4 + $0x8] sm:$0xff] }
 0x29d   : > { %3144 = vst.msk [vmem:[#allocation4 + $0x18] sm:$0xff] %vm567_vm6, %v3126_v30  ;;  %v3472_v52 = vadd.f32 %v3454_v48, %v6683_v62  ;;  %v5391_v55 = vpop.f32.mrf.mxu0 }
 0x29e   : > { %v3050_v54 = vpop.f32.mrf.mxu1  ;;  %5524 = vmatmul.mubr.msk.bf16.gmra.mxu1 %vm567_vm6, %v4289_v45 }
 0x29f   : > { %v3127_v50 = vadd.f32 %v3109_v47, %v3050_v54  ;;  %3490 = vst.msk [vmem:[#allocation4 + $0x8] sm:$0xff] %vm567_vm6, %v3472_v52  ;;  %v3409_v61 = vpop.f32.mrf.mxu0  ;;  %v3117_v47 = vld [vmem:[#allocation4 + $0x60] sm:$0xff] }
 0x2a0   : > { %v5349_v56 = vpop.f32.mrf.mxu1  ;;  %v3455_v58 = vld [vmem:[#allocation4 + $0x10] sm:$0xff] }
 0x2a1   : > { %3145 = vst.msk [vmem:[#allocation4 + $0x20] sm:$0xff] %vm567_vm6, %v3127_v50  ;;  %v3473_v32 = vadd.f32 %v3455_v58, %v6689_v10  ;;  %v5392_v53 = vpop.f32.mrf.mxu0 }
 0x2a2   : > { %v3053_v41 = vpop.f32.mrf.mxu1 }
 0x2a3   : > { %v3128_v59 = vadd.f32 %v3110_v38, %v3053_v41  ;;  %3491 = vst.msk [vmem:[#allocation4 + $0x10] sm:$0xff] %vm567_vm6, %v3473_v32  ;;  %v3414_v1 = vpop.f32.mrf.mxu0  ;;  %v3118_v38 = vld [vmem:[#allocation4 + $0x68] sm:$0xff] }
 0x2a4   : > { %v5350_v62 = vpop.f32.mrf.mxu1  ;;  %v3456_v0 = vld [vmem:[#allocation4 + $0x18] sm:$0xff] }
 0x2a5   : > { %3146 = vst.msk [vmem:[#allocation4 + $0x28] sm:$0xff] %vm567_vm6, %v3128_v59  ;;  %v3474_v60 = vadd.f32 %v3456_v0, %v3393_v21  ;;  %v5395_v11 = vpop.f32.mrf.mxu0 }
 0x2a6   : > { %v3058_v3 = vpop.f32.mrf.mxu1 }
 0x2a7   : > { %v3129_v23 = vadd.f32 %v3111_v9, %v3058_v3  ;;  %3492 = vst.msk [vmem:[#allocation4 + $0x18] sm:$0xff] %vm567_vm6, %v3474_v60  ;;  %v3417_v36 = vpop.f32.mrf.mxu0  ;;  %v3119_v9 = vld [vmem:[#allocation4 + $0x70] sm:$0xff] }
 0x2a8   : > { %v5353_v5 = vpop.f32.mrf.mxu1  ;;  %v3457_v10 = vld [vmem:[#allocation4 + $0x20] sm:$0xff] }
 0x2a9   : > { %3147 = vst.msk [vmem:[#allocation4 + $0x30] sm:$0xff] %vm567_vm6, %v3129_v23  ;;  %v3475_v63 = vadd.f32 %v3457_v10, %v3398_v31  ;;  %v5396_v2 = vpop.f32.mrf.mxu0 }
 0x2aa   : > { %v3061_v7 = vpop.f32.mrf.mxu1 }
 0x2ab   : > { %v3130_v16 = vadd.f32 %v3112_v15, %v3061_v7  ;;  %3493 = vst.msk [vmem:[#allocation4 + $0x20] sm:$0xff] %vm567_vm6, %v3475_v63  ;;  %v3422_v21 = vpop.f32.mrf.mxu0  ;;  %v3120_v15 = vld [vmem:[#allocation4 + $0x78] sm:$0xff] }
 0x2ac   : > { %v5354_v18 = vpop.f32.mrf.mxu1  ;;  %v3458_v20 = vld [vmem:[#allocation4 + $0x28] sm:$0xff] }
 0x2ad   : > { %3148 = vst.msk [vmem:[#allocation4 + $0x38] sm:$0xff] %vm567_vm6, %v3130_v16  ;;  %v3476_v6 = vadd.f32 %v3458_v20, %v3401_v43  ;;  %v5399_v24 = vpop.f32.mrf.mxu0 }
 0x2ae   : > { %v3066_v13 = vpop.f32.mrf.mxu1 }
 0x2af   : > { %v3131_v22 = vadd.f32 %v3113_v57, %v3066_v13  ;;  %3494 = vst.msk [vmem:[#allocation4 + $0x28] sm:$0xff] %vm567_vm6, %v3476_v6  ;;  %v3425_v14 = vpop.f32.mrf.mxu0  ;;  %v3121_v57 = vld [vmem:[#allocation4 + $0x80] sm:$0xff] }
 0x2b0   : > { %v5357_v27 = vpop.f32.mrf.mxu1  ;;  %v3459_v42 = vld [vmem:[#allocation4 + $0x30] sm:$0xff] }
 0x2b1   : > { %3149 = vst.msk [vmem:[#allocation4 + $0x40] sm:$0xff] %vm567_vm6, %v3131_v22  ;;  %v3477_v19 = vadd.f32 %v3459_v42, %v3406_v40  ;;  %v5400_v33 = vpop.f32.mrf.mxu0 }
 0x2b2   : > { %v3069_v17 = vpop.f32.mrf.mxu1 }
 0x2b3   : > { %v3132_v31 = vadd.f32 %v3114_v25, %v3069_v17  ;;  %3495 = vst.msk [vmem:[#allocation4 + $0x30] sm:$0xff] %vm567_vm6, %v3477_v19  ;;  %v3430_v26 = vpop.f32.mrf.mxu0  ;;  %v3122_v25 = vld [vmem:[#allocation4 + $0x88] sm:$0xff] }
 0x2b4   : > { %v5358_v4 = vpop.f32.mrf.mxu1  ;;  %v3460_v34 = vld [vmem:[#allocation4 + $0x38] sm:$0xff] }
 0x2b5   : > { %3150 = vst.msk [vmem:[#allocation4 + $0x48] sm:$0xff] %vm567_vm6, %v3132_v31  ;;  %v3478_v37 = vadd.f32 %v3460_v34, %v3409_v61  ;;  %v5403_v39 = vpop.f32.mrf.mxu0 }
 0x2b6   : > { %v3074_v28 = vpop.f32.mrf.mxu1 }
 0x2b7   : > { %v3133_v12 = vadd.f32 %v3115_v46, %v3074_v28  ;;  %3496 = vst.msk [vmem:[#allocation4 + $0x38] sm:$0xff] %vm567_vm6, %v3478_v37  ;;  %v3433_v44 = vpop.f32.mrf.mxu0  ;;  %v3800_v46 = vld [vmem:[#allocation4] sm:$0xff] }
 0x2b8   : > { %v5361_v43 = vpop.f32.mrf.mxu1  ;;  %v3461_v35 = vld [vmem:[#allocation4 + $0x40] sm:$0xff] }
 0x2b9   : > { %3151 = vst.msk [vmem:[#allocation4 + $0x50] sm:$0xff] %vm567_vm6, %v3133_v12  ;;  %v3479_v29 = vadd.f32 %v3461_v35, %v3414_v1  ;;  %v5404_v51 = vpop.f32.mrf.mxu0 }
 0x2ba   : > { %v3077_v30 = vpop.f32.mrf.mxu1 }
 0x2bb   : > { %v3134_v8 = vadd.f32 %v3116_v49, %v3077_v30  ;;  %3497 = vst.msk [vmem:[#allocation4 + $0x40] sm:$0xff] %vm567_vm6, %v3479_v29  ;;  %v3438_v40 = vpop.f32.mrf.mxu0  ;;  %v3801_v49 = vld [vmem:[#allocation4 + $0x8] sm:$0xff] }
 0x2bc   : > { %v5362_v48 = vpop.f32.mrf.mxu1  ;;  %v3462_v45 = vld [vmem:[#allocation4 + $0x48] sm:$0xff] }
 0x2bd   : > { %3152 = vst.msk [vmem:[#allocation4 + $0x58] sm:$0xff] %vm567_vm6, %v3134_v8  ;;  %v3480_v52 = vadd.f32 %v3462_v45, %v3417_v36  ;;  %v5407_v55 = vpop.f32.mrf.mxu0 }
 0x2be   : > { %v3082_v54 = vpop.f32.mrf.mxu1 }
 0x2bf   : > { %v3135_v50 = vadd.f32 %v3117_v47, %v3082_v54  ;;  %3498 = vst.msk [vmem:[#allocation4 + $0x48] sm:$0xff] %vm567_vm6, %v3480_v52  ;;  %v3441_v61 = vpop.f32.mrf.mxu0  ;;  %v3802_v47 = vld [vmem:[#allocation4 + $0x10] sm:$0xff] }
 0x2c0   : > { %v5365_v56 = vpop.f32.mrf.mxu1  ;;  %v3463_v58 = vld [vmem:[#allocation4 + $0x50] sm:$0xff] }
 0x2c1   : > { %3153 = vst.msk [vmem:[#allocation4 + $0x60] sm:$0xff] %vm567_vm6, %v3135_v50  ;;  %v3481_v32 = vadd.f32 %v3463_v58, %v3422_v21  ;;  %v5408_v53 = vpop.f32.mrf.mxu0 }
 0x2c2   : > { %v3085_v41 = vpop.f32.mrf.mxu1 }
 0x2c3   : > { %v3136_v59 = vadd.f32 %v3118_v38, %v3085_v41  ;;  %3499 = vst.msk [vmem:[#allocation4 + $0x50] sm:$0xff] %vm567_vm6, %v3481_v32  ;;  %v3446_v1 = vpop.f32.mrf.mxu0  ;;  %v3803_v38 = vld [vmem:[#allocation4 + $0x18] sm:$0xff] }
 0x2c4   : > { %v5366_v62 = vpop.f32.mrf.mxu1  ;;  %v3464_v0 = vld [vmem:[#allocation4 + $0x58] sm:$0xff] }
 0x2c5   : > { %3154 = vst.msk [vmem:[#allocation4 + $0x68] sm:$0xff] %vm567_vm6, %v3136_v59  ;;  %v3482_v60 = vadd.f32 %v3464_v0, %v3425_v14  ;;  %v5411_v11 = vpop.f32.mrf.mxu0 }
 0x2c6   : > { %v3090_v3 = vpop.f32.mrf.mxu1 }
 0x2c7   : > { %v3137_v23 = vadd.f32 %v3119_v9, %v3090_v3  ;;  %3500 = vst.msk [vmem:[#allocation4 + $0x58] sm:$0xff] %vm567_vm6, %v3482_v60  ;;  %v3449_v36 = vpop.f32.mrf.mxu0  ;;  %v3804_v9 = vld [vmem:[#allocation4 + $0x20] sm:$0xff] }
 0x2c8   : > { %v5369_v5 = vpop.f32.mrf.mxu1  ;;  %v3465_v10 = vld [vmem:[#allocation4 + $0x60] sm:$0xff] }
 0x2c9   : > { %3155 = vst.msk [vmem:[#allocation4 + $0x70] sm:$0xff] %vm567_vm6, %v3137_v23  ;;  %v3483_v63 = vadd.f32 %v3465_v10, %v3430_v26  ;;  %v5412_v2 = vpop.f32.mrf.mxu0 }
 0x2ca   : > { %v3093_v7 = vpop.f32.mrf.mxu1 }
 0x2cb   : > { %v3138_v16 = vadd.f32 %v3120_v15, %v3093_v7  ;;  %3501 = vst.msk [vmem:[#allocation4 + $0x60] sm:$0xff] %vm567_vm6, %v3483_v63  ;;  %v4006_v21 = vpop.f32.mrf.mxu0  ;;  %v3805_v15 = vld [vmem:[#allocation4 + $0x28] sm:$0xff] }
 0x2cc   : > { %v5370_v18 = vpop.f32.mrf.mxu1  ;;  %v3466_v20 = vld [vmem:[#allocation4 + $0x68] sm:$0xff] }
 0x2cd   : > { %3156 = vst.msk [vmem:[#allocation4 + $0x78] sm:$0xff] %vm567_vm6, %v3138_v16  ;;  %v3484_v6 = vadd.f32 %v3466_v20, %v3433_v44  ;;  %v5455_v24 = vpop.f32.mrf.mxu0 }
 0x2ce   : > { %v3098_v13 = vpop.f32.mrf.mxu1 }
 0x2cf   : > { %v3139_v22 = vadd.f32 %v3121_v57, %v3098_v13  ;;  %3502 = vst.msk [vmem:[#allocation4 + $0x68] sm:$0xff] %vm567_vm6, %v3484_v6  ;;  %v4009_v14 = vpop.f32.mrf.mxu0  ;;  %v3806_v57 = vld [vmem:[#allocation4 + $0x30] sm:$0xff] }
 0x2d0   : > { %v5373_v27 = vpop.f32.mrf.mxu1  ;;  %v3467_v42 = vld [vmem:[#allocation4 + $0x70] sm:$0xff] }
 0x2d1   : > { %3157 = vst.msk [vmem:[#allocation4 + $0x80] sm:$0xff] %vm567_vm6, %v3139_v22  ;;  %v3485_v19 = vadd.f32 %v3467_v42, %v3438_v40  ;;  %v5456_v33 = vpop.f32.mrf.mxu0 }
 0x2d2   : > { %v3101_v17 = vpop.f32.mrf.mxu1 }
 0x2d3   : > { %v3140_v31 = vadd.f32 %v3122_v25, %v3101_v17  ;;  %3503 = vst.msk [vmem:[#allocation4 + $0x70] sm:$0xff] %vm567_vm6, %v3485_v19  ;;  %v4014_v26 = vpop.f32.mrf.mxu0  ;;  %v3807_v25 = vld [vmem:[#allocation4 + $0x38] sm:$0xff] }
 0x2d4   : > { %v5374_v4 = vpop.f32.mrf.mxu1  ;;  %v3468_v34 = vld [vmem:[#allocation4 + $0x78] sm:$0xff] }
 0x2d5   : > { %3158 = vst.msk [vmem:[#allocation4 + $0x88] sm:$0xff] %vm567_vm6, %v3140_v31  ;;  %v3486_v37 = vadd.f32 %v3468_v34, %v3441_v61  ;;  %v5459_v39 = vpop.f32.mrf.mxu0 }
 0x2d6   : > { %v3729_v28 = vpop.f32.mrf.mxu1 }
 0x2d7   : > { %v3818_v12 = vadd.f32 %v3800_v46, %v3729_v28  ;;  %3504 = vst.msk [vmem:[#allocation4 + $0x78] sm:$0xff] %vm567_vm6, %v3486_v37  ;;  %v4017_v44 = vpop.f32.mrf.mxu0  ;;  %v3808_v46 = vld [vmem:[#allocation4 + $0x40] sm:$0xff] }
 0x2d8   : > { %v5417_v43 = vpop.f32.mrf.mxu1  ;;  %v3469_v35 = vld [vmem:[#allocation4 + $0x80] sm:$0xff] }
 0x2d9   : > { %3836 = vst.msk [vmem:[#allocation4] sm:$0xff] %vm567_vm6, %v3818_v12  ;;  %v3487_v29 = vadd.f32 %v3469_v35, %v3446_v1  ;;  %v5460_v51 = vpop.f32.mrf.mxu0 }
 0x2da   : > { %v3732_v30 = vpop.f32.mrf.mxu1 }
 0x2db   : > { %v3819_v8 = vadd.f32 %v3801_v49, %v3732_v30  ;;  %3505 = vst.msk [vmem:[#allocation4 + $0x80] sm:$0xff] %vm567_vm6, %v3487_v29  ;;  %v4022_v40 = vpop.f32.mrf.mxu0  ;;  %v3809_v49 = vld [vmem:[#allocation4 + $0x48] sm:$0xff] }
 0x2dc   : > { %v5418_v48 = vpop.f32.mrf.mxu1  ;;  %v3470_v45 = vld [vmem:[#allocation4 + $0x88] sm:$0xff] }
 0x2dd   : > { %3837 = vst.msk [vmem:[#allocation4 + $0x8] sm:$0xff] %vm567_vm6, %v3819_v8  ;;  %v3488_v52 = vadd.f32 %v3470_v45, %v3449_v36  ;;  %v5463_v55 = vpop.f32.mrf.mxu0 }
 0x2de   : > { %v3737_v54 = vpop.f32.mrf.mxu1 }
 0x2df   : > { %v3820_v50 = vadd.f32 %v3802_v47, %v3737_v54  ;;  %3506 = vst.msk [vmem:[#allocation4 + $0x88] sm:$0xff] %vm567_vm6, %v3488_v52  ;;  %v4025_v61 = vpop.f32.mrf.mxu0  ;;  %v3810_v47 = vld [vmem:[#allocation4 + $0x50] sm:$0xff] }
 0x2e0   : > { %v5421_v56 = vpop.f32.mrf.mxu1  ;;  %v4077_v58 = vld [vmem:[#allocation4] sm:$0xff] }
 0x2e1   : > { %3838 = vst.msk [vmem:[#allocation4 + $0x10] sm:$0xff] %vm567_vm6, %v3820_v50  ;;  %v4095_v32 = vadd.f32 %v4077_v58, %v4006_v21  ;;  %v5464_v53 = vpop.f32.mrf.mxu0 }
 0x2e2   : > { %v3740_v41 = vpop.f32.mrf.mxu1 }
 0x2e3   : > { %v3821_v59 = vadd.f32 %v3803_v38, %v3740_v41  ;;  %4113 = vst.msk [vmem:[#allocation4] sm:$0xff] %vm567_vm6, %v4095_v32  ;;  %v4030_v1 = vpop.f32.mrf.mxu0  ;;  %v3811_v38 = vld [vmem:[#allocation4 + $0x58] sm:$0xff] }
 0x2e4   : > { %v5422_v62 = vpop.f32.mrf.mxu1  ;;  %v4078_v0 = vld [vmem:[#allocation4 + $0x8] sm:$0xff] }
 0x2e5   : > { %3839 = vst.msk [vmem:[#allocation4 + $0x18] sm:$0xff] %vm567_vm6, %v3821_v59  ;;  %v4096_v60 = vadd.f32 %v4078_v0, %v4009_v14  ;;  %v5467_v11 = vpop.f32.mrf.mxu0 }
 0x2e6   : > { %v3745_v3 = vpop.f32.mrf.mxu1 }
 0x2e7   : > { %v3822_v23 = vadd.f32 %v3804_v9, %v3745_v3  ;;  %4114 = vst.msk [vmem:[#allocation4 + $0x8] sm:$0xff] %vm567_vm6, %v4096_v60  ;;  %v4033_v36 = vpop.f32.mrf.mxu0  ;;  %v3812_v9 = vld [vmem:[#allocation4 + $0x60] sm:$0xff] }
 0x2e8   : > { %v5425_v5 = vpop.f32.mrf.mxu1  ;;  %v4079_v10 = vld [vmem:[#allocation4 + $0x10] sm:$0xff] }
 0x2e9   : > { %3840 = vst.msk [vmem:[#allocation4 + $0x20] sm:$0xff] %vm567_vm6, %v3822_v23  ;;  %v4097_v63 = vadd.f32 %v4079_v10, %v4014_v26  ;;  %v5468_v2 = vpop.f32.mrf.mxu0 }
 0x2ea   : > { %v3748_v7 = vpop.f32.mrf.mxu1 }
 0x2eb   : > { %v3823_v16 = vadd.f32 %v3805_v15, %v3748_v7  ;;  %4115 = vst.msk [vmem:[#allocation4 + $0x10] sm:$0xff] %vm567_vm6, %v4097_v63  ;;  %v4038_v21 = vpop.f32.mrf.mxu0  ;;  %v3813_v15 = vld [vmem:[#allocation4 + $0x68] sm:$0xff] }
 0x2ec   : > { %v5426_v18 = vpop.f32.mrf.mxu1  ;;  %v4080_v20 = vld [vmem:[#allocation4 + $0x18] sm:$0xff] }
 0x2ed   : > { %3841 = vst.msk [vmem:[#allocation4 + $0x28] sm:$0xff] %vm567_vm6, %v3823_v16  ;;  %v4098_v6 = vadd.f32 %v4080_v20, %v4017_v44  ;;  %v5471_v24 = vpop.f32.mrf.mxu0 }
 0x2ee   : > { %v3753_v13 = vpop.f32.mrf.mxu1 }
 0x2ef   : > { %v3824_v22 = vadd.f32 %v3806_v57, %v3753_v13  ;;  %4116 = vst.msk [vmem:[#allocation4 + $0x18] sm:$0xff] %vm567_vm6, %v4098_v6  ;;  %v4041_v14 = vpop.f32.mrf.mxu0  ;;  %v3814_v57 = vld [vmem:[#allocation4 + $0x70] sm:$0xff] }
 0x2f0   : > { %v5429_v27 = vpop.f32.mrf.mxu1  ;;  %v4081_v42 = vld [vmem:[#allocation4 + $0x20] sm:$0xff] }
 0x2f1   : > { %3842 = vst.msk [vmem:[#allocation4 + $0x30] sm:$0xff] %vm567_vm6, %v3824_v22  ;;  %v4099_v19 = vadd.f32 %v4081_v42, %v4022_v40  ;;  %v5472_v33 = vpop.f32.mrf.mxu0 }
 0x2f2   : > { %v3756_v17 = vpop.f32.mrf.mxu1 }
 0x2f3   : > { %v3825_v31 = vadd.f32 %v3807_v25, %v3756_v17  ;;  %4117 = vst.msk [vmem:[#allocation4 + $0x20] sm:$0xff] %vm567_vm6, %v4099_v19  ;;  %v4046_v26 = vpop.f32.mrf.mxu0  ;;  %v3815_v25 = vld [vmem:[#allocation4 + $0x78] sm:$0xff] }
 0x2f4   : > { %v5430_v4 = vpop.f32.mrf.mxu1  ;;  %v4082_v34 = vld [vmem:[#allocation4 + $0x28] sm:$0xff] }
 0x2f5   : > { %3843 = vst.msk [vmem:[#allocation4 + $0x38] sm:$0xff] %vm567_vm6, %v3825_v31  ;;  %v4100_v37 = vadd.f32 %v4082_v34, %v4025_v61  ;;  %v5475_v39 = vpop.f32.mrf.mxu0 }
 0x2f6   : > { %v3761_v28 = vpop.f32.mrf.mxu1 }
 0x2f7   : > { %v3826_v12 = vadd.f32 %v3808_v46, %v3761_v28  ;;  %4118 = vst.msk [vmem:[#allocation4 + $0x28] sm:$0xff] %vm567_vm6, %v4100_v37  ;;  %v4049_v44 = vpop.f32.mrf.mxu0  ;;  %v3816_v28 = vld [vmem:[#allocation4 + $0x80] sm:$0xff] }
 0x2f8   : > { %v5433_v43 = vpop.f32.mrf.mxu1  ;;  %v4083_v35 = vld [vmem:[#allocation4 + $0x30] sm:$0xff] }
 0x2f9   : > { %3844 = vst.msk [vmem:[#allocation4 + $0x40] sm:$0xff] %vm567_vm6, %v3826_v12  ;;  %v4101_v29 = vadd.f32 %v4083_v35, %v4030_v1  ;;  %v5476_v51 = vpop.f32.mrf.mxu0 }
 0x2fa   : > { %v3764_v30 = vpop.f32.mrf.mxu1 }
 0x2fb   : > { %v3827_v8 = vadd.f32 %v3809_v49, %v3764_v30  ;;  %4119 = vst.msk [vmem:[#allocation4 + $0x30] sm:$0xff] %vm567_vm6, %v4101_v29  ;;  %v4054_v40 = vpop.f32.mrf.mxu0 }
 0x2fc   : > { %v5434_v48 = vpop.f32.mrf.mxu1  ;;  %v4084_v45 = vld [vmem:[#allocation4 + $0x38] sm:$0xff] }
 0x2fd   : > { %3845 = vst.msk [vmem:[#allocation4 + $0x48] sm:$0xff] %vm567_vm6, %v3827_v8  ;;  %v4102_v52 = vadd.f32 %v4084_v45, %v4033_v36  ;;  %v5479_v55 = vpop.f32.mrf.mxu0  ;;  %v4425_v48 = vld [vmem:[#allocation4] sm:$0xff] }
 0x2fe   : > { %v3769_v54 = vpop.f32.mrf.mxu1 }
 0x2ff   : > { %v3828_v50 = vadd.f32 %v3810_v47, %v3769_v54  ;;  %4120 = vst.msk [vmem:[#allocation4 + $0x38] sm:$0xff] %vm567_vm6, %v4102_v52  ;;  %v4057_v61 = vpop.f32.mrf.mxu0 }
 0x300   : > { %v5437_v56 = vpop.f32.mrf.mxu1  ;;  %v4085_v58 = vld [vmem:[#allocation4 + $0x40] sm:$0xff] }
 0x301   : > { %3846 = vst.msk [vmem:[#allocation4 + $0x50] sm:$0xff] %vm567_vm6, %v3828_v50  ;;  %v4103_v32 = vadd.f32 %v4085_v58, %v4038_v21  ;;  %v5480_v53 = vpop.f32.mrf.mxu0  ;;  %v4426_v50 = vld [vmem:[#allocation4 + $0x8] sm:$0xff] }
 0x302   : > { %v3772_v41 = vpop.f32.mrf.mxu1 }
 0x303   : > { %v3829_v59 = vadd.f32 %v3811_v38, %v3772_v41  ;;  %4121 = vst.msk [vmem:[#allocation4 + $0x40] sm:$0xff] %vm567_vm6, %v4103_v32  ;;  %v4062_v1 = vpop.f32.mrf.mxu0  ;;  %v6787_v32 = vld [vmem:[%s6884_s4] ss:$0 sm:$0xff]  ;;  %v4427_v38 = vld [vmem:[#allocation4 + $0x10] sm:$0xff] }
 0x304   : > { %v5438_v62 = vpop.f32.mrf.mxu1  ;;  %v4086_v0 = vld [vmem:[#allocation4 + $0x48] sm:$0xff] }
 0x305   : > { %3847 = vst.msk [vmem:[#allocation4 + $0x58] sm:$0xff] %vm567_vm6, %v3829_v59  ;;  %v4104_v60 = vadd.f32 %v4086_v0, %v4041_v14  ;;  %v5483_v11 = vpop.f32.mrf.mxu0 }
 0x306   : > { %v3777_v3 = vpop.f32.mrf.mxu1 }
 0x307   : > { %v3830_v23 = vadd.f32 %v3812_v9, %v3777_v3  ;;  %4122 = vst.msk [vmem:[#allocation4 + $0x48] sm:$0xff] %vm567_vm6, %v4104_v60  ;;  %v4065_v36 = vpop.f32.mrf.mxu0  ;;  %v4428_v60 = vld [vmem:[#allocation4 + $0x18] sm:$0xff] }
 0x308   : > { %v5441_v5 = vpop.f32.mrf.mxu1  ;;  %v4087_v10 = vld [vmem:[#allocation4 + $0x50] sm:$0xff] }
 0x309   : > { %3848 = vst.msk [vmem:[#allocation4 + $0x60] sm:$0xff] %vm567_vm6, %v3830_v23  ;;  %v4105_v63 = vadd.f32 %v4087_v10, %v4046_v26  ;;  %v5484_v2 = vpop.f32.mrf.mxu0 }
 0x30a   : > { %v3780_v7 = vpop.f32.mrf.mxu1 }
 0x30b   : > { %v3831_v16 = vadd.f32 %v3813_v15, %v3780_v7  ;;  %4123 = vst.msk [vmem:[#allocation4 + $0x50] sm:$0xff] %vm567_vm6, %v4105_v63  ;;  %v4070_v21 = vpop.f32.mrf.mxu0 }
 0x30c   : > { %v5442_v18 = vpop.f32.mrf.mxu1  ;;  %v4088_v20 = vld [vmem:[#allocation4 + $0x58] sm:$0xff] }
 0x30d   : > { %3849 = vst.msk [vmem:[#allocation4 + $0x68] sm:$0xff] %vm567_vm6, %v3831_v16  ;;  %v4106_v6 = vadd.f32 %v4088_v20, %v4049_v44  ;;  %v5487_v24 = vpop.f32.mrf.mxu0  ;;  %v3817_v44 = vld [vmem:[#allocation4 + $0x88] sm:$0xff] }
 0x30e   : > { %v3785_v13 = vpop.f32.mrf.mxu1  ;;  %v4430_v20 = vld [vmem:[#allocation4 + $0x28] sm:$0xff] }
 0x30f   : > { %v3832_v22 = vadd.f32 %v3814_v57, %v3785_v13  ;;  %4124 = vst.msk [vmem:[#allocation4 + $0x58] sm:$0xff] %vm567_vm6, %v4106_v6  ;;  %v4073_v14 = vpop.f32.mrf.mxu0 }
 0x310   : > { %v5445_v27 = vpop.f32.mrf.mxu1  ;;  %v4089_v42 = vld [vmem:[#allocation4 + $0x60] sm:$0xff] }
 0x311   : > { %3850 = vst.msk [vmem:[#allocation4 + $0x70] sm:$0xff] %vm567_vm6, %v3832_v22  ;;  %v4107_v19 = vadd.f32 %v4089_v42, %v4054_v40  ;;  %v5488_v33 = vpop.f32.mrf.mxu0  ;;  %v4431_v27 = vld [vmem:[#allocation4 + $0x30] sm:$0xff] }
 0x312   : > { %v3788_v17 = vpop.f32.mrf.mxu1  ;;  %v4432_v33 = vld [vmem:[#allocation4 + $0x38] sm:$0xff] }
 0x313   : > { %v3833_v31 = vadd.f32 %v3815_v25, %v3788_v17  ;;  %4125 = vst.msk [vmem:[#allocation4 + $0x60] sm:$0xff] %vm567_vm6, %v4107_v19 }
 0x314   : > { %v5446_v4 = vpop.f32.mrf.mxu1  ;;  %v4090_v34 = vld [vmem:[#allocation4 + $0x68] sm:$0xff] }
 0x315   : > { %3851 = vst.msk [vmem:[#allocation4 + $0x78] sm:$0xff] %vm567_vm6, %v3833_v31  ;;  %v4108_v26 = vadd.f32 %v4090_v34, %v4057_v61 }
 0x316   : > { %v3793_v37 = vpop.f32.mrf.mxu1 }
 0x317   : > { %v3834_v46 = vadd.f32 %v3816_v28, %v3793_v37  ;;  %4126 = vst.msk [vmem:[#allocation4 + $0x68] sm:$0xff] %vm567_vm6, %v4108_v26 }
 0x318   : > { %v5449_v12 = vpop.f32.mrf.mxu1  ;;  %v4091_v39 = vld [vmem:[#allocation4 + $0x70] sm:$0xff] }
 0x319   : > { %3852 = vst.msk [vmem:[#allocation4 + $0x80] sm:$0xff] %vm567_vm6, %v3834_v46  ;;  %v4109_v43 = vadd.f32 %v4091_v39, %v4062_v1  ;;  %v4433_v12 = vld [vmem:[#allocation4 + $0x40] sm:$0xff] }
 0x31a   : > { %v3796_v35 = vpop.f32.mrf.mxu1 }
 0x31b   : > { %v3835_v29 = vadd.f32 %v3817_v44, %v3796_v35  ;;  %4127 = vst.msk [vmem:[#allocation4 + $0x70] sm:$0xff] %vm567_vm6, %v4109_v43 }
 0x31c   : > { %v5450_v30 = vpop.f32.mrf.mxu1  ;;  %v4092_v49 = vld [vmem:[#allocation4 + $0x78] sm:$0xff] }
 0x31d   : > { %3853 = vst.msk [vmem:[#allocation4 + $0x88] sm:$0xff] %vm567_vm6, %v3835_v29  ;;  %v4110_v8 = vadd.f32 %v4092_v49, %v4065_v36  ;;  %v4429_v36 = vld [vmem:[#allocation4 + $0x20] sm:$0xff]  ;;  %v4434_v49 = vld [vmem:[#allocation4 + $0x48] sm:$0xff] }
 0x31e   : > { %v4354_v51 = vpop.f32.mrf.mxu1 }
 0x31f   : > { %v4443_v45 = vadd.f32 %v4425_v48, %v4354_v51  ;;  %4128 = vst.msk [vmem:[#allocation4 + $0x78] sm:$0xff] %vm567_vm6, %v4110_v8 }
 0x320   : > { %v5493_v40 = vpop.f32.mrf.mxu1  ;;  %v4093_v52 = vld [vmem:[#allocation4 + $0x80] sm:$0xff] }
 0x321   : > { %4461 = vst.msk [vmem:[#allocation4] sm:$0xff] %vm567_vm6, %v4443_v45  ;;  %v4111_v54 = vadd.f32 %v4093_v52, %v4070_v21 }
 0x322   : > { %v4357_v47 = vpop.f32.mrf.mxu1 }
 0x323   : > { %v4444_v55 = vadd.f32 %v4426_v50, %v4357_v47  ;;  %4129 = vst.msk [vmem:[#allocation4 + $0x80] sm:$0xff] %vm567_vm6, %v4111_v54  ;;  %v4435_v54 = vld [vmem:[#allocation4 + $0x50] sm:$0xff] }
 0x324   : > { %v5494_v56 = vpop.f32.mrf.mxu1  ;;  %v4094_v58 = vld [vmem:[#allocation4 + $0x88] sm:$0xff] }
 0x325   : > { %4462 = vst.msk [vmem:[#allocation4 + $0x8] sm:$0xff] %vm567_vm6, %v4444_v55  ;;  %v4112_v61 = vadd.f32 %v4094_v58, %v4073_v14 }
 0x326   : > { %v4362_v41 = vpop.f32.mrf.mxu1 }
 0x327   : > { %v4445_v59 = vadd.f32 %v4427_v38, %v4362_v41  ;;  %4130 = vst.msk [vmem:[#allocation4 + $0x88] sm:$0xff] %vm567_vm6, %v4112_v61  ;;  %v4436_v41 = vld [vmem:[#allocation4 + $0x58] sm:$0xff] }
 0x328   : > { %v4479_v53 = vld [vmem:[#allocation4] sm:$0xff]  ;;  %v5497_v62 = vpop.f32.mrf.mxu1 }
 0x329   : > { %v4504_v0 = vadd.f32 %v6787_v32, %v4479_v53  ;;  %4463 = vst.msk [vmem:[#allocation4 + $0x10] sm:$0xff] %vm567_vm6, %v4445_v59 }
 0x32a   : > { %v4365_v1 = vpop.f32.mrf.mxu1 }
 0x32b   : > { %v4522_v3 = vmax.f32 %v4504_v0, 0.0  ;;  %v4446_v9 = vadd.f32 %v4428_v60, %v4365_v1  ;;  %v4437_v60 = vld [vmem:[#allocation4 + $0x60] sm:$0xff] }
 0x32c   : > { %v4480_v23 = vld [vmem:[#allocation4 + $0x8] sm:$0xff]  ;;  %v5498_v11 = vpop.f32.mrf.mxu1 }
 0x32d   : > { %4540 = vst.msk [vmem:[%s6795_s14] sm:$0xff] %vm567_vm6, %v4522_v3  ;;  %v4505_v5 = vadd.f32 %v6787_v32, %v4480_v23  ;;  %4464 = vst.msk [vmem:[#allocation4 + $0x18] sm:$0xff] %vm567_vm6, %v4446_v9 }
 0x32e   : > { %v4370_v10 = vpop.f32.mrf.mxu1 }
 0x32f   : > { %v4523_v63 = vmax.f32 %v4505_v5, 0.0  ;;  %v4447_v7 = vadd.f32 %v4429_v36, %v4370_v10  ;;  %v4438_v36 = vld [vmem:[#allocation4 + $0x68] sm:$0xff] }
 0x330   : > { %v4481_v15 = vld [vmem:[#allocation4 + $0x10] sm:$0xff]  ;;  %v5501_v16 = vpop.f32.mrf.mxu1 }
 0x331   : > { %4541 = vst.msk [vmem:[%s6795_s14 + $0x8] sm:$0xff] %vm567_vm6, %v4523_v63  ;;  %v4506_v2 = vadd.f32 %v6787_v32, %v4481_v15  ;;  %4465 = vst.msk [vmem:[#allocation4 + $0x20] sm:$0xff] %vm567_vm6, %v4447_v7 }
 0x332   : > { %v4373_v18 = vpop.f32.mrf.mxu1 }
 0x333   : > { %v4524_v21 = vmax.f32 %v4506_v2, 0.0  ;;  %v4448_v6 = vadd.f32 %v4430_v20, %v4373_v18  ;;  %v4439_v20 = vld [vmem:[#allocation4 + $0x70] sm:$0xff] }
 0x334   : > { %v4482_v13 = vld [vmem:[#allocation4 + $0x18] sm:$0xff]  ;;  %v5502_v57 = vpop.f32.mrf.mxu1 }
 0x335   : > { %4542 = vst.msk [vmem:[%s6795_s14 + $0x10] sm:$0xff] %vm567_vm6, %v4524_v21  ;;  %v4507_v22 = vadd.f32 %v6787_v32, %v4482_v13  ;;  %4466 = vst.msk [vmem:[#allocation4 + $0x28] sm:$0xff] %vm567_vm6, %v4448_v6 }
 0x336   : > { %v4378_v24 = vpop.f32.mrf.mxu1 }
 0x337   : > { %v4525_v42 = vmax.f32 %v4507_v22, 0.0  ;;  %v4449_v14 = vadd.f32 %v4431_v27, %v4378_v24  ;;  %v4440_v27 = vld [vmem:[#allocation4 + $0x78] sm:$0xff] }
 0x338   : > { %v4483_v19 = vld [vmem:[#allocation4 + $0x20] sm:$0xff]  ;;  %v5505_v17 = vpop.f32.mrf.mxu1 }
 0x339   : > { %4543 = vst.msk [vmem:[%s6795_s14 + $0x18] sm:$0xff] %vm567_vm6, %v4525_v42  ;;  %v4508_v25 = vadd.f32 %v6787_v32, %v4483_v19  ;;  %4467 = vst.msk [vmem:[#allocation4 + $0x30] sm:$0xff] %vm567_vm6, %v4449_v14 }
 0x33a   : > { %v4381_v31 = vpop.f32.mrf.mxu1 }
 0x33b   : > { %v4526_v4 = vmax.f32 %v4508_v25, 0.0  ;;  %v4450_v34 = vadd.f32 %v4432_v33, %v4381_v31  ;;  %v4441_v33 = vld [vmem:[#allocation4 + $0x80] sm:$0xff] }
 0x33c   : > { %v4484_v26 = vld [vmem:[#allocation4 + $0x28] sm:$0xff]  ;;  %v5506_v37 = vpop.f32.mrf.mxu1 }
 0x33d   : > { %4544 = vst.msk [vmem:[%s6795_s14 + $0x20] sm:$0xff] %vm567_vm6, %v4526_v4  ;;  %v4509_v28 = vadd.f32 %v6787_v32, %v4484_v26  ;;  %4468 = vst.msk [vmem:[#allocation4 + $0x38] sm:$0xff] %vm567_vm6, %v4450_v34 }
 0x33e   : > { %v4386_v46 = vpop.f32.mrf.mxu1 }
 0x33f   : > { %v4527_v39 = vmax.f32 %v4509_v28, 0.0  ;;  %v4451_v43 = vadd.f32 %v4433_v12, %v4386_v46  ;;  %v4442_v12 = vld [vmem:[#allocation4 + $0x88] sm:$0xff] }
 0x340   : > { %v4485_v35 = vld [vmem:[#allocation4 + $0x30] sm:$0xff]  ;;  %v5509_v44 = vpop.f32.mrf.mxu1 }
 0x341   : > { %4545 = vst.msk [vmem:[%s6795_s14 + $0x28] sm:$0xff] %vm567_vm6, %v4527_v39  ;;  %v4510_v29 = vadd.f32 %v6787_v32, %v4485_v35  ;;  %4469 = vst.msk [vmem:[#allocation4 + $0x40] sm:$0xff] %vm567_vm6, %v4451_v43 }
 0x342   : > { %v4389_v30 = vpop.f32.mrf.mxu1 }
 0x343   : > { %v4528_v8 = vmax.f32 %v4510_v29, 0.0  ;;  %v4452_v51 = vadd.f32 %v4434_v49, %v4389_v30 }
 0x344   : > { %v4486_v48 = vld [vmem:[#allocation4 + $0x38] sm:$0xff]  ;;  %v5510_v45 = vpop.f32.mrf.mxu1 }
 0x345   : > { %4546 = vst.msk [vmem:[%s6795_s14 + $0x30] sm:$0xff] %vm567_vm6, %v4528_v8  ;;  %v4511_v40 = vadd.f32 %v6787_v32, %v4486_v48  ;;  %4470 = vst.msk [vmem:[#allocation4 + $0x48] sm:$0xff] %vm567_vm6, %v4452_v51 }
 0x346   : > { %v4394_v52 = vpop.f32.mrf.mxu1 }
 0x347   : > { %v4529_v47 = vmax.f32 %v4511_v40, 0.0  ;;  %v4453_v50 = vadd.f32 %v4435_v54, %v4394_v52 }
 0x348   : > { %v4487_v55 = vld [vmem:[#allocation4 + $0x40] sm:$0xff]  ;;  %v5513_v56 = vpop.f32.mrf.mxu1 }
 0x349   : > { %4547 = vst.msk [vmem:[%s6795_s14 + $0x38] sm:$0xff] %vm567_vm6, %v4529_v47  ;;  %v4512_v58 = vadd.f32 %v6787_v32, %v4487_v55  ;;  %4471 = vst.msk [vmem:[#allocation4 + $0x50] sm:$0xff] %vm567_vm6, %v4453_v50 }
 0x34a   : > { %v4397_v61 = vpop.f32.mrf.mxu1 }
 0x34b   : > { %v4530_v38 = vmax.f32 %v4512_v58, 0.0  ;;  %v4454_v59 = vadd.f32 %v4436_v41, %v4397_v61 }
 0x34c   : > { %v4488_v53 = vld [vmem:[#allocation4 + $0x48] sm:$0xff]  ;;  %v5514_v62 = vpop.f32.mrf.mxu1 }
 0x34d   : > { %4548 = vst.msk [vmem:[%s6795_s14 + $0x40] sm:$0xff] %vm567_vm6, %v4530_v38  ;;  %v4513_v0 = vadd.f32 %v6787_v32, %v4488_v53  ;;  %4472 = vst.msk [vmem:[#allocation4 + $0x58] sm:$0xff] %vm567_vm6, %v4454_v59 }
 0x34e   : > { %v4402_v1 = vpop.f32.mrf.mxu1 }
 0x34f   : > { %v4531_v3 = vmax.f32 %v4513_v0, 0.0  ;;  %v4455_v9 = vadd.f32 %v4437_v60, %v4402_v1 }
 0x350   : > { %v4489_v23 = vld [vmem:[#allocation4 + $0x50] sm:$0xff]  ;;  %v5517_v11 = vpop.f32.mrf.mxu1 }
 0x351   : > { %4549 = vst.msk [vmem:[%s6795_s14 + $0x48] sm:$0xff] %vm567_vm6, %v4531_v3  ;;  %v4514_v5 = vadd.f32 %v6787_v32, %v4489_v23  ;;  %4473 = vst.msk [vmem:[#allocation4 + $0x60] sm:$0xff] %vm567_vm6, %v4455_v9 }
 0x352   : > { %v4405_v10 = vpop.f32.mrf.mxu1 }
 0x353   : > { %v4532_v63 = vmax.f32 %v4514_v5, 0.0  ;;  %v4456_v7 = vadd.f32 %v4438_v36, %v4405_v10 }
 0x354   : > { %v4490_v15 = vld [vmem:[#allocation4 + $0x58] sm:$0xff]  ;;  %v5518_v16 = vpop.f32.mrf.mxu1 }
 0x355   : > { %4550 = vst.msk [vmem:[%s6795_s14 + $0x50] sm:$0xff] %vm567_vm6, %v4532_v63  ;;  %v4515_v2 = vadd.f32 %v6787_v32, %v4490_v15  ;;  %4474 = vst.msk [vmem:[#allocation4 + $0x68] sm:$0xff] %vm567_vm6, %v4456_v7 }
 0x356   : > { %v4410_v18 = vpop.f32.mrf.mxu1 }
 0x357   : > { %v4533_v21 = vmax.f32 %v4515_v2, 0.0  ;;  %v4457_v6 = vadd.f32 %v4439_v20, %v4410_v18 }
 0x358   : > { %v4491_v13 = vld [vmem:[#allocation4 + $0x60] sm:$0xff]  ;;  %v5521_v57 = vpop.f32.mrf.mxu1 }
 0x359   : > { %4551 = vst.msk [vmem:[%s6795_s14 + $0x58] sm:$0xff] %vm567_vm6, %v4533_v21  ;;  %v4516_v22 = vadd.f32 %v6787_v32, %v4491_v13  ;;  %4475 = vst.msk [vmem:[#allocation4 + $0x70] sm:$0xff] %vm567_vm6, %v4457_v6 }
 0x35a   : > { %v4413_v24 = vpop.f32.mrf.mxu1 }
 0x35b   : > { %v4534_v42 = vmax.f32 %v4516_v22, 0.0  ;;  %v4458_v14 = vadd.f32 %v4440_v27, %v4413_v24 }
 0x35c   : > { %v4492_v19 = vld [vmem:[#allocation4 + $0x68] sm:$0xff]  ;;  %v5522_v17 = vpop.f32.mrf.mxu1 }
 0x35d   : > { %4552 = vst.msk [vmem:[%s6795_s14 + $0x60] sm:$0xff] %vm567_vm6, %v4534_v42  ;;  %v4517_v25 = vadd.f32 %v6787_v32, %v4492_v19  ;;  %4476 = vst.msk [vmem:[#allocation4 + $0x78] sm:$0xff] %vm567_vm6, %v4458_v14 }
 0x35e   : > { %v4418_v31 = vpop.f32.mrf.mxu1 }
 0x35f   : > { %v4535_v4 = vmax.f32 %v4517_v25, 0.0  ;;  %v4459_v34 = vadd.f32 %v4441_v33, %v4418_v31 }
 0x360   : > { %v4493_v26 = vld [vmem:[#allocation4 + $0x70] sm:$0xff]  ;;  %v5525_v37 = vpop.f32.mrf.mxu1 }
 0x361   : > { %4553 = vst.msk [vmem:[%s6795_s14 + $0x68] sm:$0xff] %vm567_vm6, %v4535_v4  ;;  %v4518_v28 = vadd.f32 %v6787_v32, %v4493_v26  ;;  %4477 = vst.msk [vmem:[#allocation4 + $0x80] sm:$0xff] %vm567_vm6, %v4459_v34 }
 0x362   : > { %v4421_v46 = vpop.f32.mrf.mxu1 }
 0x363   : > { %v4536_v39 = vmax.f32 %v4518_v28, 0.0  ;;  %v4460_v43 = vadd.f32 %v4442_v12, %v4421_v46 }
 0x364   : > { %v4494_v35 = vld [vmem:[#allocation4 + $0x78] sm:$0xff]  ;;  %v5526_v44 = vpop.f32.mrf.mxu1 }
 0x365   : > { %4554 = vst.msk [vmem:[%s6795_s14 + $0x70] sm:$0xff] %vm567_vm6, %v4536_v39  ;;  %v4519_v29 = vadd.f32 %v6787_v32, %v4494_v35  ;;  %4478 = vst.msk [vmem:[#allocation4 + $0x88] sm:$0xff] %vm567_vm6, %v4460_v43 }
 0x367   : > { %v4537_v30 = vmax.f32 %v4519_v29, 0.0 }
 0x368   : > { %v4495_v49 = vld [vmem:[#allocation4 + $0x80] sm:$0xff] }
 0x369   : > { %4555 = vst.msk [vmem:[%s6795_s14 + $0x78] sm:$0xff] %vm567_vm6, %v4537_v30  ;;  %v4520_v8 = vadd.f32 %v6787_v32, %v4495_v49 }
 0x36b   : > { %v4538_v51 = vmax.f32 %v4520_v8, 0.0 }
 0x36c   : > { %v4496_v48 = vld [vmem:[#allocation4 + $0x88] sm:$0xff] }
 0x36d   : > { %4556 = vst.msk [vmem:[%s6795_s14 + $0x80] sm:$0xff] %vm567_vm6, %v4538_v51  ;;  %v4521_v45 = vadd.f32 %v6787_v32, %v4496_v48 }
 0x36f   : > { %v4539_v40 = vmax.f32 %v4521_v45, 0.0 }
 0x371   : > { %4557 = vst.msk [vmem:[%s6795_s14 + $0x88] sm:$0xff] %vm567_vm6, %v4539_v40 }
 0x372 PF: > { %s16_s25 = sadd.s32 1, %s5748_s25   ;;  %s6887_s21 = smov %s5740_s23 }
 0x373   : > { %p13_p8 = scmp.ge.s32.totalorder %s16_s25, 6   ;;  %s6888_s22 = smov %s5744_s24 }
 0x374   : > { %s6889_s23 = smov %s6892_s26  ;;  %s6890_s24 = smov %s6896_s27 }
 0x375   :  { %15 = sbr.rel (!%p13_p8) target bundleno = 3 (0x3), region = 87 }

</bundles_post_ra>
